<compile_context>
chip_gen: v5e
topology: v5e:2x2
jax: 0.10.0
libtpu: 0.0.40
codegen_flags: <defaults>
</compile_context>

<pallas_src>
import math

import jax
import jax.numpy as jnp
from jax import lax
from jax.experimental import pallas as pl
from jax.experimental.pallas import tpu as pltpu

MIN_NORM = 1e-15
PROJ_EPS = 4e-3           # float32 eps used by HGCN PoincareBall.proj
BIG = 1e30
NEG_BIG = -1e30
TN = 128                  # node-tile rows   (output block sublanes)
TE = 128                  # edge-tile lanes  (raise to 256 on v6e/v7x after trimming temps)
VMEM_LIMIT = 32 * 1024 * 1024   # actual use is <1 MiB; safe on v5e/v6e/v7x


def _artanh(z):
    z = jnp.clip(z, -1.0 + 1e-7, 1.0 - 1e-7)
    return 0.5 * jnp.log((1.0 + z) / (1.0 - z))


def _round_up(v, m):
    return ((v + m - 1) // m) * m


# ---------------------------------------------------------------------------
# Kernel A: per-node logmap0_c(x); the node "level" (Poincare c=1 distance to
# the origin) is packed into spare lane `d_real` of the same lane-dense block.
# ---------------------------------------------------------------------------
def _make_node_kernel(c, d_real):
    sqrt_c = math.sqrt(c)

    def kernel(x_ref, h_ref):
        x = x_ref[...]                                        # (TA, Dp) f32
        dp = x.shape[-1]
        sq = jnp.sum(x * x, axis=-1, keepdims=True)
        x_norm = jnp.maximum(jnp.sqrt(sq), MIN_NORM)
        level = 2.0 * _artanh(jnp.minimum(x_norm, 1.0 - 1e-5))
        scn = sqrt_c * x_norm
        h_tan = _artanh(scn) * pl.reciprocal(scn, approx=True) * x
        lane = lax.broadcasted_iota(jnp.int32, (1, dp), 1)
        is_lvl = (lane == d_real).astype(jnp.float32)
        # lane d_real of x is zero padding, so h_tan there is 0: just add.
        h_ref[...] = h_tan + level * is_lvl

    return kernel


# ---------------------------------------------------------------------------
# Kernel B: 1-D grid over edge tiles (each tile targets exactly one node tile).
#   curvature MLP (rank-1, VPU) -> flash-style segment softmax ->
#   (TN,TE)@(TE,Dp) MXU scatter-sum -> normalize + expmap0 + proj on finalize.
# ---------------------------------------------------------------------------
def _make_edge_kernel(c, d_real, mxu_dtype):
    sqrt_c = math.sqrt(c)

    def kernel(blk_ref, fst_ref, lst_ref,                 # scalar prefetch (SMEM)
               meta_ref, hsrc_ref,                        # per-edge streams (VMEM)
               w1_ref, b1_ref, w2_ref, b2_ref,            # MLP params (VMEM)
               out_ref,                                   # (TN, Dp) output block
               m_scr, l_scr, acc_scr):                    # scratch
        ei = pl.program_id(0)
        dp = acc_scr.shape[-1]

        # ---- init online-softmax state on the first tile of a node block ----
        @pl.when(fst_ref[ei] == 1)
        def _():
            m_scr[...] = jnp.full_like(m_scr, NEG_BIG)
            l_scr[...] = jnp.zeros_like(l_scr)
            acc_scr[...] = jnp.zeros_like(acc_scr)

        meta = meta_ref[...]                               # (2, TE) f32
        rel = meta[0:1, :]                                 # relative target row; -1 for pads
        mlp_in = meta[1:2, :]                              # kappa - |level_i - level_j|
        in_range = rel >= 0.0                              # (1, TE) lane-only test

        # ---- curvature MLP: rank-1 layers on the VPU, one small XLU reduce ----
        hdn = w1_ref[...] * mlp_in + b1_ref[...]           # (64, TE)
        hdn = jnp.where(hdn > 0, hdn, 0.2 * hdn)           # LeakyReLU(0.2)
        curv = jnp.sum(hdn * w2_ref[...], axis=0, keepdims=True) + b2_ref[...]  # (1,TE)

        # ---- membership mask of the (single) target node tile of this tile ----
        row_ids = lax.broadcasted_iota(jnp.int32, (TN, 1), 0).astype(jnp.float32)
        maskf = (row_ids == rel).astype(jnp.float32)       # (TN, TE); rel < 128 so f32 exact

        # ---- flash-style segment softmax over edges grouped by target ----------
        masked_curv = curv + (maskf - 1.0) * BIG           # (TN, TE)
        m_old = m_scr[...]                                 # (TN, 1)
        m_new = jnp.maximum(m_old, jnp.max(masked_curv, axis=1, keepdims=True))
        shift = jnp.sum(maskf * m_new, axis=0, keepdims=True)   # (1,TE): m of own row
        p = jnp.where(in_range, jnp.exp(curv - shift), 0.0)     # (1,TE)
        wmask = maskf * p                                        # (TN,TE)
        alpha = jnp.exp(m_old - m_new)                           # (TN,1)
        l_scr[...] = alpha * l_scr[...] + jnp.sum(wmask, axis=1, keepdims=True)
        # only MXU op: weighted scatter-sum of the pre-gathered messages (bf16 in)
        acc_scr[...] = alpha * acc_scr[...] + jnp.dot(
            wmask.astype(mxu_dtype), hsrc_ref[...].astype(mxu_dtype),
            preferred_element_type=jnp.float32)
        m_scr[...] = m_new

        # ---- finalize: normalize, expmap0, proj, lane-dense store --------------
        @pl.when(lst_ref[ei] == 1)
        def _():
            lane = lax.broadcasted_iota(jnp.int32, (1, dp), 1)
            not_lvl = (lane != d_real).astype(jnp.float32)
            inv_l = pl.reciprocal(l_scr[...] + 1e-16, approx=True)
            xc = acc_scr[...] * inv_l * not_lvl            # drop the packed level lane
            sq = jnp.sum(xc * xc, axis=-1, keepdims=True)
            u_norm = jnp.maximum(jnp.sqrt(sq), MIN_NORM)
            su = sqrt_c * u_norm
            gamma = jnp.tanh(su) * pl.reciprocal(su, approx=True) * xc
            gsq = jnp.sum(gamma * gamma, axis=-1, keepdims=True)
            g_norm = jnp.maximum(jnp.sqrt(gsq), MIN_NORM)
            maxnorm = (1.0 - PROJ_EPS) / sqrt_c
            clipped = gamma * (maxnorm * pl.reciprocal(g_norm, approx=True))
            out_ref[...] = jnp.where(g_norm > maxnorm, clipped, gamma)

    return kernel


# ---------------------------------------------------------------------------
# Wrapper
# ---------------------------------------------------------------------------
def hyp_agg_curv_att(x, edge_index, curvature, params, c=1.0,
                     mxu_dtype=jnp.bfloat16):
    """Forward pass of HypAggCurvAtt (agg_type='curv', eval mode).

    mxu_dtype only controls the MXU operand dtype of the scatter matmul;
    accumulation and all elementwise math stay float32 (v5e-safe).
    """
    N, D = x.shape
    E = edge_index.shape[1]
    W1, b1, W2, b2 = params                      # (64,1), (64,1), (64,1), (1,1)

    Dp = _round_up(D + 1, 128)                   # +1 lane carries the node level
    Np = _round_up(N, TN)
    n_node_tiles = Np // TN

    # ---- Kernel A: logmap0 + node level (mem-bound; use big row blocks) ------
    TA = TN
    for cand in (1024, 512, 256):
        if Np % cand == 0:
            TA = cand
            break
    x_pad = jnp.zeros((Np, Dp), jnp.float32).at[:N, :D].set(x.astype(jnp.float32))
    h_ext = pl.pallas_call(
        _make_node_kernel(c, D),
        out_shape=jax.ShapeDtypeStruct((Np, Dp), jnp.float32),
        grid=(Np // TA,),
        in_specs=[pl.BlockSpec((TA, Dp), lambda i: (i, 0))],
        out_specs=pl.BlockSpec((TA, Dp), lambda i: (i, 0)),
        compiler_params=pltpu.CompilerParams(
            dimension_semantics=("parallel",),
            vmem_limit_bytes=VMEM_LIMIT),
    )(x_pad)
    level = h_ext[:, D]                                        # (Np,) node levels

    # ---- glue: sort edges by target, bucket per node tile, pad to TE ---------
    edge_i = edge_index[0].astype(jnp.int32)
    edge_j = edge_index[1].astype(jnp.int32)
    order = jnp.argsort(edge_i)
    edge_i = edge_i[order]
    edge_j = edge_j[order]
    kappa = curvature.reshape(-1)[order].astype(jnp.float32)

    # per-edge MLP input precomputed here (replaces in-kernel level plumbing)
    mlp_in = kappa - jnp.abs(level[edge_i] - level[edge_j])    # (E,)

    nt = edge_i // TN                                          # node tile of each edge
    counts = jax.ops.segment_sum(jnp.ones((E,), jnp.int32), nt,
                                 num_segments=n_node_tiles)
    caps = jnp.maximum(((counts + TE - 1) // TE) * TE, TE)     # >= 1 tile per node tile
    base = jnp.concatenate([jnp.zeros((1,), caps.dtype), jnp.cumsum(caps)[:-1]])
    grp_start = jnp.concatenate([jnp.zeros((1,), counts.dtype),
                                 jnp.cumsum(counts)[:-1]])
    pos = base[nt] + (jnp.arange(E, dtype=jnp.int32) - grp_start[nt])

    Ep = _round_up(E, TE) + n_node_tiles * TE                  # static upper bound
    n_edge_tiles = Ep // TE

    rel_p = jnp.full((Ep,), -1.0, jnp.float32).at[pos].set(
        (edge_i % TN).astype(jnp.float32))                     # < 128 -> exact in f32
    mlpin_p = jnp.zeros((Ep,), jnp.float32).at[pos].set(mlp_in)
    meta = jnp.stack([rel_p, mlpin_p])                         # (2, Ep)

    # wrapper-side gather of source messages (replaces the in-kernel scalar loop)
    h_src = jnp.zeros((Ep, Dp), mxu_dtype).at[pos].set(
        h_ext[edge_j].astype(mxu_dtype))

    # per-edge-tile target block + first/last flags (scalar prefetch)
    tile_start = (base // TE).astype(jnp.int32)                # start tile of each block
    tile_ids = jnp.arange(n_edge_tiles, dtype=jnp.int32)
    blk = (jnp.searchsorted(tile_start, tile_ids, side="right") - 1).astype(jnp.int32)
    change = (blk[1:] != blk[:-1]).astype(jnp.int32)
    is_first = jnp.concatenate([jnp.ones((1,), jnp.int32), change])
    is_last = jnp.concatenate([change, jnp.ones((1,), jnp.int32)])

    # ---- Kernel B: MLP + segment softmax + scatter-sum + expmap0/proj --------
    grid_spec = pltpu.PrefetchScalarGridSpec(
        num_scalar_prefetch=3,                    # blk, is_first, is_last
        grid=(n_edge_tiles,),
        in_specs=[
            pl.BlockSpec((2, TE), lambda ei, *_: (0, ei)),     # packed edge metadata
            pl.BlockSpec((TE, Dp), lambda ei, *_: (ei, 0)),    # pre-gathered messages
            pl.BlockSpec((64, 1), lambda ei, *_: (0, 0)),      # W1
            pl.BlockSpec((64, 1), lambda ei, *_: (0, 0)),      # b1
            pl.BlockSpec((64, 1), lambda ei, *_: (0, 0)),      # W2
            pl.BlockSpec((1, 1), lambda ei, *_: (0, 0)),       # b2
        ],
        out_specs=pl.BlockSpec((TN, Dp), lambda ei, blk_ref, *_: (blk_ref[ei], 0)),
        scratch_shapes=[
            pltpu.VMEM((TN, 1), jnp.float32),    # running segment max  m
            pltpu.VMEM((TN, 1), jnp.float32),    # running denominator  l
            pltpu.VMEM((TN, Dp), jnp.float32),   # weighted-message accumulator
        ],
    )
    out_pad = pl.pallas_call(
        _make_edge_kernel(c, D, mxu_dtype),
        out_shape=jax.ShapeDtypeStruct((Np, Dp), jnp.float32),
        grid_spec=grid_spec,
        compiler_params=pltpu.CompilerParams(
            dimension_semantics=("arbitrary",),
            vmem_limit_bytes=VMEM_LIMIT),
    )(blk, is_first, is_last, meta, h_src, W1, b1, W2, b2)

    return out_pad[:N, :D]


def init_params(key):
    """Deterministic init matching the module's kaiming-uniform bounds."""
    k1, k2, k3, k4 = jax.random.split(key, 4)
    # Linear(1, 64): fan_in = 1 -> weight bound 1.0, bias bound 1.0  (stored (64,1))
    W1 = jax.random.uniform(k1, (64, 1), jnp.float32, -1.0, 1.0)
    b1 = jax.random.uniform(k2, (64, 1), jnp.float32, -1.0, 1.0)
    # Linear(64, 1): fan_in = 64 -> bounds 1/8                       (stored (64,1))
    W2 = jax.random.uniform(k3, (64, 1), jnp.float32, -0.125, 0.125)
    b2 = jax.random.uniform(k4, (1, 1), jnp.float32, -0.125, 0.125)
    return W1, b1, W2, b2


def reference_forward(x, edge_index, curvature, params, c=1.0):
    """Pure-JAX reference of the same forward pass (for a tolerance check)."""
    W1, b1, W2, b2 = params
    sqrt_c = math.sqrt(c)
    N = x.shape[0]
    x = x.astype(jnp.float32)
    x_norm = jnp.maximum(jnp.sqrt(jnp.sum(x * x, -1, keepdims=True)), MIN_NORM)
    level = 2.0 * _artanh(jnp.minimum(x_norm, 1.0 - 1e-5))            # (N,1)
    h_tan = _artanh(sqrt_c * x_norm) / (sqrt_c * x_norm) * x          # (N,D)
    ei, ej = edge_index[0], edge_index[1]
    kap = curvature.reshape(-1, 1).astype(jnp.float32)                # (E,1)
    mlp_in = kap - jnp.abs(level[ei] - level[ej])                     # (E,1)
    hdn = mlp_in * W1[:, 0][None, :] + b1[:, 0][None, :]              # (E,64)
    hdn = jnp.where(hdn > 0, hdn, 0.2 * hdn)
    curv = hdn @ W2 + b2[0, 0]                                        # (E,1)
    seg_max = jax.ops.segment_max(curv[:, 0], ei, num_segments=N)
    expc = jnp.exp(curv[:, 0] - seg_max[ei])
    denom = jax.ops.segment_sum(expc, ei, num_segments=N)
    w = expc / (denom[ei] + 1e-16)
    x_curv = jax.ops.segment_sum(h_tan[ej] * w[:, None], ei, num_segments=N)
    u_norm = jnp.maximum(jnp.sqrt(jnp.sum(x_curv * x_curv, -1, keepdims=True)),
                         MIN_NORM)
    gamma = jnp.tanh(sqrt_c * u_norm) / (sqrt_c * u_norm) * x_curv
    g_norm = jnp.maximum(jnp.sqrt(jnp.sum(gamma * gamma, -1, keepdims=True)),
                         MIN_NORM)
    maxnorm = (1.0 - PROJ_EPS) / sqrt_c
    clipped = gamma / g_norm * maxnorm
    return jnp.where(g_norm > maxnorm, clipped, gamma)


if __name__ == "__main__":
    key = jax.random.PRNGKey(0)
    kx, kc, kp = jax.random.split(key, 3)

    # 200 graph nodes, hidden dim 32 -> (256, 128) padded nodes x lanes; 400 ring
    # edges bucketed per node tile -> 1-D grid of 6 edge tiles (4 real + 2 pad).
    N, D = 200, 32
    ids = jnp.arange(N)
    src = jnp.concatenate([ids, ids])                         # aggregation targets
    dst = jnp.concatenate([(ids + 1) % N, (ids - 1) % N])     # message sources
    edge_index = jnp.stack([src, dst]).astype(jnp.int32)      # (2, 400)
    E = edge_index.shape[1]

    x = 0.1 * jax.random.normal(kx, (N, D), jnp.float32)      # points inside the ball
    curvature = jax.random.uniform(kc, (E, 1), jnp.float32, -1.0, 1.0)
    params = init_params(kp)

    out = hyp_agg_curv_att(x, edge_index, curvature, params, c=1.0)
    out = jax.block_until_ready(out)
    assert out.shape == (N, D) and out.dtype == jnp.float32

    ref = reference_forward(x, edge_index, curvature, params, c=1.0)
    err = float(jnp.max(jnp.abs(out - ref)))
    assert bool(jnp.all(jnp.isfinite(out))) and err < 5e-2, f"max abs err {err}"
    print("KERNEL_OK")
</pallas_src>

<mosaic_0001>
module attributes {stable_mosaic.version = 11 : i64} {
  func.func @kernel(%arg0: i32, %arg1: memref<256x128xf32, #tpu.memory_space<vmem>>, %arg2: memref<256x128xf32, #tpu.memory_space<vmem>>) attributes {dimension_semantics = [#tpu.dimension_semantics<parallel>], iteration_bounds = array<i64: 1>, scalar_prefetch = 0 : i64, scratch_operands = 0 : i64, tpu.core_type = #tpu.core_type<tc>, window_params = [{transform_indices = @transform_0, window_bounds = array<i64: 256, 128>}, {transform_indices = @transform_1, window_bounds = array<i64: 256, 128>}]} {
    %c0 = arith.constant 0 : index
    %c0_0 = arith.constant 0 : index
    %0 = vector.load %arg1[%c0, %c0_0] : memref<256x128xf32, #tpu.memory_space<vmem>>, vector<256x128xf32>
    %1 = arith.mulf %0, %0 : vector<256x128xf32>
    %cst = arith.constant dense<0.000000e+00> : vector<256xf32>
    %2 = vector.multi_reduction <add>, %1, %cst [1] : vector<256x128xf32> to vector<256xf32>
    %3 = vector.shape_cast %2 : vector<256xf32> to vector<256x1xf32>
    %4 = math.sqrt %3 : vector<256x1xf32>
    %cst_1 = arith.constant 1.000000e-15 : f32
    %5 = vector.broadcast %cst_1 : f32 to vector<256x1xf32>
    %6 = arith.maximumf %4, %5 : vector<256x1xf32>
    %cst_2 = arith.constant 0.999989986 : f32
    %7 = vector.broadcast %cst_2 : f32 to vector<256x1xf32>
    %8 = arith.minimumf %6, %7 : vector<256x1xf32>
    %cst_3 = arith.constant -0.99999988 : f32
    %cst_4 = arith.constant 0.99999988 : f32
    %9 = vector.broadcast %cst_3 : f32 to vector<256x1xf32>
    %10 = arith.maximumf %9, %8 : vector<256x1xf32>
    %11 = vector.broadcast %cst_4 : f32 to vector<256x1xf32>
    %12 = arith.minimumf %11, %10 : vector<256x1xf32>
    %cst_5 = arith.constant 1.000000e+00 : f32
    %13 = vector.broadcast %cst_5 : f32 to vector<256x1xf32>
    %14 = arith.addf %13, %12 : vector<256x1xf32>
    %cst_6 = arith.constant 1.000000e+00 : f32
    %15 = vector.broadcast %cst_6 : f32 to vector<256x1xf32>
    %16 = arith.subf %15, %12 : vector<256x1xf32>
    %17 = arith.divf %14, %16 : vector<256x1xf32>
    %18 = math.log %17 : vector<256x1xf32>
    %cst_7 = arith.constant 5.000000e-01 : f32
    %19 = vector.broadcast %cst_7 : f32 to vector<256x1xf32>
    %20 = arith.mulf %19, %18 : vector<256x1xf32>
    %cst_8 = arith.constant 2.000000e+00 : f32
    %21 = vector.broadcast %cst_8 : f32 to vector<256x1xf32>
    %22 = arith.mulf %21, %20 : vector<256x1xf32>
    %cst_9 = arith.constant 1.000000e+00 : f32
    %23 = vector.broadcast %cst_9 : f32 to vector<256x1xf32>
    %24 = arith.mulf %23, %6 : vector<256x1xf32>
    %cst_10 = arith.constant -0.99999988 : f32
    %cst_11 = arith.constant 0.99999988 : f32
    %25 = vector.broadcast %cst_10 : f32 to vector<256x1xf32>
    %26 = arith.maximumf %25, %24 : vector<256x1xf32>
    %27 = vector.broadcast %cst_11 : f32 to vector<256x1xf32>
    %28 = arith.minimumf %27, %26 : vector<256x1xf32>
    %cst_12 = arith.constant 1.000000e+00 : f32
    %29 = vector.broadcast %cst_12 : f32 to vector<256x1xf32>
    %30 = arith.addf %29, %28 : vector<256x1xf32>
    %cst_13 = arith.constant 1.000000e+00 : f32
    %31 = vector.broadcast %cst_13 : f32 to vector<256x1xf32>
    %32 = arith.subf %31, %28 : vector<256x1xf32>
    %33 = arith.divf %30, %32 : vector<256x1xf32>
    %34 = math.log %33 : vector<256x1xf32>
    %cst_14 = arith.constant 5.000000e-01 : f32
    %35 = vector.broadcast %cst_14 : f32 to vector<256x1xf32>
    %36 = arith.mulf %35, %34 : vector<256x1xf32>
    %37 = tpu.reciprocal %24 {approx = true} : vector<256x1xf32> -> vector<256x1xf32>
    %38 = arith.mulf %36, %37 : vector<256x1xf32>
    %39 = vector.broadcast %38 : vector<256x1xf32> to vector<256x128xf32>
    %40 = arith.mulf %39, %0 : vector<256x128xf32>
    %41 = tpu.iota {dimensions = array<i32: 1>} : vector<1x128xi32>
    %c32_i32 = arith.constant 32 : i32
    %42 = vector.broadcast %c32_i32 : i32 to vector<1x128xi32>
    %43 = arith.cmpi eq, %41, %42 : vector<1x128xi32>
    %44 = arith.extui %43 : vector<1x128xi1> to vector<1x128xi32>
    %45 = arith.sitofp %44 : vector<1x128xi32> to vector<1x128xf32>
    %46 = vector.broadcast %22 : vector<256x1xf32> to vector<256x128xf32>
    %47 = vector.broadcast %45 : vector<1x128xf32> to vector<256x128xf32>
    %48 = arith.mulf %46, %47 : vector<256x128xf32>
    %49 = arith.addf %40, %48 : vector<256x128xf32>
    %c0_15 = arith.constant 0 : index
    %c0_16 = arith.constant 0 : index
    %50 = vector.load %arg2[%c0_15, %c0_16] : memref<256x128xf32, #tpu.memory_space<vmem>>, vector<256x128xf32>
    tpu.vector_store %arg2[%c0_15, %c0_16], %49 {strides = array<i32>} : memref<256x128xf32, #tpu.memory_space<vmem>>, vector<256x128xf32>,
    return
  }
  func.func @transform_0(%arg0: i32) -> (i32, i32) {
    %c0_i32 = arith.constant 0 : i32
    %c0_i32_0 = arith.constant 0 : i32
    return %arg0, %c0_i32 : i32, i32
  }
  func.func @transform_1(%arg0: i32) -> (i32, i32) {
    %c0_i32 = arith.constant 0 : i32
    %c0_i32_0 = arith.constant 0 : i32
    return %arg0, %c0_i32 : i32, i32
  }
}

</mosaic_0001>

<bundles_post_ra>
// kernel: tpu_custom_call.1
= control target key start
LH: loop header
LB: loop body
LE: loop exit
PB: predicated region body
PF: predicated region fallthrough
CT: control target
= control target key end

     0   :  { %6 = vsyncpa [#allocation3], 0  ;;  %s4484_s0 = inlined_call_operand.hbm [shape: f32[256,128], index: 0, kind: input, shape index: {}]   ;;  %s4485_s1 = inlined_call_operand.hbm [shape: f32[256,128], index: 1, kind: output, shape index: {}]  }
   0x1   :  { %7 = vsyncpa [#allocation4], 0  ;;  %s12_s8 = sshll.u32 %s4484_s0, 4  ;;  %s2791_s9 = smov [#allocation2]   ;;  %s13_s8 = int_to_ptr.hbm [resolvable:$true] %s12_s8 }
   0x2   :  { %s14_s10 = sshll.u32 %s2791_s9, 4  ;;  %s2792_s11 = smov 128   ;;  %s15_s10 = int_to_ptr.vmem [resolvable:$true] %s14_s10 }
   0x3   :  { %s2793_s12 = smov 8  }
   0x4   :  { %20 = dma.hbm_to_vmem [thread:$0]  %s13_s8, 4096, %s15_s10, [#allocation3], %s2792_s11, %s2792_s11, %s2793_s12  }
   0x5   :  { %2787 = dma.done.wait [#allocation3], 4096  }
   0x6   :  { %2788 = vsyncadd [#allocation3], 4294963200  ;;  %v2812_v0 = vld [vmem:[#allocation2 + $0x20] sm:$0xff]  ;;  %v2814_v1 = vld [vmem:[#allocation2 + $0x10] sm:$0xff]  ;;  %s2795_s0 = smov [#allocation5]   ;;  %s2244_s16 = sshll.u32 %s4485_s1, 4  ;;  %s2245_s16 = int_to_ptr.hbm [resolvable:$true] %s2244_s16 }
   0x7   :  { %v2816_v2 = vld [vmem:[#allocation2] sm:$0xff]  ;;  %v61_v3 = vmul.f32 %v2812_v0, %v2812_v0  ;;  %v59_v4 = vmul.f32 %v2814_v1, %v2814_v1  ;;  %v2824_v6 = vld [vmem:[#allocation2 + $0x28] sm:$0xff]  ;;  %v28_v7 = vld [vmem:[#allocation2 + $0x18] sm:$0xff]  ;;  %s2242_s13 = sshll.u32 %s2795_s0, 4  ;;  %s2243_s13 = int_to_ptr.vmem [resolvable:$true] %s2242_s13 }
   0x8   :  { %v57_v5 = vmul.f32 %v2816_v2, %v2816_v2  ;;  %v26_v8 = vld [vmem:[#allocation2 + $0x8] sm:$0xff]  ;;  %v62_v9 = vmul.f32 %v2824_v6, %v2824_v6  ;;  %v60_v10 = vmul.f32 %v28_v7, %v28_v7  ;;  %v33_v12 = vld [vmem:[#allocation2 + $0x40] sm:$0xff]  ;;  %v32_v13 = vld [vmem:[#allocation2 + $0x38] sm:$0xff] }
   0x9   :  { %97 = vadd.xlane.f32.xlu2 %v61_v3  ;;  %93 = vadd.xlane.f32.xlu1 %v59_v4  ;;  %v58_v11 = vmul.f32 %v26_v8, %v26_v8  ;;  %v31_v14 = vld [vmem:[#allocation2 + $0x30] sm:$0xff]  ;;  %v65_v15 = vmul.f32 %v33_v12, %v33_v12  ;;  %v64_v16 = vmul.f32 %v32_v13, %v32_v13  ;;  %v36_v18 = vld [vmem:[#allocation2 + $0x58] sm:$0xff]  ;;  %v34_v20 = vld [vmem:[#allocation2 + $0x48] sm:$0xff] }
   0xa   :  { %89 = vadd.xlane.f32.xlu0 %v57_v5  ;;  %v63_v17 = vmul.f32 %v31_v14, %v31_v14  ;;  %v35_v19 = vld [vmem:[#allocation2 + $0x50] sm:$0xff]  ;;  %v68_v21 = vmul.f32 %v36_v18, %v36_v18  ;;  %v66_v23 = vmul.f32 %v34_v20, %v34_v20  ;;  %v38_v25 = vld [vmem:[#allocation2 + $0x68] sm:$0xff]  ;;  %v37_v26 = vld [vmem:[#allocation2 + $0x60] sm:$0xff] }
   0xb   :  { %v67_v22 = vmul.f32 %v35_v19, %v35_v19  ;;  %v39_v24 = vld [vmem:[#allocation2 + $0x70] sm:$0xff]  ;;  %v70_v28 = vmul.f32 %v38_v25, %v38_v25  ;;  %v69_v29 = vmul.f32 %v37_v26, %v37_v26  ;;  %v42_v30 = vld [vmem:[#allocation2 + $0x88] sm:$0xff]  ;;  %v41_v31 = vld [vmem:[#allocation2 + $0x80] sm:$0xff]  ;;  %v2137_v19 = vlaneseq }
   0xc   :  { %v71_v27 = vmul.f32 %v39_v24, %v39_v24  ;;  %v40_v32 = vld [vmem:[#allocation2 + $0x78] sm:$0xff]  ;;  %v74_v33 = vmul.f32 %v42_v30, %v42_v30  ;;  %v73_v34 = vmul.f32 %v41_v31, %v41_v31  ;;  %v45_v36 = vld [vmem:[#allocation2 + $0xa0] sm:$0xff]  ;;  %v43_v38 = vld [vmem:[#allocation2 + $0x90] sm:$0xff] }
   0xd   :  { %v72_v35 = vmul.f32 %v40_v32, %v40_v32  ;;  %v44_v37 = vld [vmem:[#allocation2 + $0x98] sm:$0xff]  ;;  %v77_v39 = vmul.f32 %v45_v36, %v45_v36  ;;  %v75_v41 = vmul.f32 %v43_v38, %v43_v38  ;;  %v47_v43 = vld [vmem:[#allocation2 + $0xb0] sm:$0xff]  ;;  %v46_v44 = vld [vmem:[#allocation2 + $0xa8] sm:$0xff] }
   0xe   :  { %v76_v40 = vmul.f32 %v44_v37, %v44_v37  ;;  %v48_v42 = vld [vmem:[#allocation2 + $0xb8] sm:$0xff]  ;;  %v79_v46 = vmul.f32 %v47_v43, %v47_v43  ;;  %v78_v47 = vmul.f32 %v46_v44, %v46_v44  ;;  %v51_v48 = vld [vmem:[#allocation2 + $0xd0] sm:$0xff]  ;;  %v50_v49 = vld [vmem:[#allocation2 + $0xc8] sm:$0xff] }
   0xf   :  { %v80_v45 = vmul.f32 %v48_v42, %v48_v42  ;;  %v49_v50 = vld [vmem:[#allocation2 + $0xc0] sm:$0xff]  ;;  %v83_v51 = vmul.f32 %v51_v48, %v51_v48  ;;  %v82_v52 = vmul.f32 %v50_v49, %v50_v49  ;;  %v54_v54 = vld [vmem:[#allocation2 + $0xe8] sm:$0xff]  ;;  %v52_v56 = vld [vmem:[#allocation2 + $0xd8] sm:$0xff] }
  0x10   :  { %v81_v53 = vmul.f32 %v49_v50, %v49_v50  ;;  %v53_v55 = vld [vmem:[#allocation2 + $0xe0] sm:$0xff]  ;;  %v86_v57 = vmul.f32 %v54_v54, %v54_v54  ;;  %v84_v59 = vmul.f32 %v52_v56, %v52_v56  ;;  %v56_v60 = vld [vmem:[#allocation2 + $0xf8] sm:$0xff]  ;;  %v55_v61 = vld [vmem:[#allocation2 + $0xf0] sm:$0xff] }
  0x11   :  { %99 = vadd.xlane.f32.xlu2 %v62_v9  ;;  %95 = vadd.xlane.f32.xlu1 %v60_v10  ;;  %v85_v58 = vmul.f32 %v53_v55, %v53_v55  ;;  %v88_v62 = vmul.f32 %v56_v60, %v56_v60  ;;  %v87_v63 = vmul.f32 %v55_v61, %v55_v61 }
  0x12   :  { %91 = vadd.xlane.f32.xlu0 %v58_v11 }
  0x19   :  { %105 = vadd.xlane.f32.xlu2 %v65_v15  ;;  %103 = vadd.xlane.f32.xlu1 %v64_v16 }
  0x1a   :  { %101 = vadd.xlane.f32.xlu0 %v63_v17 }
  0x21   :  { %111 = vadd.xlane.f32.xlu2 %v68_v21  ;;  %109 = vadd.xlane.f32.xlu1 %v67_v22 }
  0x22   :  { %107 = vadd.xlane.f32.xlu0 %v66_v23 }
  0x29   :  { %117 = vadd.xlane.f32.xlu2 %v71_v27  ;;  %115 = vadd.xlane.f32.xlu1 %v70_v28 }
  0x2a   :  { %113 = vadd.xlane.f32.xlu0 %v69_v29  ;;  %v2138_v29 = vand.u32 127, %v2137_v19 }
  0x2c   :  { %vm2139_vm5 = vcmp.eq.s32.totalorder %v2138_v29, 32 }
  0x31   :  { %123 = vadd.xlane.f32.xlu2 %v74_v33  ;;  %121 = vadd.xlane.f32.xlu1 %v73_v34 }
  0x32   :  { %119 = vadd.xlane.f32.xlu0 %v72_v35 }
  0x39   :  { %129 = vadd.xlane.f32.xlu2 %v77_v39  ;;  %127 = vadd.xlane.f32.xlu1 %v76_v40 }
  0x3a   :  { %125 = vadd.xlane.f32.xlu0 %v75_v41 }
  0x41   :  { %135 = vadd.xlane.f32.xlu2 %v80_v45  ;;  %133 = vadd.xlane.f32.xlu1 %v79_v46 }
  0x42   :  { %131 = vadd.xlane.f32.xlu0 %v78_v47 }
  0x49   :  { %141 = vadd.xlane.f32.xlu2 %v83_v51  ;;  %139 = vadd.xlane.f32.xlu1 %v82_v52 }
  0x4a   :  { %137 = vadd.xlane.f32.xlu0 %v81_v53 }
  0x51   :  { %147 = vadd.xlane.f32.xlu2 %v86_v57  ;;  %145 = vadd.xlane.f32.xlu1 %v85_v58 }
  0x52   :  { %143 = vadd.xlane.f32.xlu0 %v84_v59 }
  0x59   :  { %151 = vadd.xlane.f32.xlu1 %v88_v62  ;;  %v2794_v62 = vmov 0.0  }
  0x5a   :  { %149 = vadd.xlane.f32.xlu0 %v87_v63  ;;  %v2866_v63 = vsel %vm2139_vm5, 1.0, %v2794_v62 }
  0x7c   :  { %v98_v3 = vpop.xlane.xlu2 %97  ;;  %v94_v4 = vpop.xlane.xlu1 %93 }
  0x7d   :  { %2327 = vrsqrt.f32 %v98_v3  ;;  %v2828_v5 = vpop.xlane.xlu0 %89  ;;  %vm208_vm0 = vcmp.eq.f32.partialorder %v98_v3, inf  ;;  %vm210_vm1 = vcmp.eq.f32.partialorder %v98_v3, 0.0  ;;  %v211_v35 = vand.u32 2147483648, %v98_v3 }
  0x7e   :  { %2329 = vrsqrt.f32 %v94_v4  ;;  %vm184_vm2 = vcmp.eq.f32.partialorder %v94_v4, inf  ;;  %vm186_vm3 = vcmp.eq.f32.partialorder %v94_v4, 0.0  ;;  %v187_v39 = vand.u32 2147483648, %v94_v4 }
  0x7f   :  { %2331 = vrsqrt.f32 %v2828_v5  ;;  %vm160_vm4 = vcmp.eq.f32.partialorder %v2828_v5, inf  ;;  %v163_v51 = vand.u32 2147483648, %v2828_v5  ;;  %vm162_vm6 = vcmp.eq.f32.partialorder %v2828_v5, 0.0 }
  0x83   :  { %v2328_v7 = vpop.eup %2327 }
  0x84   :  { %v2330_v8 = vpop.eup %2329  ;;  %v202_v9 = vmul.f32 %v2328_v7, %v98_v3  ;;  %v2831_v10 = vpop.xlane.xlu2 %99 }
  0x85   :  { %v2833_v11 = vpop.xlane.xlu1 %95  ;;  %v2332_v12 = vpop.eup %2331  ;;  %v178_v13 = vmul.f32 %v2330_v8, %v94_v4  ;;  %2333 = vrsqrt.f32 %v2831_v10  ;;  %vm220_vm9 = vcmp.eq.f32.partialorder %v2831_v10, inf  ;;  %vm222_vm14 = vcmp.eq.f32.partialorder %v2831_v10, 0.0 }
  0x86   :  { %v203_v14 = vmul.f32 %v2328_v7, %v202_v9  ;;  %v154_v15 = vmul.f32 %v2332_v12, %v2828_v5  ;;  %2335 = vrsqrt.f32 %v2833_v11  ;;  %v2843_v34 = vpop.xlane.xlu0 %91 }
  0x87   :  { %v179_v16 = vmul.f32 %v2330_v8, %v178_v13  ;;  %2337 = vrsqrt.f32 %v2843_v34 }
  0x88   :  { %v204_v17 = vmul.f32 0.5, %v203_v14  ;;  %v155_v18 = vmul.f32 %v2332_v12, %v154_v15 }
  0x89   :  { %v180_v20 = vmul.f32 0.5, %v179_v16 }
  0x8a   :  { %v205_v21 = vsub.f32 1.5, %v204_v17  ;;  %v156_v22 = vmul.f32 0.5, %v155_v18 }
  0x8b   :  { %v2334_v23 = vpop.eup %2333  ;;  %v181_v24 = vsub.f32 1.5, %v180_v20 }
  0x8c   :  { %v2838_v25 = vpop.eup %2335  ;;  %v206_v26 = vmul.f32 %v2328_v7, %v205_v21  ;;  %v157_v27 = vsub.f32 1.5, %v156_v22  ;;  %v214_v28 = vmul.f32 %v2334_v23, %v2831_v10 }
  0x8d   :  { %v182_v30 = vmul.f32 %v2330_v8, %v181_v24  ;;  %v190_v31 = vmul.f32 %v2838_v25, %v2833_v11  ;;  %v2858_v58 = vpop.eup %2337 }
  0x8e   :  { %v207_v32 = vmul.f32 %v206_v26, %v98_v3  ;;  %v158_v33 = vmul.f32 %v2332_v12, %v157_v27  ;;  %v215_v37 = vmul.f32 %v2334_v23, %v214_v28  ;;  %v2877_v8 = vmul.f32 %v2858_v58, %v2843_v34 }
  0x8f   :  { %v183_v36 = vmul.f32 %v182_v30, %v94_v4  ;;  %v191_v43 = vmul.f32 %v2838_v25, %v190_v31 }
  0x90   :  { %v209_v38 = vsel %vm208_vm0, %v98_v3, %v207_v32  ;;  %v159_v40 = vmul.f32 %v158_v33, %v2828_v5  ;;  %v216_v48 = vmul.f32 0.5, %v215_v37 }
  0x91   :  { %v212_v41 = vsel %vm210_vm1, %v211_v35, %v209_v38  ;;  %v185_v42 = vsel %vm184_vm2, %v94_v4, %v183_v36  ;;  %v2852_v54 = vmul.f32 0.5, %v191_v43  ;;  %v223_v4 = vand.u32 2147483648, %v2831_v10 }
  0x92   :  { %v541_v44 = vmax.f32 %v212_v41, 1e-15  ;;  %v188_v45 = vsel %vm186_vm3, %v187_v39, %v185_v42  ;;  %v161_v47 = vsel %vm160_vm4, %v2828_v5, %v159_v40  ;;  %v217_v60 = vsub.f32 1.5, %v216_v48 }
  0x93   :  { %v539_v46 = vmax.f32 %v188_v45, 1e-15  ;;  %v164_v57 = vsel %vm162_vm6, %v163_v51, %v161_v47  ;;  %v193_v7 = vsub.f32 1.5, %v2852_v54 }
  0x94   :  { %v573_v49 = vmin.f32 %v541_v44, 0.99999  ;;  %v2293_v50 = vclamps-f32 %v541_v44, 0.9999999  ;;  %2339 = vrcp.f32 %v541_v44  ;;  %v2869_v3 = vmax.f32 %v164_v57, 1e-15 }
  0x95   :  { %v571_v52 = vmin.f32 %v539_v46, 0.99999  ;;  %v2291_v53 = vclamps-f32 %v539_v46, 0.9999999  ;;  %2341 = vrcp.f32 %v539_v46  ;;  %v218_v14 = vmul.f32 %v2334_v23, %v217_v60 }
  0x96   :  { %v2854_v55 = vsub.f32 1.0, %v573_v49  ;;  %v2856_v56 = vsub.f32 1.0, %v2293_v50  ;;  %v2879_v9 = vadd.f32 1.0, %v573_v49  ;;  %v2882_v13 = vadd.f32 1.0, %v2293_v50 }
  0x97   :  { %v2860_v59 = vsub.f32 1.0, %v571_v52  ;;  %v2863_v61 = vsub.f32 1.0, %v2291_v53  ;;  %v2888_v18 = vadd.f32 1.0, %v571_v52  ;;  %v2894_v20 = vadd.f32 1.0, %v2291_v53 }
  0x98   :  { %2343 = vrcp.f32 %v2854_v55  ;;  %v800_v5 = vand.u32 2147483648, %v2854_v55  ;;  %v798_v12 = vand.u32 2147483647, %v2854_v55  ;;  %v1534_v16 = vand.u32 2147483647, %v2856_v56 }
  0x99   :  { %2345 = vrcp.f32 %v2856_v56  ;;  %v1536_v17 = vand.u32 2147483648, %v2856_v56  ;;  %vm794_vm7 = vweird.f32 %v2854_v55  ;;  %v569_v21 = vmin.f32 %v2869_v3, 0.99999 }
  0x9a   :  { %2347 = vrcp.f32 %v2860_v59  ;;  %v2884_v15 = vpop.eup %2339  ;;  %v2289_v22 = vclamps-f32 %v2869_v3, 0.9999999  ;;  %v801_v24 = vor.u32 1.1754944e-38, %v800_v5  ;;  %vm1530_vm8 = vweird.f32 %v2856_v56 }
  0x9b   :  { %2349 = vrcp.f32 %v2863_v61  ;;  %v2891_v19 = vpop.eup %2341  ;;  %v768_v26 = vand.u32 2147483647, %v2860_v59  ;;  %v770_v27 = vand.u32 2147483648, %v2860_v59  ;;  %vm2903_vm10 = vcmp.eq.f32.partialorder %v798_v12, 8.507059e+37 }
  0x9c   :  { %vm764_vm11 = vweird.f32 %v2860_v59  ;;  %v1504_v31 = vand.u32 2147483647, %v2863_v61  ;;  %v2909_v32 = vsub.f32 1.0, %v569_v21  ;;  %vm2912_vm12 = vcmp.eq.f32.partialorder %v1534_v16, 8.507059e+37 }
  0x9d   :  { %v1537_v37 = vor.u32 1.1754944e-38, %v1536_v17  ;;  %v1506_v38 = vand.u32 2147483648, %v2863_v61  ;;  %v2919_v39 = vsub.f32 1.0, %v2289_v22  ;;  %vm1500_vm13 = vweird.f32 %v2863_v61 }
  0x9e   :  { %v2344_v23 = vpop.eup %2343  ;;  %2351 = vrcp.f32 %v2909_v32  ;;  %vm2925_vm15 = vcmp.eq.f32.partialorder %v768_v26, 8.507059e+37  ;;  %v771_v45 = vor.u32 1.1754944e-38, %v770_v27  ;;  %v219_v46 = vmul.f32 %v218_v14, %v2831_v10 }
  0x9f   :  { %v2346_v28 = vpop.eup %2345  ;;  %v790_v29 = vmul.f32 %v2344_v23, %v2854_v55  ;;  %vm795_vm0 = vweird.f32 %v2344_v23  ;;  %vm2931_vm1 = vcmp.eq.f32.partialorder %v1504_v31, 8.507059e+37  ;;  %v1507_v52 = vor.u32 1.1754944e-38, %v1506_v38 }
  0xa0   :  { %v2348_v33 = vpop.eup %2347  ;;  %v1526_v35 = vmul.f32 %v2346_v28, %v2856_v56  ;;  %vm1531_vm2 = vweird.f32 %v2346_v28  ;;  %2353 = vrcp.f32 %v2919_v39  ;;  %vm796_vm4 = vmor %vm794_vm7, %vm795_vm0  ;;  %v665_v5 = vadd.f32 1.0, %v569_v21 }
  0xa1   :  { %v791_v40 = vsub.f32 1.0, %v790_v29  ;;  %v760_v41 = vmul.f32 %v2348_v33, %v2860_v59  ;;  %v2350_v42 = vpop.eup %2349  ;;  %vm765_vm3 = vweird.f32 %v2348_v33  ;;  %v738_v12 = vand.u32 2147483647, %v2909_v32  ;;  %vm1532_vm6 = vmor %vm1530_vm8, %vm1531_vm2 }
  0xa2   :  { %v1527_v43 = vsub.f32 1.0, %v1526_v35  ;;  %v1496_v49 = vmul.f32 %v2350_v42, %v2863_v61  ;;  %vm1501_vm5 = vweird.f32 %v2350_v42  ;;  %v221_v27 = vsel %vm220_vm9, %v2831_v10, %v219_v46  ;;  %vm766_vm7 = vmor %vm764_vm11, %vm765_vm3 }
  0xa3   :  { %v792_v47 = vmul.f32 %v2344_v23, %v791_v40  ;;  %v761_v48 = vsub.f32 1.0, %v760_v41  ;;  %vm1502_vm8 = vmor %vm1500_vm13, %vm1501_vm5  ;;  %v1474_v44 = vand.u32 2147483647, %v2919_v39  ;;  %vm739_vm13 = vcmp.eq.f32.partialorder %v738_v12, 8.507059e+37 }
  0xa4   :  { %v1528_v51 = vmul.f32 %v2346_v28, %v1527_v43  ;;  %v1497_v60 = vsub.f32 1.0, %v1496_v49  ;;  %v2352_v14 = vpop.eup %2351  ;;  %v1476_v43 = vand.u32 2147483648, %v2919_v39  ;;  %vm198_vm2 = vcmp.eq.f32.partialorder %v2833_v11, 0.0 }
  0xa5   :  { %v793_v53 = vadd.f32 %v2344_v23, %v792_v47  ;;  %v762_v57 = vmul.f32 %v2348_v33, %v761_v48  ;;  %v730_v21 = vmul.f32 %v2352_v14, %v2909_v32  ;;  %vm735_vm9 = vweird.f32 %v2352_v14 }
  0xa6   :  { %v1529_v62 = vadd.f32 %v2346_v28, %v1528_v51  ;;  %v1498_v26 = vmul.f32 %v2350_v42, %v1497_v60  ;;  %v2354_v40 = vpop.eup %2353  ;;  %v1477_v49 = vor.u32 1.1754944e-38, %v1476_v43  ;;  %vm1475_vm0 = vcmp.eq.f32.partialorder %v1474_v44, 8.507059e+37 }
  0xa7   :  { %v797_v16 = vsel %vm796_vm4, %v2344_v23, %v793_v53  ;;  %v763_v17 = vadd.f32 %v2348_v33, %v762_v57  ;;  %v740_v23 = vand.u32 2147483648, %v2909_v32  ;;  %v731_v59 = vsub.f32 1.0, %v730_v21 }
  0xa8   :  { %v802_v55 = vsel %vm2903_vm10, %v801_v24, %v797_v16  ;;  %v1533_v29 = vsel %vm1532_vm6, %v2346_v28, %v1529_v62  ;;  %v1499_v38 = vadd.f32 %v2350_v42, %v1498_v26  ;;  %v1466_v36 = vmul.f32 %v2354_v40, %v2919_v39 }
  0xa9   :  { %v803_v56 = vmul.f32 %v802_v55, %v2879_v9  ;;  %v1538_v31 = vsel %vm2912_vm12, %v1537_v37, %v1533_v29  ;;  %v767_v35 = vsel %vm766_vm7, %v2348_v33, %v763_v17  ;;  %v224_v9 = vsel %vm222_vm14, %v223_v4, %v221_v27 }
  0xaa   :  { %v1539_v30 = vmul.f32 %v1538_v31, %v2882_v13  ;;  %v772_v24 = vsel %vm2925_vm15, %v771_v45, %v767_v35  ;;  %v1503_v33 = vsel %vm1502_vm8, %v2350_v42, %v1499_v38  ;;  %v732_v37 = vmul.f32 %v2352_v14, %v731_v59 }
  0xab   :  { %2355 = vlog2.f32 %v803_v56  ;;  %v773_v28 = vmul.f32 %v772_v24, %v2888_v18  ;;  %v1508_v13 = vsel %vm2931_vm1, %v1507_v52, %v1503_v33  ;;  %v1467_v41 = vsub.f32 1.0, %v1466_v36  ;;  %v3004_v33 = vpop.xlane.xlu2 %105 }
  0xac   :  { %2357 = vlog2.f32 %v1539_v30  ;;  %v1509_v61 = vmul.f32 %v1508_v13, %v2894_v20  ;;  %v733_v10 = vadd.f32 %v2352_v14, %v732_v37  ;;  %vm734_vm10 = vweird.f32 %v2909_v32 }
  0xad   :  { %2359 = vlog2.f32 %v773_v28  ;;  %v741_v4 = vor.u32 1.1754944e-38, %v740_v23  ;;  %v2971_v18 = vmax.f32 %v224_v9, 1e-15  ;;  %vm736_vm11 = vmor %vm734_vm10, %vm735_vm9  ;;  %v1468_v42 = vmul.f32 %v2354_v40, %v1467_v41 }
  0xae   :  { %2361 = vlog2.f32 %v1509_v61  ;;  %vm1471_vm12 = vweird.f32 %v2354_v40  ;;  %v737_v45 = vsel %vm736_vm11, %v2352_v14, %v733_v10  ;;  %vm1470_vm14 = vweird.f32 %v2919_v39 }
  0xaf   :  { %v574_v20 = vmin.f32 %v2971_v18, 0.99999  ;;  %v742_v47 = vsel %vm739_vm13, %v741_v4, %v737_v45  ;;  %v1469_v48 = vadd.f32 %v2354_v40, %v1468_v42  ;;  %v2294_v32 = vclamps-f32 %v2971_v18, 0.9999999  ;;  %vm1472_vm15 = vmor %vm1470_vm14, %vm1471_vm12 }
  0xb0   :  { %v743_v52 = vmul.f32 %v742_v47, %v665_v5  ;;  %v194_v57 = vmul.f32 %v2838_v25, %v193_v7  ;;  %v1401_v62 = vadd.f32 1.0, %v2289_v22  ;;  %vm196_vm1 = vcmp.eq.f32.partialorder %v2833_v11, inf }
  0xb1   :  { %v2356_v46 = vpop.eup %2355  ;;  %v2977_v53 = vsub.f32 1.0, %v574_v20  ;;  %v1473_v12 = vsel %vm1472_vm15, %v2354_v40, %v1469_v48  ;;  %v2987_v54 = vsub.f32 1.0, %v2294_v32  ;;  %v167_v31 = vmul.f32 %v2858_v58, %v2877_v8 }
  0xb2   :  { %v2358_v50 = vpop.eup %2357  ;;  %v1218_v51 = vmul.f32 0.6931472, %v2356_v46  ;;  %2363 = vlog2.f32 %v743_v52  ;;  %v1478_v17 = vsel %vm1475_vm0, %v1477_v49, %v1473_v12  ;;  %v195_v22 = vmul.f32 %v194_v57, %v2833_v11 }
  0xb3   :  { %v2360_v60 = vpop.eup %2359  ;;  %v1954_v39 = vmul.f32 0.6931472, %v2358_v50  ;;  %v1479_v27 = vmul.f32 %v1478_v17, %v1401_v62  ;;  %2365 = vrcp.f32 %v2977_v53  ;;  %v199_v38 = vand.u32 2147483648, %v2833_v11 }
  0xb4   :  { %v1277_v14 = vmul.f32 0.5, %v1218_v51  ;;  %v1214_v16 = vmul.f32 0.6931472, %v2360_v60  ;;  %v2362_v26 = vpop.eup %2361  ;;  %v197_v24 = vsel %vm196_vm1, %v2833_v11, %v195_v22  ;;  %v670_v13 = vadd.f32 1.0, %v574_v20 }
  0xb5   :  { %v2013_v5 = vmul.f32 0.5, %v1954_v39  ;;  %v1950_v55 = vmul.f32 0.6931472, %v2362_v26  ;;  %2367 = vlog2.f32 %v1479_v27  ;;  %v200_v28 = vsel %vm198_vm2, %v199_v38, %v197_v24 }
  0xb6   :  { %v1309_v25 = vmul.f32 2.0, %v1277_v14  ;;  %v1275_v7 = vmul.f32 0.5, %v1214_v16  ;;  %2369 = vrcp.f32 %v2987_v54  ;;  %vm809_vm3 = vweird.f32 %v2977_v53 }
  0xb7   :  { %v2077_v29 = vmul.f32 %v2884_v15, %v2013_v5  ;;  %v2011_v56 = vmul.f32 0.5, %v1950_v55  ;;  %2371 = vrcp.f32 %v2869_v3  ;;  %v815_v11 = vand.u32 2147483648, %v2977_v53 }
  0xb8   :  { %v2146_v21 = vmul.f32 %v2866_v63, %v1309_v25  ;;  %v1307_v23 = vmul.f32 2.0, %v1275_v7  ;;  %v2364_v40 = vpop.eup %2363  ;;  %v3010_v3 = vmax.f32 %v200_v28, 1e-15  ;;  %2373 = vrsqrt.f32 %v3004_v33 }
  0xb9   :  { %v2109_v35 = vmul.f32 %v2077_v29, %v2812_v0  ;;  %v2075_v15 = vmul.f32 %v2891_v19, %v2011_v56  ;;  %v2366_v59 = vpop.eup %2365  ;;  %v1210_v8 = vmul.f32 0.6931472, %v2364_v40  ;;  %v813_v0 = vand.u32 2147483647, %v2977_v53 }
  0xba   :  { %v2144_v30 = vmul.f32 %v2866_v63, %v1307_v23  ;;  %v805_v37 = vmul.f32 %v2366_v59, %v2977_v53  ;;  %v168_v19 = vmul.f32 0.5, %v167_v31  ;;  %v572_v45 = vmin.f32 %v3010_v3, 0.99999 }
  0xbb   :  { %v2178_v9 = vadd.f32 %v2146_v21, %v2109_v35  ;;  %v2107_v36 = vmul.f32 %v2075_v15, %v2814_v1  ;;  %v2368_v61 = vpop.eup %2367  ;;  %v1273_v41 = vmul.f32 0.5, %v1210_v8  ;;  %vm3013_vm4 = vcmp.eq.f32.partialorder %v813_v0, 8.507059e+37 }
  0xbc   :  { %v1946_v10 = vmul.f32 0.6931472, %v2368_v61  ;;  %v806_v4 = vsub.f32 1.0, %v805_v37  ;;  %v2370_v42 = vpop.eup %2369  ;;  %v2292_v20 = vclamps-f32 %v3010_v3, 0.9999999  ;;  %vm810_vm5 = vweird.f32 %v2366_v59 }
  0xbd   :  { %2210 = vst [vmem:[#allocation5 + $0x20] sm:$0xff] %v2178_v9  ;;  %v2176_v43 = vadd.f32 %v2144_v30, %v2107_v36  ;;  %v1305_v1 = vmul.f32 2.0, %v1273_v41  ;;  %v2372_v46 = vpop.eup %2371  ;;  %v1541_v49 = vmul.f32 %v2370_v42, %v2987_v54  ;;  %v816_v51 = vor.u32 1.1754944e-38, %v815_v11  ;;  %vm811_vm7 = vmor %vm809_vm3, %vm810_vm5 }
  0xbe   :  { %v2009_v47 = vmul.f32 0.5, %v1946_v10  ;;  %v807_v48 = vmul.f32 %v2366_v59, %v806_v4  ;;  %v1549_v52 = vand.u32 2147483647, %v2987_v54  ;;  %v3022_v57 = vsub.f32 1.0, %v572_v45  ;;  %v2374_v17 = vpop.eup %2373 }
  0xbf   :  { %2208 = vst [vmem:[#allocation5 + $0x10] sm:$0xff] %v2176_v43  ;;  %v2142_v50 = vmul.f32 %v2866_v63, %v1305_v1  ;;  %v1542_v62 = vsub.f32 1.0, %v1541_v49  ;;  %v3024_v12 = vsub.f32 1.0, %v2292_v20  ;;  %vm172_vm6 = vcmp.eq.f32.partialorder %v2843_v34, inf  ;;  %v3062_v43 = vpop.xlane.xlu1 %103 }
  0xc0   :  { %v2073_v60 = vmul.f32 %v2372_v46, %v2009_v47  ;;  %v808_v39 = vadd.f32 %v2366_v59, %v807_v48  ;;  %vm1546_vm8 = vweird.f32 %v2370_v42  ;;  %v1551_v14 = vand.u32 2147483648, %v2987_v54 }
  0xc1   :  { %2375 = vrcp.f32 %v3022_v57  ;;  %v169_v16 = vsub.f32 1.5, %v168_v19  ;;  %vm174_vm9 = vcmp.eq.f32.partialorder %v2843_v34, 0.0  ;;  %v1543_v27 = vmul.f32 %v2370_v42, %v1542_v62 }
  0xc2   :  { %v2105_v26 = vmul.f32 %v2073_v60, %v2816_v2  ;;  %v812_v5 = vsel %vm811_vm7, %v2366_v59, %v808_v39  ;;  %2377 = vrcp.f32 %v3024_v12  ;;  %v1406_v53 = vadd.f32 1.0, %v2294_v32 }
  0xc3   :  { %v817_v25 = vsel %vm3013_vm4, %v816_v51, %v812_v5  ;;  %vm1545_vm10 = vweird.f32 %v2987_v54  ;;  %2379 = vrcp.f32 %v2971_v18  ;;  %v1544_v22 = vadd.f32 %v2370_v42, %v1543_v27 }
  0xc4   :  { %v2174_v7 = vadd.f32 %v2142_v50, %v2105_v26  ;;  %v818_v55 = vmul.f32 %v817_v25, %v670_v13  ;;  %vm1550_vm11 = vcmp.eq.f32.partialorder %v1549_v52, 8.507059e+37  ;;  %vm1547_vm12 = vmor %vm1545_vm10, %vm1546_vm8  ;;  %v1552_v2 = vor.u32 1.1754944e-38, %v1551_v14 }
  0xc5   :  { %v783_v29 = vand.u32 2147483647, %v3022_v57  ;;  %v170_v21 = vmul.f32 %v2858_v58, %v169_v16  ;;  %v250_v23 = vmul.f32 %v2374_v17, %v3004_v33  ;;  %v1548_v32 = vsel %vm1547_vm12, %v2370_v42, %v1544_v22 }
  0xc6   :  { %2206 = vst [vmem:[#allocation5] sm:$0xff] %v2174_v7  ;;  %2381 = vlog2.f32 %v818_v55  ;;  %v785_v54 = vand.u32 2147483648, %v3022_v57  ;;  %v175_v18 = vand.u32 2147483648, %v2843_v34  ;;  %v1553_v31 = vsel %vm1550_vm11, %v1552_v2, %v1548_v32 }
  0xc7   :  { %v2376_v56 = vpop.eup %2375  ;;  %v668_v35 = vadd.f32 1.0, %v572_v45  ;;  %v171_v38 = vmul.f32 %v170_v21, %v2843_v34  ;;  %v251_v40 = vmul.f32 %v2374_v17, %v250_v23  ;;  %v1554_v30 = vmul.f32 %v1553_v31, %v1406_v53  ;;  %v3103_v31 = vpop.xlane.xlu2 %111 }
  0xc8   :  { %v2378_v15 = vpop.eup %2377  ;;  %v775_v24 = vmul.f32 %v2376_v56, %v3022_v57  ;;  %vm779_vm13 = vweird.f32 %v3022_v57  ;;  %v1404_v58 = vadd.f32 1.0, %v2292_v20  ;;  %vm3049_vm14 = vcmp.eq.f32.partialorder %v783_v29, 8.507059e+37  ;;  %v3067_v20 = vpop.xlane.xlu0 %101 }
  0xc9   :  { %v2380_v59 = vpop.eup %2379  ;;  %v1511_v8 = vmul.f32 %v2378_v15, %v3024_v12  ;;  %v173_v0 = vsel %vm172_vm6, %v2843_v34, %v171_v38  ;;  %v252_v28 = vmul.f32 0.5, %v251_v40  ;;  %2383 = vlog2.f32 %v1554_v30 }
  0xca   :  { %v776_v36 = vsub.f32 1.0, %v775_v24  ;;  %v786_v13 = vor.u32 1.1754944e-38, %v785_v54  ;;  %v176_v37 = vsel %vm174_vm9, %v175_v18, %v173_v0  ;;  %v1519_v61 = vand.u32 2147483647, %v3024_v12 }
  0xcb   :  { %v1512_v19 = vsub.f32 1.0, %v1511_v8  ;;  %v3060_v41 = vmax.f32 %v176_v37, 1e-15  ;;  %v253_v11 = vsub.f32 1.5, %v252_v28  ;;  %vm780_vm15 = vweird.f32 %v2376_v56 }
  0xcc   :  { %v2382_v10 = vpop.eup %2381  ;;  %v777_v4 = vmul.f32 %v2376_v56, %v776_v36  ;;  %vm1516_vm0 = vweird.f32 %v2378_v15  ;;  %v1521_v42 = vand.u32 2147483648, %v3024_v12  ;;  %vm1515_vm1 = vweird.f32 %v3024_v12  ;;  %vm781_vm2 = vmor %vm779_vm13, %vm780_vm15 }
  0xcd   :  { %v1220_v1 = vmul.f32 0.6931472, %v2382_v10  ;;  %v1513_v44 = vmul.f32 %v2378_v15, %v1512_v19  ;;  %v570_v45 = vmin.f32 %v3060_v41, 0.99999  ;;  %v2290_v34 = vclamps-f32 %v3060_v41, 0.9999999  ;;  %vm1517_vm4 = vmor %vm1515_vm1, %vm1516_vm0 }
  0xce   :  { %v778_v46 = vadd.f32 %v2376_v56, %v777_v4  ;;  %v254_v47 = vmul.f32 %v2374_v17, %v253_v11  ;;  %2385 = vrsqrt.f32 %v3062_v43  ;;  %vm1520_vm3 = vcmp.eq.f32.partialorder %v1519_v61, 8.507059e+37 }
  0xcf   :  { %v1278_v48 = vmul.f32 0.5, %v1220_v1  ;;  %v1514_v49 = vadd.f32 %v2378_v15, %v1513_v44  ;;  %v3073_v50 = vsub.f32 1.0, %v570_v45  ;;  %v2384_v51 = vpop.eup %2383  ;;  %v1522_v60 = vor.u32 1.1754944e-38, %v1521_v42 }
  0xd0   :  { %v782_v52 = vsel %vm781_vm2, %v2376_v56, %v778_v46  ;;  %v3078_v39 = vsub.f32 1.0, %v2290_v34  ;;  %2387 = vrsqrt.f32 %v3067_v20  ;;  %v1956_v12 = vmul.f32 0.6931472, %v2384_v51 }
  0xd1   :  { %v1310_v62 = vmul.f32 2.0, %v1278_v48  ;;  %v787_v57 = vsel %vm3049_vm14, %v786_v13, %v782_v52  ;;  %v1518_v14 = vsel %vm1517_vm4, %v2378_v15, %v1514_v49  ;;  %2389 = vrcp.f32 %v3073_v50 }
  0xd2   :  { %v788_v16 = vmul.f32 %v787_v57, %v668_v35  ;;  %v1523_v17 = vsel %vm1520_vm3, %v1522_v60, %v1518_v14  ;;  %v255_v26 = vmul.f32 %v254_v47, %v3004_v33  ;;  %v2014_v5 = vmul.f32 0.5, %v1956_v12  ;;  %v2711_v14 = vld [vmem:[#allocation2 + $0x18] sm:$0xff] }
  0xd3   :  { %v1524_v27 = vmul.f32 %v1523_v17, %v1404_v58  ;;  %vm256_vm5 = vcmp.eq.f32.partialorder %v3004_v33, inf  ;;  %v2147_v7 = vmul.f32 %v2866_v63, %v1310_v62  ;;  %v259_v55 = vand.u32 2147483648, %v3004_v33 }
  0xd4   :  { %v3085_v25 = vpop.eup %2385  ;;  %2391 = vlog2.f32 %v788_v16  ;;  %v2078_v53 = vmul.f32 %v2380_v59, %v2014_v5  ;;  %v257_v2 = vsel %vm256_vm5, %v3004_v33, %v255_v26  ;;  %vm258_vm6 = vcmp.eq.f32.partialorder %v3004_v33, 0.0 }
  0xd5   :  { %2393 = vlog2.f32 %v1524_v27  ;;  %v260_v21 = vsel %vm258_vm6, %v259_v55, %v257_v2  ;;  %v238_v23 = vmul.f32 %v3085_v25, %v3062_v43  ;;  %v666_v54 = vadd.f32 1.0, %v570_v45 }
  0xd6   :  { %v3090_v22 = vpop.eup %2387  ;;  %2395 = vrcp.f32 %v3078_v39  ;;  %v2110_v29 = vmul.f32 %v2078_v53, %v2824_v6  ;;  %v3100_v18 = vmax.f32 %v260_v21, 1e-15  ;;  %v247_v56 = vand.u32 2147483648, %v3062_v43 }
  0xd7   :  { %2397 = vrcp.f32 %v3010_v3  ;;  %v2390_v32 = vpop.eup %2389  ;;  %v753_v6 = vand.u32 2147483647, %v3073_v50  ;;  %v239_v3 = vmul.f32 %v3085_v25, %v238_v23  ;;  %vm749_vm7 = vweird.f32 %v3073_v50 }
  0xd8   :  { %2399 = vrcp.f32 %v3060_v41  ;;  %v2179_v35 = vadd.f32 %v2147_v7, %v2110_v29  ;;  %v745_v33 = vmul.f32 %v2390_v32, %v3073_v50  ;;  %v755_v40 = vand.u32 2147483648, %v3073_v50 }
  0xd9   :  { %v1489_v15 = vand.u32 2147483647, %v3078_v39  ;;  %v577_v30 = vmin.f32 %v3100_v18, 0.99999  ;;  %v226_v9 = vmul.f32 %v3090_v22, %v3067_v20  ;;  %2401 = vrsqrt.f32 %v3103_v31 }
  0xda   :  { %v2392_v38 = vpop.eup %2391  ;;  %2211 = vst [vmem:[#allocation5 + $0x28] sm:$0xff] %v2179_v35  ;;  %v746_v59 = vsub.f32 1.0, %v745_v33  ;;  %v2297_v36 = vclamps-f32 %v3100_v18, 0.9999999  ;;  %v240_v13 = vmul.f32 0.5, %v239_v3  ;;  %vm750_vm8 = vweird.f32 %v2390_v32 }
  0xdb   :  { %v2394_v24 = vpop.eup %2393  ;;  %v1216_v58 = vmul.f32 0.6931472, %v2392_v38  ;;  %v3117_v28 = vsub.f32 1.0, %v577_v30  ;;  %vm3123_vm9 = vcmp.eq.f32.partialorder %v753_v6, 8.507059e+37  ;;  %v1491_v1 = vand.u32 2147483648, %v3078_v39  ;;  %vm751_vm11 = vmor %vm749_vm7, %vm750_vm8 }
  0xdc   :  { %v2396_v8 = vpop.eup %2395  ;;  %v1952_v0 = vmul.f32 0.6931472, %v2394_v24  ;;  %v747_v61 = vmul.f32 %v2390_v32, %v746_v59  ;;  %v756_v46 = vor.u32 1.1754944e-38, %v755_v40  ;;  %vm244_vm10 = vcmp.eq.f32.partialorder %v3062_v43, inf }
  0xdd   :  { %v2398_v37 = vpop.eup %2397  ;;  %v1276_v19 = vmul.f32 0.5, %v1216_v58  ;;  %v1481_v11 = vmul.f32 %v2396_v8, %v3078_v39  ;;  %2403 = vrcp.f32 %v3117_v28  ;;  %v3134_v49 = vsub.f32 1.0, %v2297_v36 }
  0xde   :  { %v3121_v10 = vpop.eup %2399  ;;  %v2012_v4 = vmul.f32 0.5, %v1952_v0  ;;  %v748_v45 = vadd.f32 %v2390_v32, %v747_v61  ;;  %v241_v51 = vsub.f32 1.5, %v240_v13  ;;  %v227_v52 = vmul.f32 %v3090_v22, %v226_v9 }
  0xdf   :  { %v1308_v44 = vmul.f32 2.0, %v1276_v19  ;;  %v1482_v47 = vsub.f32 1.0, %v1481_v11  ;;  %v3137_v60 = vpop.eup %2401  ;;  %vm1486_vm12 = vweird.f32 %v2396_v8  ;;  %vm246_vm13 = vcmp.eq.f32.partialorder %v3062_v43, 0.0 }
  0xe0   :  { %v2076_v48 = vmul.f32 %v2398_v37, %v2012_v4  ;;  %v752_v12 = vsel %vm751_vm11, %v2390_v32, %v748_v45  ;;  %v1402_v17 = vadd.f32 1.0, %v2290_v34  ;;  %2405 = vrcp.f32 %v3134_v49 }
  0xe1   :  { %v2145_v62 = vmul.f32 %v2866_v63, %v1308_v44  ;;  %v1483_v57 = vmul.f32 %v2396_v8, %v1482_v47  ;;  %v757_v50 = vsel %vm3123_vm9, %v756_v46, %v752_v12  ;;  %vm1485_vm14 = vweird.f32 %v3078_v39 }
  0xe2   :  { %v2108_v16 = vmul.f32 %v2711_v14, %v2076_v48  ;;  %v758_v26 = vmul.f32 %v757_v50, %v666_v54  ;;  %v1492_v27 = vor.u32 1.1754944e-38, %v1491_v1  ;;  %vm1487_vm15 = vmor %vm1485_vm14, %vm1486_vm12  ;;  %v242_v55 = vmul.f32 %v3085_v25, %v241_v51 }
  0xe3   :  { %v1484_v5 = vadd.f32 %v2396_v8, %v1483_v57  ;;  %v2404_v53 = vpop.eup %2403  ;;  %v228_v2 = vmul.f32 0.5, %v227_v52  ;;  %v286_v29 = vmul.f32 %v3137_v60, %v3103_v31  ;;  %vm1490_vm0 = vcmp.eq.f32.partialorder %v1489_v15, 8.507059e+37 }
  0xe4   :  { %v2177_v7 = vadd.f32 %v2145_v62, %v2108_v16  ;;  %2407 = vlog2.f32 %v758_v26  ;;  %v850_v41 = vmul.f32 %v2404_v53, %v3117_v28  ;;  %v858_v23 = vand.u32 2147483647, %v3117_v28 }
  0xe5   :  { %v1488_v21 = vsel %vm1487_vm15, %v2396_v8, %v1484_v5  ;;  %v860_v39 = vand.u32 2147483648, %v3117_v28  ;;  %v243_v32 = vmul.f32 %v242_v55, %v3062_v43  ;;  %2409 = vrcp.f32 %v3100_v18 }
  0xe6   :  { %2209 = vst [vmem:[#allocation5 + $0x18] sm:$0xff] %v2177_v7  ;;  %v1493_v34 = vsel %vm1490_vm0, %v1492_v27, %v1488_v21  ;;  %v851_v35 = vsub.f32 1.0, %v850_v41  ;;  %v229_v25 = vsub.f32 1.5, %v228_v2  ;;  %v2406_v33 = vpop.eup %2405  ;;  %v673_v6 = vadd.f32 1.0, %v577_v30 }
  0xe7   :  { %v1494_v54 = vmul.f32 %v1493_v34, %v1402_v17  ;;  %vm854_vm1 = vweird.f32 %v3117_v28  ;;  %v245_v3 = vsel %vm244_vm10, %v3062_v43, %v243_v32  ;;  %v287_v38 = vmul.f32 %v3137_v60, %v286_v29  ;;  %v2712_v29 = vld [vmem:[#allocation2 + $0x8] sm:$0xff] }
  0xe8   :  { %v852_v40 = vmul.f32 %v2404_v53, %v851_v35  ;;  %vm855_vm2 = vweird.f32 %v2404_v53  ;;  %v1586_v15 = vmul.f32 %v2406_v33, %v3134_v49  ;;  %vm232_vm3 = vcmp.eq.f32.partialorder %v3067_v20, inf }
  0xe9   :  { %2411 = vlog2.f32 %v1494_v54  ;;  %vm3164_vm4 = vcmp.eq.f32.partialorder %v858_v23, 8.507059e+37  ;;  %v861_v30 = vor.u32 1.1754944e-38, %v860_v39  ;;  %v248_v58 = vsel %vm246_vm13, %v247_v56, %v245_v3  ;;  %vm856_vm5 = vmor %vm854_vm1, %vm855_vm2 }
  0xea   :  { %v230_v59 = vmul.f32 %v3090_v22, %v229_v25  ;;  %v2408_v9 = vpop.eup %2407  ;;  %v853_v8 = vadd.f32 %v2404_v53, %v852_v40  ;;  %v1587_v0 = vsub.f32 1.0, %v1586_v15  ;;  %v1594_v13 = vand.u32 2147483647, %v3134_v49 }
  0xeb   :  { %v544_v37 = vmax.f32 %v248_v58, 1e-15  ;;  %v1212_v19 = vmul.f32 0.6931472, %v2408_v9  ;;  %vm1591_vm6 = vweird.f32 %v2406_v33  ;;  %v1596_v61 = vand.u32 2147483648, %v3134_v49  ;;  %v3178_v43 = vpop.eup %2409 }
  0xec   :  { %vm234_vm7 = vcmp.eq.f32.partialorder %v3067_v20, 0.0  ;;  %v288_v11 = vmul.f32 0.5, %v287_v38  ;;  %v857_v56 = vsel %vm856_vm5, %v2404_v53, %v853_v8  ;;  %v1588_v22 = vmul.f32 %v2406_v33, %v1587_v0 }
  0xed   :  { %v576_v4 = vmin.f32 %v544_v37, 0.99999  ;;  %v2296_v42 = vclamps-f32 %v544_v37, 0.9999999  ;;  %v1274_v1 = vmul.f32 0.5, %v1212_v19  ;;  %v862_v44 = vsel %vm3164_vm4, %v861_v30, %v857_v56 }
  0xee   :  { %v1409_v28 = vadd.f32 1.0, %v2297_v36  ;;  %v231_v45 = vmul.f32 %v230_v59, %v3067_v20  ;;  %v863_v47 = vmul.f32 %v862_v44, %v673_v6  ;;  %v1589_v48 = vadd.f32 %v2406_v33, %v1588_v22  ;;  %v3191_v36 = vpop.xlane.xlu1 %109 }
  0xef   :  { %v2412_v46 = vpop.eup %2411  ;;  %vm1590_vm8 = vweird.f32 %v3134_v49  ;;  %v3186_v51 = vsub.f32 1.0, %v576_v4  ;;  %v1306_v52 = vmul.f32 2.0, %v1274_v1  ;;  %v1597_v12 = vor.u32 1.1754944e-38, %v1596_v61 }
  0xf0   :  { %v1948_v62 = vmul.f32 0.6931472, %v2412_v46  ;;  %vm1592_vm9 = vmor %vm1590_vm8, %vm1591_vm6  ;;  %v3189_v57 = vsub.f32 1.0, %v2296_v42  ;;  %2413 = vlog2.f32 %v863_v47  ;;  %vm1595_vm10 = vcmp.eq.f32.partialorder %v1594_v13, 8.507059e+37 }
  0xf1   :  { %v1593_v14 = vsel %vm1592_vm9, %v2406_v33, %v1589_v48  ;;  %v289_v18 = vsub.f32 1.5, %v288_v11  ;;  %2415 = vrcp.f32 %v3186_v51  ;;  %v233_v49 = vsel %vm232_vm3, %v3067_v20, %v231_v45 }
  0xf2   :  { %v2010_v16 = vmul.f32 0.5, %v1948_v62  ;;  %v1598_v50 = vsel %vm1595_vm10, %v1597_v12, %v1593_v14  ;;  %2417 = vrcp.f32 %v3189_v57  ;;  %v235_v26 = vand.u32 2147483648, %v3067_v20 }
  0xf3   :  { %v1599_v17 = vmul.f32 %v1598_v50, %v1409_v28  ;;  %vm292_vm11 = vcmp.eq.f32.partialorder %v3103_v31, inf  ;;  %v2143_v27 = vmul.f32 %v2866_v63, %v1306_v52  ;;  %v295_v53 = vand.u32 2147483648, %v3103_v31 }
  0xf4   :  { %v2074_v5 = vmul.f32 %v3121_v10, %v2010_v16  ;;  %2419 = vrsqrt.f32 %v3191_v36  ;;  %v843_v7 = vand.u32 2147483647, %v3186_v51  ;;  %v236_v55 = vsel %vm234_vm7, %v235_v26, %v233_v49 }
  0xf5   :  { %2421 = vlog2.f32 %v1599_v17  ;;  %v290_v2 = vmul.f32 %v3137_v60, %v289_v18  ;;  %vm294_vm12 = vcmp.eq.f32.partialorder %v3103_v31, 0.0  ;;  %v845_v10 = vand.u32 2147483648, %v3186_v51  ;;  %v2713_v18 = vld [vmem:[#allocation2 + $0x40] sm:$0xff] }
  0xf6   :  { %v2106_v21 = vmul.f32 %v2712_v29, %v2074_v5  ;;  %2423 = vrcp.f32 %v544_v37  ;;  %v543_v41 = vmax.f32 %v236_v55, 1e-15  ;;  %v2414_v34 = vpop.eup %2413  ;;  %v672_v23 = vadd.f32 1.0, %v576_v4 }
  0xf7   :  { %v3210_v39 = vadd.f32 1.0, %v2296_v42  ;;  %v1579_v32 = vand.u32 2147483647, %v3189_v57  ;;  %v291_v54 = vmul.f32 %v290_v2, %v3103_v31  ;;  %v2416_v20 = vpop.eup %2415  ;;  %v1226_v25 = vmul.f32 0.6931472, %v2414_v34  ;;  %v3239_v42 = vpop.xlane.xlu0 %107 }
  0xf8   :  { %v2175_v35 = vadd.f32 %v2143_v27, %v2106_v21  ;;  %v575_v60 = vmin.f32 %v543_v41, 0.99999  ;;  %v2295_v33 = vclamps-f32 %v543_v41, 0.9999999  ;;  %v2418_v6 = vpop.eup %2417  ;;  %v835_v3 = vmul.f32 %v2416_v20, %v3186_v51 }
  0xf9   :  { %vm839_vm13 = vweird.f32 %v3186_v51  ;;  %vm3216_vm14 = vcmp.eq.f32.partialorder %v843_v7, 8.507059e+37  ;;  %v1581_v40 = vand.u32 2147483648, %v3189_v57  ;;  %v1281_v24 = vmul.f32 0.5, %v1226_v25 }
  0xfa   :  { %v3221_v15 = vpop.eup %2419  ;;  %2207 = vst [vmem:[#allocation5 + $0x8] sm:$0xff] %v2175_v35  ;;  %v846_v30 = vor.u32 1.1754944e-38, %v845_v10  ;;  %v1571_v58 = vmul.f32 %v2418_v6, %v3189_v57  ;;  %vm1575_vm15 = vweird.f32 %v3189_v57  ;;  %v836_v9 = vsub.f32 1.0, %v835_v3 }
  0xfb   :  { %v2422_v59 = vpop.eup %2421  ;;  %v3225_v8 = vsub.f32 1.0, %v575_v60  ;;  %v3227_v0 = vsub.f32 1.0, %v2295_v33  ;;  %v293_v13 = vsel %vm292_vm11, %v3103_v31, %v291_v54  ;;  %v1313_v19 = vmul.f32 2.0, %v1281_v24 }
  0xfc   :  { %v3232_v37 = vpop.eup %2423  ;;  %v1962_v61 = vmul.f32 0.6931472, %v2422_v59  ;;  %v1572_v11 = vsub.f32 1.0, %v1571_v58  ;;  %vm3234_vm0 = vcmp.eq.f32.partialorder %v1579_v32, 8.507059e+37  ;;  %v837_v22 = vmul.f32 %v2416_v20, %v836_v9 }
  0xfd   :  { %vm840_vm1 = vweird.f32 %v2416_v20  ;;  %v1582_v4 = vor.u32 1.1754944e-38, %v1581_v40  ;;  %2425 = vrcp.f32 %v3225_v8  ;;  %vm1576_vm2 = vweird.f32 %v2418_v6 }
  0xfe   :  { %v2017_v1 = vmul.f32 0.5, %v1962_v61  ;;  %v1573_v44 = vmul.f32 %v2418_v6, %v1572_v11  ;;  %v296_v28 = vsel %vm294_vm12, %v295_v53, %v293_v13  ;;  %v838_v45 = vadd.f32 %v2416_v20, %v837_v22  ;;  %vm841_vm3 = vmor %vm839_vm13, %vm840_vm1 }
  0xff   :  { %2427 = vrcp.f32 %v3227_v0  ;;  %v274_v46 = vmul.f32 %v3221_v15, %v3191_v36  ;;  %v283_v47 = vand.u32 2147483648, %v3191_v36  ;;  %v2150_v52 = vmul.f32 %v2866_v63, %v1313_v19  ;;  %vm1577_vm4 = vmor %vm1575_vm15, %vm1576_vm2 }
 0x100   :  { %v2081_v48 = vmul.f32 %v3178_v43, %v2017_v1  ;;  %v1574_v62 = vadd.f32 %v2418_v6, %v1573_v44  ;;  %2429 = vrsqrt.f32 %v3239_v42  ;;  %v842_v31 = vsel %vm841_vm3, %v2416_v20, %v838_v45 }
 0x101   :  { %v3254_v12 = vadd.f32 1.0, %v575_v60  ;;  %2431 = vrcp.f32 %v543_v41  ;;  %v3256_v14 = vmax.f32 %v296_v28, 1e-15  ;;  %v847_v43 = vsel %vm3216_vm14, %v846_v30, %v842_v31 }
 0x102   :  { %v2113_v16 = vmul.f32 %v2713_v18, %v2081_v48  ;;  %v1578_v50 = vsel %vm1577_vm4, %v2418_v6, %v1574_v62  ;;  %v3260_v51 = vadd.f32 1.0, %v2295_v33  ;;  %v848_v17 = vmul.f32 %v847_v43, %v672_v23 }
 0x103   :  { %v2426_v49 = vpop.eup %2425  ;;  %v1583_v26 = vsel %vm3234_vm0, %v1582_v4, %v1578_v50  ;;  %v828_v57 = vand.u32 2147483647, %v3225_v8  ;;  %v580_v5 = vmin.f32 %v3256_v14, 0.99999  ;;  %v830_v55 = vand.u32 2147483648, %v3225_v8 }
 0x104   :  { %v2182_v27 = vadd.f32 %v2150_v52, %v2113_v16  ;;  %v1584_v53 = vmul.f32 %v1583_v26, %v3210_v39  ;;  %v820_v7 = vmul.f32 %v2426_v49, %v3225_v8  ;;  %2433 = vlog2.f32 %v848_v17 }
 0x105   :  { %v2428_v2 = vpop.eup %2427  ;;  %v3269_v29 = vsub.f32 1.0, %v580_v5  ;;  %v2300_v21 = vclamps-f32 %v3256_v14, 0.9999999  ;;  %v275_v10 = vmul.f32 %v3221_v15, %v274_v46  ;;  %vm824_vm5 = vweird.f32 %v3225_v8 }
 0x106   :  { %v3273_v41 = vpop.eup %2429  ;;  %2214 = vst [vmem:[#allocation5 + $0x40] sm:$0xff] %v2182_v27  ;;  %2435 = vlog2.f32 %v1584_v53  ;;  %v821_v34 = vsub.f32 1.0, %v820_v7  ;;  %v1556_v23 = vmul.f32 %v2428_v2, %v3227_v0  ;;  %vm3279_vm6 = vcmp.eq.f32.partialorder %v828_v57, 8.507059e+37 }
 0x107   :  { %v3277_v39 = vpop.eup %2431  ;;  %v1564_v54 = vand.u32 2147483647, %v3227_v0  ;;  %v1566_v20 = vand.u32 2147483648, %v3227_v0  ;;  %2437 = vrcp.f32 %v3269_v29  ;;  %vm825_vm7 = vweird.f32 %v2426_v49 }
 0x108   :  { %v822_v35 = vmul.f32 %v2426_v49, %v821_v34  ;;  %v1557_v25 = vsub.f32 1.0, %v1556_v23  ;;  %v3288_v60 = vsub.f32 1.0, %v2300_v21  ;;  %v831_v33 = vor.u32 1.1754944e-38, %v830_v55  ;;  %vm826_vm11 = vmor %vm824_vm5, %vm825_vm7 }
 0x109   :  { %vm1560_vm8 = vweird.f32 %v3227_v0  ;;  %vm1561_vm9 = vweird.f32 %v2428_v2  ;;  %v276_v6 = vmul.f32 0.5, %v275_v10  ;;  %v903_v40 = vand.u32 2147483647, %v3269_v29 }
 0x10a   :  { %v823_v3 = vadd.f32 %v2426_v49, %v822_v35  ;;  %v1558_v38 = vmul.f32 %v2428_v2, %v1557_v25  ;;  %2439 = vrcp.f32 %v3288_v60  ;;  %vm280_vm10 = vcmp.eq.f32.partialorder %v3191_v36, inf  ;;  %v2434_v24 = vpop.eup %2433  ;;  %vm1562_vm14 = vmor %vm1560_vm8, %vm1561_vm9 }
 0x10b   :  { %vm3296_vm12 = vcmp.eq.f32.partialorder %v1564_v54, 8.507059e+37  ;;  %v1567_v58 = vor.u32 1.1754944e-38, %v1566_v20  ;;  %v905_v59 = vand.u32 2147483648, %v3269_v29  ;;  %v277_v9 = vsub.f32 1.5, %v276_v6 }
 0x10c   :  { %vm282_vm13 = vcmp.eq.f32.partialorder %v3191_v36, 0.0  ;;  %v2436_v13 = vpop.eup %2435  ;;  %v1224_v19 = vmul.f32 0.6931472, %v2434_v24  ;;  %v827_v61 = vsel %vm826_vm11, %v2426_v49, %v823_v3  ;;  %v1559_v11 = vadd.f32 %v2428_v2, %v1558_v38 }
 0x10d   :  { %v676_v56 = vadd.f32 1.0, %v580_v5  ;;  %v2438_v22 = vpop.eup %2437  ;;  %v1960_v4 = vmul.f32 0.6931472, %v2436_v13  ;;  %v832_v8 = vsel %vm3279_vm6, %v831_v33, %v827_v61  ;;  %vm899_vm15 = vweird.f32 %v3269_v29 }
 0x10e   :  { %v262_v1 = vmul.f32 %v3273_v41, %v3239_v42  ;;  %v1280_v44 = vmul.f32 0.5, %v1224_v19  ;;  %v833_v28 = vmul.f32 %v832_v8, %v3254_v12  ;;  %v1563_v45 = vsel %vm1562_vm14, %v2428_v2, %v1559_v11  ;;  %v2715_v8 = vld [vmem:[#allocation2 + $0x30] sm:$0xff] }
 0x10f   :  { %v895_v46 = vmul.f32 %v2438_v22, %v3269_v29  ;;  %vm3312_vm0 = vcmp.eq.f32.partialorder %v903_v40, 8.507059e+37  ;;  %v2016_v52 = vmul.f32 0.5, %v1960_v4  ;;  %v1568_v0 = vsel %vm3296_vm12, %v1567_v58, %v1563_v45 }
 0x110   :  { %v906_v62 = vor.u32 1.1754944e-38, %v905_v59  ;;  %v278_v31 = vmul.f32 %v3221_v15, %v277_v9  ;;  %v2440_v18 = vpop.eup %2439  ;;  %v1312_v16 = vmul.f32 2.0, %v1280_v44  ;;  %2441 = vlog2.f32 %v833_v28  ;;  %v2714_v15 = vld [vmem:[#allocation2 + $0x38] sm:$0xff] }
 0x111   :  { %v1569_v43 = vmul.f32 %v1568_v0, %v3260_v51  ;;  %v896_v12 = vsub.f32 1.0, %v895_v46  ;;  %v2080_v50 = vmul.f32 %v3232_v37, %v2016_v52  ;;  %vm900_vm1 = vweird.f32 %v2438_v22  ;;  %v3329_v51 = vpop.xlane.xlu2 %117 }
 0x112   :  { %v1631_v49 = vmul.f32 %v2440_v18, %v3288_v60  ;;  %v279_v17 = vmul.f32 %v278_v31, %v3191_v36  ;;  %v2149_v26 = vmul.f32 %v2866_v63, %v1312_v16  ;;  %v263_v5 = vmul.f32 %v3273_v41, %v262_v1  ;;  %vm901_vm2 = vmor %vm899_vm15, %vm900_vm1 }
 0x113   :  { %2443 = vlog2.f32 %v1569_v43  ;;  %v897_v57 = vmul.f32 %v2438_v22, %v896_v12  ;;  %v2112_v27 = vmul.f32 %v2714_v15, %v2080_v50  ;;  %v1639_v7 = vand.u32 2147483647, %v3288_v60 }
 0x114   :  { %v1632_v53 = vsub.f32 1.0, %v1631_v49  ;;  %v281_v37 = vsel %vm280_vm10, %v3191_v36, %v279_v17  ;;  %v1641_v2 = vand.u32 2147483648, %v3288_v60  ;;  %v264_v34 = vmul.f32 0.5, %v263_v5 }
 0x115   :  { %v898_v55 = vadd.f32 %v2438_v22, %v897_v57  ;;  %v284_v10 = vsel %vm282_vm13, %v283_v47, %v281_v37  ;;  %v2181_v23 = vadd.f32 %v2149_v26, %v2112_v27  ;;  %vm1636_vm3 = vweird.f32 %v2440_v18 }
 0x116   :  { %v1633_v32 = vmul.f32 %v2440_v18, %v1632_v53  ;;  %v3339_v54 = vmax.f32 %v284_v10, 1e-15  ;;  %v2442_v20 = vpop.eup %2441  ;;  %vm1635_vm4 = vweird.f32 %v3288_v60  ;;  %v265_v25 = vsub.f32 1.5, %v264_v34 }
 0x117   :  { %v902_v35 = vsel %vm901_vm2, %v2438_v22, %v898_v55  ;;  %2445 = vrsqrt.f32 %v3329_v51  ;;  %2213 = vst [vmem:[#allocation5 + $0x38] sm:$0xff] %v2181_v23  ;;  %v1222_v36 = vmul.f32 0.6931472, %v2442_v20  ;;  %v1412_v38 = vadd.f32 1.0, %v2300_v21  ;;  %vm1637_vm5 = vmor %vm1635_vm4, %vm1636_vm3 }
 0x118   :  { %v907_v47 = vsel %vm3312_vm0, %v906_v62, %v902_v35  ;;  %v1634_v33 = vadd.f32 %v2440_v18, %v1633_v32  ;;  %v579_v29 = vmin.f32 %v3339_v54, 0.99999  ;;  %v1642_v40 = vor.u32 1.1754944e-38, %v1641_v2 }
 0x119   :  { %v2444_v6 = vpop.eup %2443  ;;  %v908_v3 = vmul.f32 %v907_v47, %v676_v56  ;;  %v2299_v60 = vclamps-f32 %v3339_v54, 0.9999999  ;;  %v1279_v24 = vmul.f32 0.5, %v1222_v36  ;;  %vm1640_vm6 = vcmp.eq.f32.partialorder %v1639_v7, 8.507059e+37  ;;  %v3385_v7 = vpop.xlane.xlu0 %113 }
 0x11a   :  { %v1958_v30 = vmul.f32 0.6931472, %v2444_v6  ;;  %v1638_v58 = vsel %vm1637_vm5, %v2440_v18, %v1634_v33  ;;  %v3350_v9 = vsub.f32 1.0, %v579_v29  ;;  %v266_v13 = vmul.f32 %v3273_v41, %v265_v25  ;;  %v3375_v18 = vpop.xlane.xlu1 %115  ;;  %v2716_v6 = vld [vmem:[#allocation2 + $0x58] sm:$0xff] }
 0x11b   :  { %2447 = vlog2.f32 %v908_v3  ;;  %v1643_v59 = vsel %vm1640_vm6, %v1642_v40, %v1638_v58  ;;  %v1311_v19 = vmul.f32 2.0, %v1279_v24  ;;  %v3355_v21 = vsub.f32 1.0, %v2299_v60 }
 0x11c   :  { %v2015_v61 = vmul.f32 0.5, %v1958_v30  ;;  %v1644_v11 = vmul.f32 %v1643_v59, %v1412_v38  ;;  %2449 = vrcp.f32 %v3350_v9  ;;  %v267_v1 = vmul.f32 %v266_v13, %v3239_v42 }
 0x11d   :  { %v3357_v56 = vpop.eup %2445  ;;  %v2148_v4 = vmul.f32 %v2866_v63, %v1311_v19  ;;  %vm268_vm7 = vcmp.eq.f32.partialorder %v3239_v42, inf  ;;  %vm270_vm8 = vcmp.eq.f32.partialorder %v3239_v42, 0.0  ;;  %v675_v48 = vadd.f32 1.0, %v579_v29 }
 0x11e   :  { %v2079_v22 = vmul.f32 %v3277_v39, %v2015_v61  ;;  %2451 = vlog2.f32 %v1644_v11  ;;  %v322_v44 = vmul.f32 %v3357_v56, %v3329_v51  ;;  %v271_v39 = vand.u32 2147483648, %v3239_v42 }
 0x11f   :  { %2453 = vrcp.f32 %v3355_v21  ;;  %v269_v52 = vsel %vm268_vm7, %v3239_v42, %v267_v1  ;;  %vm884_vm9 = vweird.f32 %v3350_v9  ;;  %v888_v0 = vand.u32 2147483647, %v3350_v9 }
 0x120   :  { %v2111_v41 = vmul.f32 %v2715_v8, %v2079_v22  ;;  %2455 = vrcp.f32 %v3256_v14  ;;  %v272_v62 = vsel %vm270_vm8, %v271_v39, %v269_v52  ;;  %v323_v31 = vmul.f32 %v3357_v56, %v322_v44 }
 0x121   :  { %v2448_v28 = vpop.eup %2447  ;;  %2457 = vrcp.f32 %v3339_v54  ;;  %v890_v50 = vand.u32 2147483648, %v3350_v9  ;;  %v3379_v49 = vmax.f32 %v272_v62, 1e-15  ;;  %vm1620_vm10 = vweird.f32 %v3355_v21 }
 0x122   :  { %v2180_v45 = vadd.f32 %v2148_v4, %v2111_v41  ;;  %v1232_v46 = vmul.f32 0.6931472, %v2448_v28  ;;  %v2450_v14 = vpop.eup %2449  ;;  %v1624_v26 = vand.u32 2147483647, %v3355_v21  ;;  %v324_v57 = vmul.f32 0.5, %v323_v31 }
 0x123   :  { %v880_v12 = vmul.f32 %v2450_v14, %v3350_v9  ;;  %2459 = vrsqrt.f32 %v3375_v18  ;;  %v1626_v2 = vand.u32 2147483648, %v3355_v21  ;;  %v578_v10 = vmin.f32 %v3379_v49, 0.99999 }
 0x124   :  { %v2452_v16 = vpop.eup %2451  ;;  %2212 = vst [vmem:[#allocation5 + $0x30] sm:$0xff] %v2180_v45  ;;  %v1284_v43 = vmul.f32 0.5, %v1232_v46  ;;  %v2298_v34 = vclamps-f32 %v3379_v49, 0.9999999  ;;  %vm885_vm11 = vweird.f32 %v2450_v14  ;;  %v325_v20 = vsub.f32 1.5, %v324_v57 }
 0x125   :  { %v2454_v42 = vpop.eup %2453  ;;  %v1968_v17 = vmul.f32 0.6931472, %v2452_v16  ;;  %v881_v27 = vsub.f32 1.0, %v880_v12  ;;  %vm328_vm12 = vcmp.eq.f32.partialorder %v3329_v51, inf  ;;  %v3394_v36 = vsub.f32 1.0, %v578_v10  ;;  %vm886_vm15 = vmor %vm884_vm9, %vm885_vm11 }
 0x126   :  { %v2456_v5 = vpop.eup %2455  ;;  %v1316_v15 = vmul.f32 2.0, %v1284_v43  ;;  %v1616_v53 = vmul.f32 %v2454_v42, %v3355_v21  ;;  %vm330_vm13 = vcmp.eq.f32.partialorder %v3329_v51, 0.0  ;;  %2461 = vrsqrt.f32 %v3385_v7 }
 0x127   :  { %v3387_v37 = vpop.eup %2457  ;;  %v2020_v55 = vmul.f32 0.5, %v1968_v17  ;;  %v882_v23 = vmul.f32 %v2450_v14, %v881_v27  ;;  %vm1621_vm14 = vweird.f32 %v2454_v42  ;;  %v3398_v29 = vsub.f32 1.0, %v2298_v34 }
 0x128   :  { %v1617_v32 = vsub.f32 1.0, %v1616_v53  ;;  %v2153_v25 = vmul.f32 %v2866_v63, %v1316_v15  ;;  %v891_v38 = vor.u32 1.1754944e-38, %v890_v50  ;;  %2463 = vrcp.f32 %v3394_v36  ;;  %vm1622_vm1 = vmor %vm1620_vm10, %vm1621_vm14 }
 0x129   :  { %v2084_v35 = vmul.f32 %v2456_v5, %v2020_v55  ;;  %v883_v47 = vadd.f32 %v2450_v14, %v882_v23  ;;  %v326_v40 = vmul.f32 %v3357_v56, %v325_v20  ;;  %v3405_v24 = vpop.eup %2459  ;;  %vm889_vm0 = vcmp.eq.f32.partialorder %v888_v0, 8.507059e+37 }
 0x12a   :  { %v1618_v33 = vmul.f32 %v2454_v42, %v1617_v32  ;;  %2465 = vrcp.f32 %v3398_v29  ;;  %v1411_v19 = vadd.f32 1.0, %v2299_v60  ;;  %v1627_v9 = vor.u32 1.1754944e-38, %v1626_v2 }
 0x12b   :  { %v2116_v3 = vmul.f32 %v2716_v6, %v2084_v35  ;;  %v887_v30 = vsel %vm886_vm15, %v2450_v14, %v883_v47  ;;  %vm1625_vm2 = vcmp.eq.f32.partialorder %v1624_v26, 8.507059e+37  ;;  %v331_v56 = vand.u32 2147483648, %v3329_v51  ;;  %v3460_v47 = vpop.xlane.xlu2 %123 }
 0x12c   :  { %v1619_v58 = vadd.f32 %v2454_v42, %v1618_v33  ;;  %v892_v13 = vsel %vm889_vm0, %v891_v38, %v887_v30  ;;  %v3414_v22 = vpop.eup %2461  ;;  %2467 = vrcp.f32 %v3379_v49  ;;  %v327_v8 = vmul.f32 %v326_v40, %v3329_v51 }
 0x12d   :  { %v2185_v59 = vadd.f32 %v2153_v25, %v2116_v3  ;;  %v893_v61 = vmul.f32 %v892_v13, %v675_v48  ;;  %v310_v54 = vmul.f32 %v3405_v24, %v3375_v18  ;;  %v674_v21 = vadd.f32 1.0, %v578_v10 }
 0x12e   :  { %v1623_v11 = vsel %vm1622_vm1, %v2454_v42, %v1619_v58  ;;  %v873_v41 = vand.u32 2147483647, %v3394_v36  ;;  %v2464_v1 = vpop.eup %2463  ;;  %vm869_vm3 = vweird.f32 %v3394_v36  ;;  %v1410_v44 = vadd.f32 1.0, %v2298_v34 }
 0x12f   :  { %2217 = vst [vmem:[#allocation5 + $0x58] sm:$0xff] %v2185_v59  ;;  %v1628_v4 = vsel %vm1625_vm2, %v1627_v9, %v1623_v11  ;;  %2469 = vlog2.f32 %v893_v61  ;;  %v329_v28 = vsel %vm328_vm12, %v3329_v51, %v327_v8  ;;  %v311_v39 = vmul.f32 %v3405_v24, %v310_v54 }
 0x130   :  { %v1629_v60 = vmul.f32 %v1628_v4, %v1411_v19  ;;  %v2466_v45 = vpop.eup %2465  ;;  %v865_v46 = vmul.f32 %v2464_v1, %v3394_v36  ;;  %v332_v48 = vsel %vm330_vm13, %v331_v56, %v329_v28  ;;  %v298_v52 = vmul.f32 %v3414_v22, %v3385_v7  ;;  %v2717_v4 = vld [vmem:[#allocation2 + $0x50] sm:$0xff] }
 0x131   :  { %v875_v14 = vand.u32 2147483648, %v3394_v36  ;;  %v1601_v0 = vmul.f32 %v2466_v45, %v3398_v29  ;;  %v3433_v62 = vmax.f32 %v332_v48, 1e-15  ;;  %v312_v31 = vmul.f32 0.5, %v311_v39 }
 0x132   :  { %2471 = vlog2.f32 %v1629_v60  ;;  %v866_v16 = vsub.f32 1.0, %v865_v46  ;;  %vm3435_vm4 = vcmp.eq.f32.partialorder %v873_v41, 8.507059e+37  ;;  %vm1605_vm5 = vweird.f32 %v3398_v29  ;;  %v3441_v12 = vpop.eup %2467 }
 0x133   :  { %v1609_v51 = vand.u32 2147483647, %v3398_v29  ;;  %v1602_v50 = vsub.f32 1.0, %v1601_v0  ;;  %v1611_v49 = vand.u32 2147483648, %v3398_v29  ;;  %v583_v42 = vmin.f32 %v3433_v62, 0.99999 }
 0x134   :  { %v2303_v17 = vclamps-f32 %v3433_v62, 0.9999999  ;;  %v867_v57 = vmul.f32 %v2464_v1, %v866_v16  ;;  %vm870_vm6 = vweird.f32 %v2464_v1  ;;  %v313_v5 = vsub.f32 1.5, %v312_v31 }
 0x135   :  { %v2470_v26 = vpop.eup %2469  ;;  %v299_v15 = vmul.f32 %v3414_v22, %v298_v52  ;;  %v1603_v53 = vmul.f32 %v2466_v45, %v1602_v50  ;;  %vm1606_vm7 = vweird.f32 %v2466_v45  ;;  %v3447_v55 = vsub.f32 1.0, %v583_v42  ;;  %vm871_vm10 = vmor %vm869_vm3, %vm870_vm6 }
 0x136   :  { %v1230_v27 = vmul.f32 0.6931472, %v2470_v26  ;;  %v868_v10 = vadd.f32 %v2464_v1, %v867_v57  ;;  %v876_v34 = vor.u32 1.1754944e-38, %v875_v14  ;;  %vm3449_vm8 = vcmp.eq.f32.partialorder %v1609_v51, 8.507059e+37  ;;  %vm1607_vm11 = vmor %vm1605_vm5, %vm1606_vm7 }
 0x137   :  { %v3453_v32 = vsub.f32 1.0, %v2303_v17  ;;  %vm316_vm9 = vcmp.eq.f32.partialorder %v3375_v18, inf  ;;  %v1604_v25 = vadd.f32 %v2466_v45, %v1603_v53  ;;  %2473 = vrcp.f32 %v3447_v55 }
 0x138   :  { %v2472_v2 = vpop.eup %2471  ;;  %v1283_v20 = vmul.f32 0.5, %v1230_v27  ;;  %v872_v33 = vsel %vm871_vm10, %v2464_v1, %v868_v10  ;;  %v1612_v6 = vor.u32 1.1754944e-38, %v1611_v49  ;;  %v314_v3 = vmul.f32 %v3405_v24, %v313_v5 }
 0x139   :  { %v1966_v35 = vmul.f32 0.6931472, %v2472_v2  ;;  %v300_v38 = vmul.f32 0.5, %v299_v15  ;;  %v877_v36 = vsel %vm3435_vm4, %v876_v34, %v872_v33  ;;  %v1608_v58 = vsel %vm1607_vm11, %v2466_v45, %v1604_v25  ;;  %v3517_v34 = vpop.xlane.xlu1 %121 }
 0x13a   :  { %v1315_v40 = vmul.f32 2.0, %v1283_v20  ;;  %v878_v59 = vmul.f32 %v877_v36, %v674_v21  ;;  %v1613_v13 = vsel %vm3449_vm8, %v1612_v6, %v1608_v58  ;;  %vm318_vm12 = vcmp.eq.f32.partialorder %v3375_v18, 0.0 }
 0x13b   :  { %v2019_v30 = vmul.f32 0.5, %v1966_v35  ;;  %2475 = vrsqrt.f32 %v3460_v47  ;;  %v1614_v24 = vmul.f32 %v1613_v13, %v1410_v44  ;;  %v948_v9 = vand.u32 2147483647, %v3447_v55 }
 0x13c   :  { %v2152_v19 = vmul.f32 %v2866_v63, %v1315_v40  ;;  %2477 = vrcp.f32 %v3453_v32  ;;  %v950_v61 = vand.u32 2147483648, %v3447_v55  ;;  %v319_v11 = vand.u32 2147483648, %v3375_v18 }
 0x13d   :  { %v2083_v29 = vmul.f32 %v3387_v37, %v2019_v30  ;;  %2479 = vlog2.f32 %v878_v59  ;;  %v2474_v56 = vpop.eup %2473  ;;  %v315_v54 = vmul.f32 %v314_v3, %v3375_v18  ;;  %v301_v60 = vsub.f32 1.5, %v300_v38  ;;  %v2718_v59 = vld [vmem:[#allocation2 + $0x48] sm:$0xff] }
 0x13e   :  { %2481 = vlog2.f32 %v1614_v24  ;;  %v679_v37 = vadd.f32 1.0, %v583_v42  ;;  %v940_v21 = vmul.f32 %v2474_v56, %v3447_v55  ;;  %v307_v41 = vand.u32 2147483648, %v3385_v7 }
 0x13f   :  { %v2115_v8 = vmul.f32 %v2717_v4, %v2083_v29  ;;  %2483 = vrcp.f32 %v3433_v62  ;;  %vm944_vm13 = vweird.f32 %v3447_v55  ;;  %v3483_v44 = vadd.f32 1.0, %v2303_v17 }
 0x140   :  { %v317_v28 = vsel %vm316_vm9, %v3375_v18, %v315_v54  ;;  %v941_v45 = vsub.f32 1.0, %v940_v21  ;;  %vm3490_vm14 = vcmp.eq.f32.partialorder %v948_v9, 8.507059e+37  ;;  %v1684_v48 = vand.u32 2147483647, %v3453_v32 }
 0x141   :  { %v2184_v1 = vadd.f32 %v2152_v19, %v2115_v8  ;;  %v3488_v39 = vpop.eup %2475  ;;  %v320_v52 = vsel %vm318_vm12, %v319_v11, %v317_v28  ;;  %vm304_vm15 = vcmp.eq.f32.partialorder %v3385_v7, inf  ;;  %v951_v0 = vor.u32 1.1754944e-38, %v950_v61 }
 0x142   :  { %v2478_v14 = vpop.eup %2477  ;;  %vm1680_vm0 = vweird.f32 %v3453_v32  ;;  %v550_v62 = vmax.f32 %v320_v52, 1e-15  ;;  %v302_v31 = vmul.f32 %v3414_v22, %v301_v60  ;;  %v942_v43 = vmul.f32 %v2474_v56, %v941_v45 }
 0x143   :  { %2216 = vst [vmem:[#allocation5 + $0x50] sm:$0xff] %v2184_v1  ;;  %v2480_v16 = vpop.eup %2479  ;;  %vm945_vm1 = vweird.f32 %v2474_v56  ;;  %v1676_v51 = vmul.f32 %v2478_v14, %v3453_v32  ;;  %v1686_v50 = vand.u32 2147483648, %v3453_v32  ;;  %vm306_vm2 = vcmp.eq.f32.partialorder %v3385_v7, 0.0  ;;  %v3617_v1 = vpop.xlane.xlu0 %119 }
 0x144   :  { %v2482_v49 = vpop.eup %2481  ;;  %v1228_v18 = vmul.f32 0.6931472, %v2480_v16  ;;  %v582_v42 = vmin.f32 %v550_v62, 0.99999  ;;  %v2302_v17 = vclamps-f32 %v550_v62, 0.9999999  ;;  %v358_v26 = vmul.f32 %v3488_v39, %v3460_v47  ;;  %vm946_vm4 = vmor %vm944_vm13, %vm945_vm1 }
 0x145   :  { %v3505_v57 = vpop.eup %2483  ;;  %v1964_v5 = vmul.f32 0.6931472, %v2482_v49  ;;  %v943_v22 = vadd.f32 %v2474_v56, %v942_v43  ;;  %v1677_v15 = vsub.f32 1.0, %v1676_v51  ;;  %vm3507_vm3 = vcmp.eq.f32.partialorder %v1684_v48, 8.507059e+37 }
 0x146   :  { %v1282_v53 = vmul.f32 0.5, %v1228_v18  ;;  %vm1681_vm5 = vweird.f32 %v2478_v14  ;;  %v3514_v2 = vsub.f32 1.0, %v582_v42  ;;  %v303_v10 = vmul.f32 %v302_v31, %v3385_v7 }
 0x147   :  { %v2018_v23 = vmul.f32 0.5, %v1964_v5  ;;  %v947_v20 = vsel %vm946_vm4, %v2474_v56, %v943_v22  ;;  %v1678_v35 = vmul.f32 %v2478_v14, %v1677_v15  ;;  %v3519_v25 = vsub.f32 1.0, %v2302_v17  ;;  %vm1682_vm6 = vmor %vm1680_vm0, %vm1681_vm5 }
 0x148   :  { %v1314_v33 = vmul.f32 2.0, %v1282_v53  ;;  %v952_v6 = vsel %vm3490_vm14, %v951_v0, %v947_v20  ;;  %2485 = vrcp.f32 %v3514_v2  ;;  %v359_v55 = vmul.f32 %v3488_v39, %v358_v26 }
 0x149   :  { %v2082_v3 = vmul.f32 %v3441_v12, %v2018_v23  ;;  %v953_v38 = vmul.f32 %v952_v6, %v679_v37  ;;  %v1679_v40 = vadd.f32 %v2478_v14, %v1678_v35  ;;  %2487 = vrsqrt.f32 %v3517_v34 }
 0x14a   :  { %v2151_v30 = vmul.f32 %v2866_v63, %v1314_v33  ;;  %v1687_v36 = vor.u32 1.1754944e-38, %v1686_v50  ;;  %2489 = vrcp.f32 %v3519_v25  ;;  %v305_v58 = vsel %vm304_vm15, %v3385_v7, %v303_v10 }
 0x14b   :  { %v2114_v13 = vmul.f32 %v2718_v59, %v2082_v3  ;;  %2491 = vlog2.f32 %v953_v38  ;;  %v1683_v12 = vsel %vm1682_vm6, %v2478_v14, %v1679_v40  ;;  %v933_v29 = vand.u32 2147483647, %v3514_v2 }
 0x14c   :  { %v1688_v19 = vsel %vm3507_vm3, %v1687_v36, %v1683_v12  ;;  %v935_v24 = vand.u32 2147483648, %v3514_v2  ;;  %2493 = vrcp.f32 %v550_v62  ;;  %v367_v32 = vand.u32 2147483648, %v3460_v47 }
 0x14d   :  { %v2183_v9 = vadd.f32 %v2151_v30, %v2114_v13  ;;  %v1689_v61 = vmul.f32 %v1688_v19, %v3483_v44  ;;  %v308_v11 = vsel %vm306_vm2, %v307_v41, %v305_v58  ;;  %v360_v56 = vmul.f32 0.5, %v359_v55 }
 0x14e   :  { %v2486_v4 = vpop.eup %2485  ;;  %v678_v8 = vadd.f32 1.0, %v582_v42  ;;  %vm929_vm7 = vweird.f32 %v3514_v2  ;;  %v3546_v54 = vadd.f32 1.0, %v2302_v17  ;;  %v549_v60 = vmax.f32 %v308_v11, 1e-15 }
 0x14f   :  { %v3548_v37 = vpop.eup %2487  ;;  %2215 = vst [vmem:[#allocation5 + $0x48] sm:$0xff] %v2183_v9  ;;  %2495 = vlog2.f32 %v1689_v61  ;;  %v925_v21 = vmul.f32 %v2486_v4, %v3514_v2  ;;  %vm3551_vm8 = vcmp.eq.f32.partialorder %v933_v29, 8.507059e+37  ;;  %v361_v7 = vsub.f32 1.5, %v360_v56  ;;  %v3666_v61 = vpop.xlane.xlu2 %129 }
 0x150   :  { %v2490_v41 = vpop.eup %2489  ;;  %vm1665_vm9 = vweird.f32 %v3519_v25  ;;  %v1669_v44 = vand.u32 2147483647, %v3519_v25  ;;  %v581_v28 = vmin.f32 %v549_v60, 0.99999  ;;  %v2301_v45 = vclamps-f32 %v549_v60, 0.9999999 }
 0x151   :  { %vm364_vm10 = vcmp.eq.f32.partialorder %v3460_v47, inf  ;;  %v2492_v46 = vpop.eup %2491  ;;  %v926_v48 = vsub.f32 1.0, %v925_v21  ;;  %v936_v52 = vor.u32 1.1754944e-38, %v935_v24  ;;  %v1661_v14 = vmul.f32 %v2490_v41, %v3519_v25 }
 0x152   :  { %v362_v0 = vmul.f32 %v3488_v39, %v361_v7  ;;  %vm366_vm11 = vcmp.eq.f32.partialorder %v3460_v47, 0.0  ;;  %v3561_v62 = vpop.eup %2493  ;;  %v1238_v31 = vmul.f32 0.6931472, %v2492_v46  ;;  %v1671_v16 = vand.u32 2147483648, %v3519_v25 }
 0x153   :  { %v3564_v43 = vsub.f32 1.0, %v581_v28  ;;  %v346_v51 = vmul.f32 %v3548_v37, %v3517_v34  ;;  %v927_v50 = vmul.f32 %v2486_v4, %v926_v48  ;;  %vm930_vm12 = vweird.f32 %v2486_v4 }
 0x154   :  { %v1662_v49 = vsub.f32 1.0, %v1661_v14  ;;  %v3568_v18 = vsub.f32 1.0, %v2301_v45  ;;  %v1287_v42 = vmul.f32 0.5, %v1238_v31  ;;  %vm1666_vm13 = vweird.f32 %v2490_v41  ;;  %vm931_vm15 = vmor %vm929_vm7, %vm930_vm12 }
 0x155   :  { %vm3570_vm14 = vcmp.eq.f32.partialorder %v1669_v44, 8.507059e+37  ;;  %2497 = vrcp.f32 %v3564_v43  ;;  %v2496_v17 = vpop.eup %2495  ;;  %v928_v26 = vadd.f32 %v2486_v4, %v927_v50  ;;  %v363_v22 = vmul.f32 %v362_v0, %v3460_v47  ;;  %vm1667_vm0 = vmor %vm1665_vm9, %vm1666_vm13 }
 0x156   :  { %v1663_v5 = vmul.f32 %v2490_v41, %v1662_v49  ;;  %2499 = vrcp.f32 %v3568_v18  ;;  %v1319_v15 = vmul.f32 2.0, %v1287_v42  ;;  %v1974_v27 = vmul.f32 0.6931472, %v2496_v17 }
 0x157   :  { %v1672_v53 = vor.u32 1.1754944e-38, %v1671_v16  ;;  %2501 = vrcp.f32 %v549_v60  ;;  %v932_v10 = vsel %vm931_vm15, %v2486_v4, %v928_v26  ;;  %v3579_v20 = vadd.f32 1.0, %v581_v28 }
 0x158   :  { %v1664_v23 = vadd.f32 %v2490_v41, %v1663_v5  ;;  %v347_v35 = vmul.f32 %v3548_v37, %v346_v51  ;;  %v2023_v33 = vmul.f32 0.5, %v1974_v27  ;;  %v937_v6 = vsel %vm3551_vm8, %v936_v52, %v932_v10 }
 0x159   :  { %v918_v55 = vand.u32 2147483647, %v3564_v43  ;;  %v3588_v2 = vadd.f32 1.0, %v2301_v45  ;;  %v938_v3 = vmul.f32 %v937_v6, %v678_v8  ;;  %vm914_vm1 = vweird.f32 %v3564_v43 }
 0x15a   :  { %v1668_v38 = vsel %vm1667_vm0, %v2490_v41, %v1664_v23  ;;  %v365_v40 = vsel %vm364_vm10, %v3460_v47, %v363_v22  ;;  %v2087_v36 = vmul.f32 %v3505_v57, %v2023_v33  ;;  %v2156_v58 = vmul.f32 %v2866_v63, %v1319_v15  ;;  %v2719_v57 = vld [vmem:[#allocation2 + $0x70] sm:$0xff] }
 0x15b   :  { %v2498_v30 = vpop.eup %2497  ;;  %v1673_v25 = vsel %vm3570_vm14, %v1672_v53, %v1668_v38  ;;  %v368_v59 = vsel %vm366_vm11, %v367_v32, %v365_v40  ;;  %2503 = vlog2.f32 %v938_v3  ;;  %v920_v19 = vand.u32 2147483648, %v3564_v43 }
 0x15c   :  { %v2500_v13 = vpop.eup %2499  ;;  %v1674_v12 = vmul.f32 %v1673_v25, %v3546_v54  ;;  %v910_v29 = vmul.f32 %v2498_v30, %v3564_v43  ;;  %v2119_v9 = vmul.f32 %v2719_v57, %v2087_v36  ;;  %vm3607_vm2 = vcmp.eq.f32.partialorder %v918_v55, 8.507059e+37 }
 0x15d   :  { %v3605_v24 = vpop.eup %2501  ;;  %v1646_v11 = vmul.f32 %v2500_v13, %v3568_v18  ;;  %v3612_v47 = vmax.f32 %v368_v59, 1e-15  ;;  %v1654_v56 = vand.u32 2147483647, %v3568_v18  ;;  %v348_v4 = vmul.f32 0.5, %v347_v35 }
 0x15e   :  { %2505 = vlog2.f32 %v1674_v12  ;;  %v911_v32 = vsub.f32 1.0, %v910_v29  ;;  %v2188_v8 = vadd.f32 %v2156_v58, %v2119_v9  ;;  %vm915_vm3 = vweird.f32 %v2498_v30 }
 0x15f   :  { %v1647_v54 = vsub.f32 1.0, %v1646_v11  ;;  %v586_v60 = vmin.f32 %v3612_v47, 0.99999  ;;  %v2306_v21 = vclamps-f32 %v3612_v47, 0.9999999  ;;  %v1656_v41 = vand.u32 2147483648, %v3568_v18  ;;  %vm916_vm7 = vmor %vm914_vm1, %vm915_vm3 }
 0x160   :  { %v912_v7 = vmul.f32 %v2498_v30, %v911_v32  ;;  %v349_v44 = vsub.f32 1.5, %v348_v4  ;;  %2220 = vst [vmem:[#allocation5 + $0x70] sm:$0xff] %v2188_v8  ;;  %vm1650_vm4 = vweird.f32 %v3568_v18  ;;  %vm1651_vm5 = vweird.f32 %v2500_v13 }
 0x161   :  { %v1648_v28 = vmul.f32 %v2500_v13, %v1647_v54  ;;  %v3621_v45 = vsub.f32 1.0, %v586_v60  ;;  %v2504_v46 = vpop.eup %2503  ;;  %v921_v52 = vor.u32 1.1754944e-38, %v920_v19  ;;  %v3623_v14 = vsub.f32 1.0, %v2306_v21  ;;  %vm1652_vm9 = vmor %vm1650_vm4, %vm1651_vm5 }
 0x162   :  { %v913_v48 = vadd.f32 %v2498_v30, %v912_v7  ;;  %vm352_vm6 = vcmp.eq.f32.partialorder %v3517_v34, inf  ;;  %2507 = vrsqrt.f32 %v3617_v1  ;;  %v1236_v0 = vmul.f32 0.6931472, %v2504_v46 }
 0x163   :  { %v1649_v31 = vadd.f32 %v2500_v13, %v1648_v28  ;;  %vm1655_vm8 = vcmp.eq.f32.partialorder %v1654_v56, 8.507059e+37  ;;  %2509 = vrcp.f32 %v3621_v45  ;;  %v1657_v50 = vor.u32 1.1754944e-38, %v1656_v41 }
 0x164   :  { %v2506_v16 = vpop.eup %2505  ;;  %v917_v51 = vsel %vm916_vm7, %v2498_v30, %v913_v48  ;;  %2511 = vrcp.f32 %v3623_v14  ;;  %v350_v49 = vmul.f32 %v3548_v37, %v349_v44  ;;  %v1286_v42 = vmul.f32 0.5, %v1236_v0  ;;  %v2720_v30 = vld [vmem:[#allocation2 + $0x68] sm:$0xff] }
 0x165   :  { %v1972_v39 = vmul.f32 0.6931472, %v2506_v16  ;;  %v922_v43 = vsel %vm3607_vm2, %v921_v52, %v917_v51  ;;  %v1653_v17 = vsel %vm1652_vm9, %v2500_v13, %v1649_v31  ;;  %v993_v22 = vand.u32 2147483647, %v3621_v45 }
 0x166   :  { %v923_v26 = vmul.f32 %v922_v43, %v3579_v20  ;;  %v1658_v5 = vsel %vm1655_vm8, %v1657_v50, %v1653_v17  ;;  %vm354_vm10 = vcmp.eq.f32.partialorder %v3517_v34, 0.0  ;;  %v1318_v18 = vmul.f32 2.0, %v1286_v42 }
 0x167   :  { %v2022_v15 = vmul.f32 0.5, %v1972_v39  ;;  %v1659_v27 = vmul.f32 %v1658_v5, %v3588_v2  ;;  %v995_v53 = vand.u32 2147483648, %v3621_v45  ;;  %v682_v10 = vadd.f32 1.0, %v586_v60 }
 0x168   :  { %v3643_v37 = vpop.eup %2507  ;;  %2513 = vlog2.f32 %v923_v26  ;;  %v351_v23 = vmul.f32 %v350_v49, %v3517_v34  ;;  %v355_v35 = vand.u32 2147483648, %v3517_v34  ;;  %v2155_v6 = vmul.f32 %v2866_v63, %v1318_v18  ;;  %v2721_v26 = vld [vmem:[#allocation2 + $0x60] sm:$0xff] }
 0x169   :  { %v2510_v20 = vpop.eup %2509  ;;  %v2086_v33 = vmul.f32 %v3561_v62, %v2022_v15  ;;  %2515 = vlog2.f32 %v1659_v27  ;;  %v334_v55 = vmul.f32 %v3643_v37, %v3617_v1  ;;  %vm989_vm11 = vweird.f32 %v3621_v45 }
 0x16a   :  { %v2512_v2 = vpop.eup %2511  ;;  %v985_v3 = vmul.f32 %v2510_v20, %v3621_v45  ;;  %vm3653_vm12 = vcmp.eq.f32.partialorder %v993_v22, 8.507059e+37  ;;  %v1418_v40 = vadd.f32 1.0, %v2306_v21  ;;  %v996_v58 = vor.u32 1.1754944e-38, %v995_v53 }
 0x16b   :  { %v2118_v36 = vmul.f32 %v2720_v30, %v2086_v33  ;;  %v1721_v62 = vmul.f32 %v2512_v2, %v3623_v14  ;;  %v353_v25 = vsel %vm352_vm6, %v3517_v34, %v351_v23  ;;  %vm1725_vm13 = vweird.f32 %v3623_v14 }
 0x16c   :  { %v986_v59 = vsub.f32 1.0, %v985_v3  ;;  %v356_v13 = vsel %vm354_vm10, %v355_v35, %v353_v25  ;;  %v335_v12 = vmul.f32 %v3643_v37, %v334_v55  ;;  %v1729_v57 = vand.u32 2147483647, %v3623_v14  ;;  %v3693_v35 = vpop.xlane.xlu1 %127 }
 0x16d   :  { %v2187_v29 = vadd.f32 %v2155_v6, %v2118_v36  ;;  %v1722_v19 = vsub.f32 1.0, %v1721_v62  ;;  %v553_v9 = vmax.f32 %v356_v13, 1e-15  ;;  %vm990_vm14 = vweird.f32 %v2510_v20 }
 0x16e   :  { %v2514_v11 = vpop.eup %2513  ;;  %v987_v32 = vmul.f32 %v2510_v20, %v986_v59  ;;  %v1731_v56 = vand.u32 2147483648, %v3623_v14  ;;  %v336_v4 = vmul.f32 0.5, %v335_v12  ;;  %vm1726_vm15 = vweird.f32 %v2512_v2  ;;  %vm991_vm0 = vmor %vm989_vm11, %vm990_vm14 }
 0x16f   :  { %v2516_v8 = vpop.eup %2515  ;;  %2219 = vst [vmem:[#allocation5 + $0x68] sm:$0xff] %v2187_v29  ;;  %v1234_v54 = vmul.f32 0.6931472, %v2514_v11  ;;  %v1723_v34 = vmul.f32 %v2512_v2, %v1722_v19  ;;  %v585_v60 = vmin.f32 %v553_v9, 0.99999  ;;  %2517 = vrsqrt.f32 %v3666_v61  ;;  %vm1727_vm2 = vmor %vm1725_vm13, %vm1726_vm15  ;;  %v3710_v29 = vpop.xlane.xlu0 %125 }
 0x170   :  { %v1970_v21 = vmul.f32 0.6931472, %v2516_v8  ;;  %v988_v7 = vadd.f32 %v2510_v20, %v987_v32  ;;  %v2305_v41 = vclamps-f32 %v553_v9, 0.9999999  ;;  %vm1730_vm1 = vcmp.eq.f32.partialorder %v1729_v57, 8.507059e+37 }
 0x171   :  { %v1285_v44 = vmul.f32 0.5, %v1234_v54  ;;  %v1724_v28 = vadd.f32 %v2512_v2, %v1723_v34  ;;  %v3672_v46 = vsub.f32 1.0, %v585_v60  ;;  %v1732_v0 = vor.u32 1.1754944e-38, %v1731_v56 }
 0x172   :  { %v2021_v48 = vmul.f32 0.5, %v1970_v21  ;;  %v992_v52 = vsel %vm991_vm0, %v2510_v20, %v988_v7  ;;  %v337_v31 = vsub.f32 1.5, %v336_v4  ;;  %v3680_v39 = vsub.f32 1.0, %v2305_v41 }
 0x173   :  { %v1317_v16 = vmul.f32 2.0, %v1285_v44  ;;  %v997_v51 = vsel %vm3653_vm12, %v996_v58, %v992_v52  ;;  %v1728_v50 = vsel %vm1727_vm2, %v2512_v2, %v1724_v28  ;;  %2519 = vrcp.f32 %v3672_v46 }
 0x174   :  { %v2085_v45 = vmul.f32 %v3605_v24, %v2021_v48  ;;  %v998_v49 = vmul.f32 %v997_v51, %v682_v10  ;;  %v1733_v42 = vsel %vm1730_vm1, %v1732_v0, %v1728_v50  ;;  %2521 = vrcp.f32 %v3612_v47 }
 0x175   :  { %v2154_v43 = vmul.f32 %v2866_v63, %v1317_v16  ;;  %v1734_v17 = vmul.f32 %v1733_v42, %v1418_v40  ;;  %v2518_v14 = vpop.eup %2517  ;;  %v978_v18 = vand.u32 2147483647, %v3672_v46  ;;  %v338_v24 = vmul.f32 %v3643_v37, %v337_v31 }
 0x176   :  { %v2117_v5 = vmul.f32 %v2721_v26, %v2085_v45  ;;  %2523 = vlog2.f32 %v998_v49  ;;  %vm340_vm3 = vcmp.eq.f32.partialorder %v3617_v1, inf  ;;  %vm342_vm4 = vcmp.eq.f32.partialorder %v3617_v1, 0.0 }
 0x177   :  { %2525 = vlog2.f32 %v1734_v17  ;;  %v343_v27 = vand.u32 2147483648, %v3617_v1  ;;  %v394_v47 = vmul.f32 %v2518_v14, %v3666_v61  ;;  %v681_v53 = vadd.f32 1.0, %v585_v60 }
 0x178   :  { %v2186_v22 = vadd.f32 %v2154_v43, %v2117_v5  ;;  %2527 = vrcp.f32 %v3680_v39  ;;  %v339_v23 = vmul.f32 %v338_v24, %v3617_v1  ;;  %vm974_vm5 = vweird.f32 %v3672_v46 }
 0x179   :  { %v2520_v15 = vpop.eup %2519  ;;  %2529 = vrcp.f32 %v553_v9  ;;  %v980_v37 = vand.u32 2147483648, %v3672_v46  ;;  %v3697_v33 = vadd.f32 1.0, %v2305_v41  ;;  %v395_v6 = vmul.f32 %v2518_v14, %v394_v47 }
 0x17a   :  { %2218 = vst [vmem:[#allocation5 + $0x60] sm:$0xff] %v2186_v22  ;;  %v970_v10 = vmul.f32 %v2520_v15, %v3672_v46  ;;  %v2522_v20 = vpop.eup %2521  ;;  %vm3699_vm6 = vcmp.eq.f32.partialorder %v978_v18, 8.507059e+37  ;;  %v1714_v38 = vand.u32 2147483647, %v3680_v39  ;;  %v341_v40 = vsel %vm340_vm3, %v3617_v1, %v339_v23  ;;  %v2722_v46 = vld [vmem:[#allocation2 + $0x88] sm:$0xff] }
 0x17b   :  { %v344_v58 = vsel %vm342_vm4, %v343_v27, %v341_v40  ;;  %v396_v62 = vmul.f32 0.5, %v395_v6  ;;  %2531 = vrsqrt.f32 %v3693_v35  ;;  %vm975_vm7 = vweird.f32 %v2520_v15 }
 0x17c   :  { %v2524_v55 = vpop.eup %2523  ;;  %v971_v2 = vsub.f32 1.0, %v970_v10  ;;  %v552_v12 = vmax.f32 %v344_v58, 1e-15  ;;  %v981_v57 = vor.u32 1.1754944e-38, %v980_v37  ;;  %v1716_v4 = vand.u32 2147483648, %v3680_v39  ;;  %vm976_vm8 = vmor %vm974_vm5, %vm975_vm7  ;;  %v3756_v58 = vpop.xlane.xlu2 %135 }
 0x17d   :  { %v2526_v30 = vpop.eup %2525  ;;  %v1244_v36 = vmul.f32 0.6931472, %v2524_v55  ;;  %v397_v11 = vsub.f32 1.5, %v396_v62  ;;  %2533 = vrsqrt.f32 %v3710_v29  ;;  %vm1710_vm10 = vweird.f32 %v3680_v39 }
 0x17e   :  { %v2528_v25 = vpop.eup %2527  ;;  %v1980_v59 = vmul.f32 0.6931472, %v2526_v30  ;;  %v972_v13 = vmul.f32 %v2520_v15, %v971_v2  ;;  %v584_v8 = vmin.f32 %v552_v12, 0.99999  ;;  %v2304_v60 = vclamps-f32 %v552_v12, 0.9999999 }
 0x17f   :  { %v1290_v19 = vmul.f32 0.5, %v1244_v36  ;;  %v1706_v9 = vmul.f32 %v2528_v25, %v3680_v39  ;;  %v3713_v32 = vpop.eup %2529  ;;  %v398_v44 = vmul.f32 %v2518_v14, %v397_v11  ;;  %vm1711_vm9 = vweird.f32 %v2528_v25 }
 0x180   :  { %v2026_v56 = vmul.f32 0.5, %v1980_v59  ;;  %v973_v1 = vadd.f32 %v2520_v15, %v972_v13  ;;  %v3719_v41 = vsub.f32 1.0, %v584_v8  ;;  %vm1715_vm11 = vcmp.eq.f32.partialorder %v1714_v38, 8.507059e+37  ;;  %vm1712_vm12 = vmor %vm1710_vm10, %vm1711_vm9 }
 0x181   :  { %v1322_v54 = vmul.f32 2.0, %v1290_v19  ;;  %v1707_v34 = vsub.f32 1.0, %v1706_v9  ;;  %v3721_v28 = vpop.eup %2531  ;;  %v1717_v50 = vor.u32 1.1754944e-38, %v1716_v4  ;;  %v3728_v45 = vsub.f32 1.0, %v2304_v60 }
 0x182   :  { %v2090_v21 = vmul.f32 %v2522_v20, %v2026_v56  ;;  %v977_v7 = vsel %vm976_vm8, %v2520_v15, %v973_v1  ;;  %2535 = vrcp.f32 %v3719_v41  ;;  %v399_v42 = vmul.f32 %v398_v44, %v3666_v61 }
 0x183   :  { %v2159_v48 = vmul.f32 %v2866_v63, %v1322_v54  ;;  %v982_v52 = vsel %vm3699_vm6, %v981_v57, %v977_v7  ;;  %v1708_v0 = vmul.f32 %v2528_v25, %v1707_v34  ;;  %v382_v43 = vmul.f32 %v3721_v28, %v3693_v35  ;;  %v3733_v17 = vpop.eup %2533 }
 0x184   :  { %v2122_v31 = vmul.f32 %v2722_v46, %v2090_v21  ;;  %v983_v16 = vmul.f32 %v982_v52, %v681_v53  ;;  %vm400_vm13 = vcmp.eq.f32.partialorder %v3666_v61, inf  ;;  %vm402_vm14 = vcmp.eq.f32.partialorder %v3666_v61, 0.0 }
 0x185   :  { %v1709_v51 = vadd.f32 %v2528_v25, %v1708_v0  ;;  %v963_v26 = vand.u32 2147483647, %v3719_v41  ;;  %v965_v5 = vand.u32 2147483648, %v3719_v41  ;;  %v403_v22 = vand.u32 2147483648, %v3666_v61 }
 0x186   :  { %v2191_v49 = vadd.f32 %v2159_v48, %v2122_v31  ;;  %2537 = vlog2.f32 %v983_v16  ;;  %v401_v24 = vsel %vm400_vm13, %v3666_v61, %v399_v42  ;;  %v383_v15 = vmul.f32 %v3721_v28, %v382_v43 }
 0x187   :  { %v1713_v14 = vsel %vm1712_vm12, %v2528_v25, %v1709_v51  ;;  %2539 = vrcp.f32 %v3728_v45  ;;  %v391_v27 = vand.u32 2147483648, %v3693_v35  ;;  %v680_v53 = vadd.f32 1.0, %v584_v8 }
 0x188   :  { %2223 = vst [vmem:[#allocation5 + $0x88] sm:$0xff] %v2191_v49  ;;  %v1718_v39 = vsel %vm1715_vm11, %v1717_v50, %v1713_v14  ;;  %v2536_v47 = vpop.eup %2535  ;;  %v3745_v10 = vadd.f32 1.0, %v2304_v60  ;;  %2541 = vrcp.f32 %v552_v12  ;;  %v404_v23 = vsel %vm402_vm14, %v403_v22, %v401_v24 }
 0x189   :  { %v1719_v18 = vmul.f32 %v1718_v39, %v3697_v33  ;;  %v955_v20 = vmul.f32 %v2536_v47, %v3719_v41  ;;  %vm959_vm15 = vweird.f32 %v3719_v41  ;;  %v557_v37 = vmax.f32 %v404_v23, 1e-15 }
 0x18a   :  { %vm3749_vm0 = vcmp.eq.f32.partialorder %v963_v26, 8.507059e+37  ;;  %v966_v61 = vor.u32 1.1754944e-38, %v965_v5  ;;  %v1699_v55 = vand.u32 2147483647, %v3728_v45  ;;  %v384_v2 = vmul.f32 0.5, %v383_v15  ;;  %v2723_v26 = vld [vmem:[#allocation2 + $0x80] sm:$0xff] }
 0x18b   :  { %2543 = vlog2.f32 %v1719_v18  ;;  %v956_v40 = vsub.f32 1.0, %v955_v20  ;;  %v589_v30 = vmin.f32 %v557_v37, 0.99999  ;;  %v370_v36 = vmul.f32 %v3733_v17, %v3710_v29 }
 0x18c   :  { %v2538_v6 = vpop.eup %2537  ;;  %v1701_v25 = vand.u32 2147483648, %v3728_v45  ;;  %v2309_v59 = vclamps-f32 %v557_v37, 0.9999999  ;;  %v385_v13 = vsub.f32 1.5, %v384_v2  ;;  %vm960_vm1 = vweird.f32 %v2536_v47 }
 0x18d   :  { %v2540_v3 = vpop.eup %2539  ;;  %v1242_v38 = vmul.f32 0.6931472, %v2538_v6  ;;  %v957_v19 = vmul.f32 %v2536_v47, %v956_v40  ;;  %v3760_v57 = vsub.f32 1.0, %v589_v30  ;;  %vm1695_vm2 = vweird.f32 %v3728_v45  ;;  %vm961_vm4 = vmor %vm959_vm15, %vm960_vm1 }
 0x18e   :  { %v1691_v62 = vmul.f32 %v2540_v3, %v3728_v45  ;;  %v3762_v9 = vpop.eup %2541  ;;  %v3765_v56 = vsub.f32 1.0, %v2309_v59  ;;  %vm388_vm3 = vcmp.eq.f32.partialorder %v3693_v35, inf  ;;  %2545 = vrsqrt.f32 %v3756_v58 }
 0x18f   :  { %v1289_v12 = vmul.f32 0.5, %v1242_v38  ;;  %v958_v8 = vadd.f32 %v2536_v47, %v957_v19  ;;  %2547 = vrcp.f32 %v3760_v57  ;;  %v371_v54 = vmul.f32 %v3733_v17, %v370_v36 }
 0x190   :  { %v1692_v11 = vsub.f32 1.0, %v1691_v62  ;;  %vm1696_vm5 = vweird.f32 %v2540_v3  ;;  %v386_v21 = vmul.f32 %v3721_v28, %v385_v13  ;;  %vm390_vm6 = vcmp.eq.f32.partialorder %v3693_v35, 0.0  ;;  %v3822_v13 = vpop.xlane.xlu1 %133 }
 0x191   :  { %v2544_v1 = vpop.eup %2543  ;;  %v1321_v4 = vmul.f32 2.0, %v1289_v12  ;;  %v962_v7 = vsel %vm961_vm4, %v2536_v47, %v958_v8  ;;  %vm3775_vm7 = vcmp.eq.f32.partialorder %v1699_v55, 8.507059e+37  ;;  %v1702_v48 = vor.u32 1.1754944e-38, %v1701_v25  ;;  %vm1697_vm8 = vmor %vm1695_vm2, %vm1696_vm5 }
 0x192   :  { %v1978_v34 = vmul.f32 0.6931472, %v2544_v1  ;;  %v1693_v60 = vmul.f32 %v2540_v3, %v1692_v11  ;;  %2549 = vrcp.f32 %v3765_v56  ;;  %v967_v0 = vsel %vm3749_vm0, %v966_v61, %v962_v7 }
 0x193   :  { %2551 = vrcp.f32 %v557_v37  ;;  %v2158_v46 = vmul.f32 %v2866_v63, %v1321_v4  ;;  %v968_v31 = vmul.f32 %v967_v0, %v680_v53  ;;  %v3785_v28 = vadd.f32 1.0, %v589_v30 }
 0x194   :  { %v2025_v52 = vmul.f32 0.5, %v1978_v34  ;;  %v1694_v41 = vadd.f32 %v2540_v3, %v1693_v60  ;;  %v3787_v16 = vadd.f32 1.0, %v2309_v59  ;;  %v3789_v51 = vpop.eup %2545  ;;  %v387_v42 = vmul.f32 %v386_v21, %v3693_v35 }
 0x195   :  { %v372_v43 = vmul.f32 0.5, %v371_v54  ;;  %v2548_v14 = vpop.eup %2547  ;;  %2553 = vlog2.f32 %v968_v31  ;;  %vm1034_vm9 = vweird.f32 %v3760_v57  ;;  %v1038_v45 = vand.u32 2147483647, %v3760_v57 }
 0x196   :  { %v2089_v50 = vmul.f32 %v3713_v32, %v2025_v52  ;;  %v1698_v49 = vsel %vm1697_vm8, %v2540_v3, %v1694_v41  ;;  %v1030_v18 = vmul.f32 %v2548_v14, %v3760_v57  ;;  %v1040_v32 = vand.u32 2147483648, %v3760_v57 }
 0x197   :  { %v1703_v39 = vsel %vm3775_vm7, %v1702_v48, %v1698_v49  ;;  %v1774_v15 = vand.u32 2147483647, %v3765_v56  ;;  %v389_v47 = vsel %vm388_vm3, %v3693_v35, %v387_v42  ;;  %v373_v53 = vsub.f32 1.5, %v372_v43 }
 0x198   :  { %v2121_v5 = vmul.f32 %v2723_v26, %v2089_v50  ;;  %v1704_v22 = vmul.f32 %v1703_v39, %v3745_v10  ;;  %v2550_v24 = vpop.eup %2549  ;;  %v430_v23 = vmul.f32 %v3789_v51, %v3756_v58  ;;  %v1031_v10 = vsub.f32 1.0, %v1030_v18 }
 0x199   :  { %v3806_v20 = vpop.eup %2551  ;;  %v1766_v6 = vmul.f32 %v2550_v24, %v3765_v56  ;;  %vm1035_vm10 = vweird.f32 %v2548_v14  ;;  %v1776_v33 = vand.u32 2147483648, %v3765_v56  ;;  %v392_v61 = vsel %vm390_vm6, %v391_v27, %v389_v47 }
 0x19a   :  { %v2190_v37 = vadd.f32 %v2158_v46, %v2121_v5  ;;  %2555 = vlog2.f32 %v1704_v22  ;;  %vm376_vm11 = vcmp.eq.f32.partialorder %v3710_v29, inf  ;;  %v431_v55 = vmul.f32 %v3789_v51, %v430_v23  ;;  %vm1036_vm15 = vmor %vm1034_vm9, %vm1035_vm10 }
 0x19b   :  { %v1032_v2 = vmul.f32 %v2548_v14, %v1031_v10  ;;  %v1767_v3 = vsub.f32 1.0, %v1766_v6  ;;  %v556_v38 = vmax.f32 %v392_v61, 1e-15  ;;  %v374_v40 = vmul.f32 %v3733_v17, %v373_v53  ;;  %v2554_v30 = vpop.eup %2553 }
 0x19c   :  { %2222 = vst [vmem:[#allocation5 + $0x80] sm:$0xff] %v2190_v37  ;;  %vm3817_vm12 = vcmp.eq.f32.partialorder %v1038_v45, 8.507059e+37  ;;  %v1041_v62 = vor.u32 1.1754944e-38, %v1040_v32  ;;  %vm1770_vm13 = vweird.f32 %v3765_v56  ;;  %vm1771_vm14 = vweird.f32 %v2550_v24 }
 0x19d   :  { %v1240_v35 = vmul.f32 0.6931472, %v2554_v30  ;;  %v1033_v27 = vadd.f32 %v2548_v14, %v1032_v2  ;;  %v1768_v25 = vmul.f32 %v2550_v24, %v1767_v3  ;;  %v588_v59 = vmin.f32 %v556_v38, 0.99999  ;;  %vm1772_vm1 = vmor %vm1770_vm13, %vm1771_vm14 }
 0x19e   :  { %vm3827_vm0 = vcmp.eq.f32.partialorder %v1774_v15, 8.507059e+37  ;;  %v1777_v12 = vor.u32 1.1754944e-38, %v1776_v33  ;;  %v2308_v19 = vclamps-f32 %v556_v38, 0.9999999  ;;  %v432_v11 = vmul.f32 0.5, %v431_v55 }
 0x19f   :  { %v1288_v4 = vmul.f32 0.5, %v1240_v35  ;;  %v1037_v8 = vsel %vm1036_vm15, %v2548_v14, %v1033_v27  ;;  %v1769_v54 = vadd.f32 %v2550_v24, %v1768_v25  ;;  %v375_v34 = vmul.f32 %v374_v40, %v3710_v29 }
 0x1a0   :  { %v2556_v1 = vpop.eup %2555  ;;  %v1042_v21 = vsel %vm3817_vm12, %v1041_v62, %v1037_v8  ;;  %v3837_v57 = vsub.f32 1.0, %v588_v59  ;;  %2557 = vrsqrt.f32 %v3822_v13  ;;  %v3841_v52 = vsub.f32 1.0, %v2308_v19 }
 0x1a1   :  { %v1976_v60 = vmul.f32 0.6931472, %v2556_v1  ;;  %v1320_v7 = vmul.f32 2.0, %v1288_v4  ;;  %v1043_v44 = vmul.f32 %v1042_v21, %v3785_v28  ;;  %v1773_v48 = vsel %vm1772_vm1, %v2550_v24, %v1769_v54 }
 0x1a2   :  { %v1778_v41 = vsel %vm3827_vm0, %v1777_v12, %v1773_v48  ;;  %2559 = vrcp.f32 %v3837_v57  ;;  %v433_v46 = vsub.f32 1.5, %v432_v11  ;;  %v377_v31 = vsel %vm376_vm11, %v3710_v29, %v375_v34 }
 0x1a3   :  { %v2024_v0 = vmul.f32 0.5, %v1976_v60  ;;  %2561 = vlog2.f32 %v1043_v44  ;;  %v1779_v56 = vmul.f32 %v1778_v41, %v3787_v16  ;;  %v2157_v28 = vmul.f32 %v2866_v63, %v1320_v7  ;;  %v2724_v16 = vld [vmem:[#allocation2 + $0x78] sm:$0xff]  ;;  %v2725_v7 = vld [vmem:[#allocation2 + $0xa0] sm:$0xff] }
 0x1a4   :  { %2563 = vrcp.f32 %v3841_v52  ;;  %v379_v49 = vand.u32 2147483648, %v3710_v29  ;;  %vm378_vm2 = vcmp.eq.f32.partialorder %v3710_v29, 0.0  ;;  %vm436_vm3 = vcmp.eq.f32.partialorder %v3756_v58, inf }
 0x1a5   :  { %v2088_v50 = vmul.f32 %v3762_v9, %v2024_v0  ;;  %2565 = vlog2.f32 %v1779_v56  ;;  %v1023_v14 = vand.u32 2147483647, %v3837_v57  ;;  %v434_v9 = vmul.f32 %v3789_v51, %v433_v46 }
 0x1a6   :  { %v3856_v42 = vpop.eup %2557  ;;  %v380_v39 = vsel %vm378_vm2, %v379_v49, %v377_v31  ;;  %v684_v45 = vadd.f32 1.0, %v588_v59  ;;  %2567 = vrcp.f32 %v556_v38  ;;  %vm438_vm4 = vcmp.eq.f32.partialorder %v3756_v58, 0.0 }
 0x1a7   :  { %v2120_v43 = vmul.f32 %v2724_v16, %v2088_v50  ;;  %v3860_v26 = vmax.f32 %v380_v39, 1e-15  ;;  %v439_v5 = vand.u32 2147483648, %v3756_v58  ;;  %vm1019_vm5 = vweird.f32 %v3837_v57 }
 0x1a8   :  { %v2560_v29 = vpop.eup %2559  ;;  %v1025_v18 = vand.u32 2147483648, %v3837_v57  ;;  %v1420_v32 = vadd.f32 1.0, %v2308_v19  ;;  %v435_v53 = vmul.f32 %v434_v9, %v3756_v58  ;;  %vm3870_vm6 = vcmp.eq.f32.partialorder %v1023_v14, 8.507059e+37 }
 0x1a9   :  { %v2189_v22 = vadd.f32 %v2157_v28, %v2120_v43  ;;  %v2562_v24 = vpop.eup %2561  ;;  %v1015_v15 = vmul.f32 %v2560_v29, %v3837_v57  ;;  %v587_v51 = vmin.f32 %v3860_v26, 0.99999  ;;  %v2307_v47 = vclamps-f32 %v3860_v26, 0.9999999 }
 0x1aa   :  { %v2564_v23 = vpop.eup %2563  ;;  %v1250_v37 = vmul.f32 0.6931472, %v2562_v24  ;;  %vm1755_vm7 = vweird.f32 %v3841_v52  ;;  %v1759_v6 = vand.u32 2147483647, %v3841_v52  ;;  %v1761_v2 = vand.u32 2147483648, %v3841_v52 }
 0x1ab   :  { %2221 = vst [vmem:[#allocation5 + $0x78] sm:$0xff] %v2189_v22  ;;  %v2566_v33 = vpop.eup %2565  ;;  %v1016_v61 = vsub.f32 1.0, %v1015_v15  ;;  %v1751_v55 = vmul.f32 %v2564_v23, %v3841_v52  ;;  %v418_v3 = vmul.f32 %v3856_v42, %v3822_v13  ;;  %vm1020_vm8 = vweird.f32 %v2560_v29 }
 0x1ac   :  { %v1293_v38 = vmul.f32 0.5, %v1250_v37  ;;  %v1986_v40 = vmul.f32 0.6931472, %v2566_v33  ;;  %v3880_v30 = vsub.f32 1.0, %v587_v51  ;;  %v3882_v36 = vpop.eup %2567  ;;  %v3884_v27 = vsub.f32 1.0, %v2307_v47  ;;  %vm1021_vm10 = vmor %vm1019_vm5, %vm1020_vm8 }
 0x1ad   :  { %v1017_v62 = vmul.f32 %v2560_v29, %v1016_v61  ;;  %v1752_v35 = vsub.f32 1.0, %v1751_v55  ;;  %v437_v25 = vsel %vm436_vm3, %v3756_v58, %v435_v53  ;;  %v1026_v12 = vor.u32 1.1754944e-38, %v1025_v18 }
 0x1ae   :  { %v1325_v59 = vmul.f32 2.0, %v1293_v38  ;;  %v2029_v17 = vmul.f32 0.5, %v1986_v40  ;;  %2569 = vrcp.f32 %v3880_v30  ;;  %vm1756_vm9 = vweird.f32 %v2564_v23 }
 0x1af   :  { %v1018_v19 = vadd.f32 %v2560_v29, %v1017_v62  ;;  %v1753_v11 = vmul.f32 %v2564_v23, %v1752_v35  ;;  %v419_v1 = vmul.f32 %v3856_v42, %v418_v3  ;;  %2571 = vrcp.f32 %v3884_v27  ;;  %vm1757_vm12 = vmor %vm1755_vm7, %vm1756_vm9 }
 0x1b0   :  { %v2093_v4 = vmul.f32 %v3806_v20, %v2029_v17  ;;  %v2162_v8 = vmul.f32 %v2866_v63, %v1325_v59  ;;  %v440_v54 = vsel %vm438_vm4, %v439_v5, %v437_v25  ;;  %vm1760_vm11 = vcmp.eq.f32.partialorder %v1759_v6, 8.507059e+37  ;;  %v3915_v5 = vpop.xlane.xlu0 %131 }
 0x1b1   :  { %v1022_v34 = vsel %vm1021_vm10, %v2560_v29, %v1018_v19  ;;  %v1754_v60 = vadd.f32 %v2564_v23, %v1753_v11  ;;  %v1762_v21 = vor.u32 1.1754944e-38, %v1761_v2  ;;  %v683_v48 = vadd.f32 1.0, %v587_v51 }
 0x1b2   :  { %v2125_v44 = vmul.f32 %v2725_v7, %v2093_v4  ;;  %v1027_v20 = vsel %vm3870_vm6, %v1026_v12, %v1022_v34  ;;  %v427_v57 = vand.u32 2147483648, %v3822_v13  ;;  %v3904_v46 = vmax.f32 %v440_v54, 1e-15 }
 0x1b3   :  { %v1028_v0 = vmul.f32 %v1027_v20, %v684_v45  ;;  %v1758_v41 = vsel %vm1757_vm12, %v2564_v23, %v1754_v60  ;;  %v420_v58 = vmul.f32 0.5, %v419_v1  ;;  %v1008_v28 = vand.u32 2147483647, %v3880_v30 }
 0x1b4   :  { %v2570_v56 = vpop.eup %2569  ;;  %v2194_v31 = vadd.f32 %v2162_v8, %v2125_v44  ;;  %v1763_v50 = vsel %vm1760_vm11, %v1762_v21, %v1758_v41  ;;  %v3907_v49 = vadd.f32 1.0, %v2307_v47  ;;  %v1010_v43 = vand.u32 2147483648, %v3880_v30 }
 0x1b5   :  { %2573 = vlog2.f32 %v1028_v0  ;;  %v1764_v16 = vmul.f32 %v1763_v50, %v1420_v32  ;;  %v1000_v52 = vmul.f32 %v2570_v56, %v3880_v30  ;;  %v2572_v14 = vpop.eup %2571  ;;  %v592_v39 = vmin.f32 %v3904_v46, 0.99999 }
 0x1b6   :  { %2226 = vst [vmem:[#allocation5 + $0xa0] sm:$0xff] %v2194_v31  ;;  %2575 = vrcp.f32 %v3860_v26  ;;  %v2312_v9 = vclamps-f32 %v3904_v46, 0.9999999  ;;  %v421_v45 = vsub.f32 1.5, %v420_v58  ;;  %vm424_vm13 = vcmp.eq.f32.partialorder %v3822_v13, inf  ;;  %v2726_v58 = vld [vmem:[#allocation2 + $0x98] sm:$0xff] }
 0x1b7   :  { %2577 = vlog2.f32 %v1764_v16  ;;  %v1001_v29 = vsub.f32 1.0, %v1000_v52  ;;  %v1736_v22 = vmul.f32 %v2572_v14, %v3884_v27  ;;  %v1744_v18 = vand.u32 2147483647, %v3884_v27 }
 0x1b8   :  { %vm426_vm14 = vcmp.eq.f32.partialorder %v3822_v13, 0.0  ;;  %vm1005_vm15 = vweird.f32 %v2570_v56  ;;  %v1746_v26 = vand.u32 2147483648, %v3884_v27  ;;  %v3921_v32 = vsub.f32 1.0, %v592_v39 }
 0x1b9   :  { %v3923_v24 = vsub.f32 1.0, %v2312_v9  ;;  %v1002_v15 = vmul.f32 %v2570_v56, %v1001_v29  ;;  %v1737_v51 = vsub.f32 1.0, %v1736_v22  ;;  %v422_v47 = vmul.f32 %v3856_v42, %v421_v45 }
 0x1ba   :  { %2579 = vrsqrt.f32 %v3915_v5  ;;  %vm1004_vm0 = vweird.f32 %v3880_v30  ;;  %vm3928_vm1 = vcmp.eq.f32.partialorder %v1008_v28, 8.507059e+37  ;;  %vm1740_vm2 = vweird.f32 %v3884_v27 }
 0x1bb   :  { %2581 = vrcp.f32 %v3921_v32  ;;  %v2574_v23 = vpop.eup %2573  ;;  %v1003_v37 = vadd.f32 %v2570_v56, %v1002_v15  ;;  %v1738_v10 = vmul.f32 %v2572_v14, %v1737_v51  ;;  %vm1741_vm3 = vweird.f32 %v2572_v14  ;;  %vm1006_vm4 = vmor %vm1004_vm0, %vm1005_vm15 }
 0x1bc   :  { %2583 = vrcp.f32 %v3923_v24  ;;  %v3935_v6 = vpop.eup %2575  ;;  %v1248_v42 = vmul.f32 0.6931472, %v2574_v23  ;;  %v1011_v33 = vor.u32 1.1754944e-38, %v1010_v43  ;;  %vm3938_vm5 = vcmp.eq.f32.partialorder %v1744_v18, 8.507059e+37  ;;  %vm1742_vm6 = vmor %vm1740_vm2, %vm1741_vm3 }
 0x1bd   :  { %v1747_v55 = vor.u32 1.1754944e-38, %v1746_v26  ;;  %v2578_v2 = vpop.eup %2577  ;;  %v1007_v3 = vsel %vm1006_vm4, %v2570_v56, %v1003_v37  ;;  %v1739_v38 = vadd.f32 %v2572_v14, %v1738_v10  ;;  %v3942_v40 = vadd.f32 1.0, %v592_v39 }
 0x1be   :  { %v423_v30 = vmul.f32 %v422_v47, %v3822_v13  ;;  %v1292_v62 = vmul.f32 0.5, %v1248_v42  ;;  %v1984_v35 = vmul.f32 0.6931472, %v2578_v2  ;;  %v1012_v25 = vsel %vm3928_vm1, %v1011_v33, %v1007_v3  ;;  %v4000_v3 = vpop.xlane.xlu2 %141 }
 0x1bf   :  { %v3950_v59 = vadd.f32 1.0, %v2312_v9  ;;  %v1013_v12 = vmul.f32 %v1012_v25, %v683_v48  ;;  %v1743_v19 = vsel %vm1742_vm6, %v2572_v14, %v1739_v38  ;;  %vm1079_vm7 = vweird.f32 %v3921_v32  ;;  %v2727_v25 = vld [vmem:[#allocation2 + $0x90] sm:$0xff] }
 0x1c0   :  { %v3952_v17 = vpop.eup %2579  ;;  %v425_v11 = vsel %vm424_vm13, %v3822_v13, %v423_v30  ;;  %v1324_v4 = vmul.f32 2.0, %v1292_v62  ;;  %v2028_v8 = vmul.f32 0.5, %v1984_v35  ;;  %v1748_v54 = vsel %vm3938_vm5, %v1747_v55, %v1743_v19  ;;  %v4012_v19 = vpop.xlane.xlu1 %139 }
 0x1c1   :  { %v2582_v1 = vpop.eup %2581  ;;  %v428_v27 = vsel %vm426_vm14, %v427_v57, %v425_v11  ;;  %2585 = vlog2.f32 %v1013_v12  ;;  %v1749_v60 = vmul.f32 %v1748_v54, %v3907_v49  ;;  %v1083_v7 = vand.u32 2147483647, %v3921_v32 }
 0x1c2   :  { %v2584_v34 = vpop.eup %2583  ;;  %v1075_v21 = vmul.f32 %v2582_v1, %v3921_v32  ;;  %v2092_v44 = vmul.f32 %v3882_v36, %v2028_v8  ;;  %v2161_v20 = vmul.f32 %v2866_v63, %v1324_v4  ;;  %v1085_v48 = vand.u32 2147483648, %v3921_v32 }
 0x1c3   :  { %v1811_v0 = vmul.f32 %v2584_v34, %v3923_v24  ;;  %2587 = vlog2.f32 %v1749_v60  ;;  %v3971_v13 = vmax.f32 %v428_v27, 1e-15  ;;  %v406_v57 = vmul.f32 %v3952_v17, %v3915_v5 }
 0x1c4   :  { %v1076_v41 = vsub.f32 1.0, %v1075_v21  ;;  %v2124_v56 = vmul.f32 %v2726_v58, %v2092_v44  ;;  %v1819_v50 = vand.u32 2147483647, %v3923_v24  ;;  %v1821_v36 = vand.u32 2147483648, %v3923_v24 }
 0x1c5   :  { %v1812_v31 = vsub.f32 1.0, %v1811_v0  ;;  %vm1080_vm8 = vweird.f32 %v2582_v1  ;;  %v591_v49 = vmin.f32 %v3971_v13, 0.99999  ;;  %v2311_v16 = vclamps-f32 %v3971_v13, 0.9999999  ;;  %v4024_v0 = vpop.xlane.xlu0 %137 }
 0x1c6   :  { %v1077_v28 = vmul.f32 %v2582_v1, %v1076_v41  ;;  %v2193_v52 = vadd.f32 %v2161_v20, %v2124_v56  ;;  %vm1815_vm9 = vweird.f32 %v3923_v24  ;;  %vm1816_vm10 = vweird.f32 %v2584_v34  ;;  %vm1081_vm12 = vmor %vm1079_vm7, %vm1080_vm8 }
 0x1c7   :  { %v1813_v43 = vmul.f32 %v2584_v34, %v1812_v31  ;;  %v2586_v14 = vpop.eup %2585  ;;  %vm3980_vm11 = vcmp.eq.f32.partialorder %v1083_v7, 8.507059e+37  ;;  %v3984_v45 = vsub.f32 1.0, %v591_v49  ;;  %v407_v29 = vmul.f32 %v3952_v17, %v406_v57  ;;  %vm1817_vm13 = vmor %vm1815_vm9, %vm1816_vm10 }
 0x1c8   :  { %v1078_v39 = vadd.f32 %v2582_v1, %v1077_v28  ;;  %2225 = vst [vmem:[#allocation5 + $0x98] sm:$0xff] %v2193_v52  ;;  %v1246_v22 = vmul.f32 0.6931472, %v2586_v14  ;;  %v1086_v18 = vor.u32 1.1754944e-38, %v1085_v48  ;;  %v3989_v15 = vsub.f32 1.0, %v2311_v16 }
 0x1c9   :  { %v1814_v26 = vadd.f32 %v2584_v34, %v1813_v43  ;;  %v2588_v51 = vpop.eup %2587  ;;  %vm1820_vm14 = vcmp.eq.f32.partialorder %v1819_v50, 8.507059e+37  ;;  %v1822_v53 = vor.u32 1.1754944e-38, %v1821_v36  ;;  %2589 = vrcp.f32 %v3984_v45 }
 0x1ca   :  { %v1082_v47 = vsel %vm1081_vm12, %v2582_v1, %v1078_v39  ;;  %v1291_v23 = vmul.f32 0.5, %v1246_v22  ;;  %v1982_v37 = vmul.f32 0.6931472, %v2588_v51  ;;  %2591 = vrcp.f32 %v3904_v46 }
 0x1cb   :  { %v1087_v10 = vsel %vm3980_vm11, %v1086_v18, %v1082_v47  ;;  %v1818_v32 = vsel %vm1817_vm13, %v2584_v34, %v1814_v26  ;;  %v408_v61 = vmul.f32 0.5, %v407_v29  ;;  %2593 = vrcp.f32 %v3989_v15 }
 0x1cc   :  { %v1088_v42 = vmul.f32 %v1087_v10, %v3942_v40  ;;  %v1823_v33 = vsel %vm1820_vm14, %v1822_v53, %v1818_v32  ;;  %v1323_v55 = vmul.f32 2.0, %v1291_v23  ;;  %v2027_v2 = vmul.f32 0.5, %v1982_v37  ;;  %v2728_v37 = vld [vmem:[#allocation2 + $0xb8] sm:$0xff] }
 0x1cd   :  { %v1824_v24 = vmul.f32 %v1823_v33, %v3950_v59  ;;  %v1068_v38 = vand.u32 2147483647, %v3984_v45  ;;  %v1070_v40 = vand.u32 2147483648, %v3984_v45  ;;  %v409_v35 = vsub.f32 1.5, %v408_v61 }
 0x1ce   :  { %2595 = vlog2.f32 %v1088_v42  ;;  %v2091_v30 = vmul.f32 %v3935_v6, %v2027_v2  ;;  %v2160_v62 = vmul.f32 %v2866_v63, %v1323_v55  ;;  %vm412_vm15 = vcmp.eq.f32.partialorder %v3915_v5, inf }
 0x1cf   :  { %2597 = vlog2.f32 %v1824_v24  ;;  %v2590_v46 = vpop.eup %2589  ;;  %vm414_vm0 = vcmp.eq.f32.partialorder %v3915_v5, 0.0  ;;  %v415_v6 = vand.u32 2147483648, %v3915_v5  ;;  %v687_v1 = vadd.f32 1.0, %v591_v49 }
 0x1d0   :  { %2599 = vrsqrt.f32 %v4000_v3  ;;  %v2123_v59 = vmul.f32 %v2727_v25, %v2091_v30  ;;  %v1060_v12 = vmul.f32 %v2590_v46, %v3984_v45  ;;  %v2592_v11 = vpop.eup %2591  ;;  %vm1064_vm1 = vweird.f32 %v3984_v45 }
 0x1d1   :  { %2601 = vrcp.f32 %v3971_v13  ;;  %v1423_v4 = vadd.f32 1.0, %v2311_v16  ;;  %v410_v8 = vmul.f32 %v3952_v17, %v409_v35  ;;  %v2594_v54 = vpop.eup %2593  ;;  %vm4016_vm2 = vcmp.eq.f32.partialorder %v1068_v38, 8.507059e+37 }
 0x1d2   :  { %v2192_v27 = vadd.f32 %v2160_v62, %v2123_v59  ;;  %v1061_v34 = vsub.f32 1.0, %v1060_v12  ;;  %v1071_v21 = vor.u32 1.1754944e-38, %v1070_v40  ;;  %v1796_v44 = vmul.f32 %v2594_v54, %v3989_v15 }
 0x1d3   :  { %v1804_v20 = vand.u32 2147483647, %v3989_v15  ;;  %v411_v48 = vmul.f32 %v410_v8, %v3915_v5  ;;  %2603 = vrsqrt.f32 %v4012_v19  ;;  %vm1065_vm3 = vweird.f32 %v2590_v46 }
 0x1d4   :  { %v2596_v7 = vpop.eup %2595  ;;  %2224 = vst [vmem:[#allocation5 + $0x90] sm:$0xff] %v2192_v27  ;;  %v1062_v13 = vmul.f32 %v2590_v46, %v1061_v34  ;;  %v1806_v57 = vand.u32 2147483648, %v3989_v15  ;;  %v1797_v31 = vsub.f32 1.0, %v1796_v44  ;;  %vm1801_vm4 = vweird.f32 %v2594_v54  ;;  %vm1066_vm5 = vmor %vm1064_vm1, %vm1065_vm3  ;;  %v4085_v27 = vpop.xlane.xlu2 %147 }
 0x1d5   :  { %v2598_v17 = vpop.eup %2597  ;;  %v1256_v41 = vmul.f32 0.6931472, %v2596_v7  ;;  %v413_v50 = vsel %vm412_vm15, %v3915_v5, %v411_v48  ;;  %2605 = vrsqrt.f32 %v4024_v0  ;;  %vm1800_vm6 = vweird.f32 %v3989_v15 }
 0x1d6   :  { %v4027_v58 = vpop.eup %2599  ;;  %v1992_v56 = vmul.f32 0.6931472, %v2598_v17  ;;  %v1063_v49 = vadd.f32 %v2590_v46, %v1062_v13  ;;  %v416_v16 = vsel %vm414_vm0, %v415_v6, %v413_v50  ;;  %v1798_v43 = vmul.f32 %v2594_v54, %v1797_v31  ;;  %vm1802_vm8 = vmor %vm1800_vm6, %vm1801_vm4 }
 0x1d7   :  { %v4032_v36 = vpop.eup %2601  ;;  %v1296_v28 = vmul.f32 0.5, %v1256_v41  ;;  %v4039_v14 = vmax.f32 %v416_v16, 1e-15  ;;  %v466_v39 = vmul.f32 %v4027_v58, %v4000_v3  ;;  %vm4044_vm7 = vcmp.eq.f32.partialorder %v1804_v20, 8.507059e+37 }
 0x1d8   :  { %v2032_v52 = vmul.f32 0.5, %v1992_v56  ;;  %v1067_v29 = vsel %vm1066_vm5, %v2590_v46, %v1063_v49  ;;  %v1799_v26 = vadd.f32 %v2594_v54, %v1798_v43  ;;  %v1807_v23 = vor.u32 1.1754944e-38, %v1806_v57 }
 0x1d9   :  { %v1328_v9 = vmul.f32 2.0, %v1296_v28  ;;  %v4048_v5 = vpop.eup %2603  ;;  %v1072_v45 = vsel %vm4016_vm2, %v1071_v21, %v1067_v29  ;;  %v590_v51 = vmin.f32 %v4039_v14, 0.99999  ;;  %v2310_v15 = vclamps-f32 %v4039_v14, 0.9999999 }
 0x1da   :  { %v2096_v18 = vmul.f32 %v2592_v11, %v2032_v52  ;;  %v1073_v53 = vmul.f32 %v1072_v45, %v687_v1  ;;  %v1803_v32 = vsel %vm1802_vm8, %v2594_v54, %v1799_v26  ;;  %v467_v33 = vmul.f32 %v4027_v58, %v466_v39 }
 0x1db   :  { %v2165_v47 = vmul.f32 %v2866_v63, %v1328_v9  ;;  %v4056_v42 = vsub.f32 1.0, %v590_v51  ;;  %v4059_v61 = vpop.eup %2605  ;;  %v1808_v55 = vsel %vm4044_vm7, %v1807_v23, %v1803_v32  ;;  %v4063_v2 = vsub.f32 1.0, %v2310_v15  ;;  %v2729_v32 = vld [vmem:[#allocation2 + $0xb0] sm:$0xff] }
 0x1dc   :  { %v2128_v10 = vmul.f32 %v2728_v37, %v2096_v18  ;;  %2607 = vlog2.f32 %v1073_v53  ;;  %v454_v24 = vmul.f32 %v4048_v5, %v4012_v19  ;;  %v1809_v30 = vmul.f32 %v1808_v55, %v1423_v4 }
 0x1dd   :  { %2609 = vrcp.f32 %v4056_v42  ;;  %v468_v62 = vmul.f32 0.5, %v467_v33  ;;  %vm472_vm9 = vcmp.eq.f32.partialorder %v4000_v3, inf  ;;  %vm474_vm10 = vcmp.eq.f32.partialorder %v4000_v3, 0.0 }
 0x1de   :  { %v2197_v38 = vadd.f32 %v2165_v47, %v2128_v10  ;;  %2611 = vrcp.f32 %v4063_v2  ;;  %v1053_v40 = vand.u32 2147483647, %v4056_v42  ;;  %v475_v46 = vand.u32 2147483648, %v4000_v3 }
 0x1df   :  { %2613 = vlog2.f32 %v1809_v30  ;;  %v455_v35 = vmul.f32 %v4048_v5, %v454_v24  ;;  %v442_v25 = vmul.f32 %v4059_v61, %v4024_v0  ;;  %v4076_v59 = vadd.f32 1.0, %v590_v51 }
 0x1e0   :  { %2229 = vst [vmem:[#allocation5 + $0xb8] sm:$0xff] %v2197_v38  ;;  %v4078_v12 = vadd.f32 1.0, %v2310_v15  ;;  %v469_v6 = vsub.f32 1.5, %v468_v62  ;;  %vm460_vm11 = vcmp.eq.f32.partialorder %v4012_v19, inf  ;;  %v463_v11 = vand.u32 2147483648, %v4012_v19 }
 0x1e1   :  { %vm1049_vm12 = vweird.f32 %v4056_v42  ;;  %v1055_v4 = vand.u32 2147483648, %v4056_v42  ;;  %v456_v8 = vmul.f32 0.5, %v455_v35  ;;  %v443_v54 = vmul.f32 %v4059_v61, %v442_v25 }
 0x1e2   :  { %v2608_v1 = vpop.eup %2607  ;;  %vm1785_vm13 = vweird.f32 %v4063_v2  ;;  %v1789_v21 = vand.u32 2147483647, %v4063_v2  ;;  %v1791_v7 = vand.u32 2147483648, %v4063_v2  ;;  %v470_v44 = vmul.f32 %v4027_v58, %v469_v6 }
 0x1e3   :  { %v2610_v34 = vpop.eup %2609  ;;  %v1254_v60 = vmul.f32 0.6931472, %v2608_v1  ;;  %vm4092_vm14 = vcmp.eq.f32.partialorder %v1053_v40, 8.507059e+37  ;;  %v457_v41 = vsub.f32 1.5, %v456_v8  ;;  %vm462_vm15 = vcmp.eq.f32.partialorder %v4012_v19, 0.0 }
 0x1e4   :  { %v2612_v20 = vpop.eup %2611  ;;  %v1045_v48 = vmul.f32 %v2610_v34, %v4056_v42  ;;  %v444_v13 = vmul.f32 0.5, %v443_v54  ;;  %v471_v50 = vmul.f32 %v470_v44, %v4000_v3  ;;  %2615 = vrsqrt.f32 %v4085_v27 }
 0x1e5   :  { %v2614_v57 = vpop.eup %2613  ;;  %v1295_v56 = vmul.f32 0.5, %v1254_v60  ;;  %v1781_v31 = vmul.f32 %v2612_v20, %v4063_v2  ;;  %vm1050_vm0 = vweird.f32 %v2610_v34  ;;  %v458_v49 = vmul.f32 %v4048_v5, %v457_v41 }
 0x1e6   :  { %v1990_v58 = vmul.f32 0.6931472, %v2614_v57  ;;  %v1046_v28 = vsub.f32 1.0, %v1045_v48  ;;  %v473_v43 = vsel %vm472_vm9, %v4000_v3, %v471_v50  ;;  %v445_v39 = vsub.f32 1.5, %v444_v13  ;;  %vm1051_vm2 = vmor %vm1049_vm12, %vm1050_vm0 }
 0x1e7   :  { %v1327_v16 = vmul.f32 2.0, %v1295_v56  ;;  %v1782_v52 = vsub.f32 1.0, %v1781_v31  ;;  %v476_v22 = vsel %vm474_vm10, %v475_v46, %v473_v43  ;;  %v459_v18 = vmul.f32 %v458_v49, %v4012_v19  ;;  %v4163_v31 = vpop.xlane.xlu1 %145 }
 0x1e8   :  { %v2031_v9 = vmul.f32 0.5, %v1990_v58  ;;  %v1047_v29 = vmul.f32 %v2610_v34, %v1046_v28  ;;  %v1056_v45 = vor.u32 1.1754944e-38, %v1055_v4  ;;  %vm1786_vm1 = vweird.f32 %v2612_v20 }
 0x1e9   :  { %v1783_v26 = vmul.f32 %v2612_v20, %v1782_v52  ;;  %v563_v51 = vmax.f32 %v476_v22, 1e-15  ;;  %v2164_v47 = vmul.f32 %v2866_v63, %v1327_v16  ;;  %v461_v23 = vsel %vm460_vm11, %v4012_v19, %v459_v18  ;;  %vm1787_vm4 = vmor %vm1785_vm13, %vm1786_vm1 }
 0x1ea   :  { %v2095_v5 = vmul.f32 %v4032_v36, %v2031_v9  ;;  %v1048_v53 = vadd.f32 %v2610_v34, %v1047_v29  ;;  %v4112_v15 = vpop.eup %2615  ;;  %vm1790_vm3 = vcmp.eq.f32.partialorder %v1789_v21, 8.507059e+37  ;;  %v446_v10 = vmul.f32 %v4059_v61, %v445_v39 }
 0x1eb   :  { %v1784_v3 = vadd.f32 %v2612_v20, %v1783_v26  ;;  %v595_v37 = vmin.f32 %v563_v51, 0.99999  ;;  %v1792_v55 = vor.u32 1.1754944e-38, %v1791_v7  ;;  %v2315_v24 = vclamps-f32 %v563_v51, 0.9999999 }
 0x1ec   :  { %v2127_v36 = vmul.f32 %v2729_v32, %v2095_v5  ;;  %v1052_v33 = vsel %vm1051_vm2, %v2610_v34, %v1048_v53  ;;  %v464_v62 = vsel %vm462_vm15, %v463_v11, %v461_v23  ;;  %2617 = vrcp.f32 %v4039_v14 }
 0x1ed   :  { %v1057_v38 = vsel %vm4092_vm14, %v1056_v45, %v1052_v33  ;;  %v1788_v30 = vsel %vm1787_vm4, %v2612_v20, %v1784_v3  ;;  %v4123_v42 = vsub.f32 1.0, %v595_v37  ;;  %v447_v35 = vmul.f32 %v446_v10, %v4024_v0 }
 0x1ee   :  { %v2196_v40 = vadd.f32 %v2164_v47, %v2127_v36  ;;  %v1058_v61 = vmul.f32 %v1057_v38, %v4076_v59  ;;  %v1793_v46 = vsel %vm1790_vm3, %v1792_v55, %v1788_v30  ;;  %v4132_v25 = vsub.f32 1.0, %v2315_v24  ;;  %v2730_v30 = vld [vmem:[#allocation2 + $0xa8] sm:$0xff] }
 0x1ef   :  { %v1794_v2 = vmul.f32 %v1793_v46, %v4078_v12  ;;  %2619 = vrcp.f32 %v4123_v42  ;;  %v562_v6 = vmax.f32 %v464_v62, 1e-15  ;;  %v502_v19 = vmul.f32 %v4112_v15, %v4085_v27 }
 0x1f0   :  { %2228 = vst [vmem:[#allocation5 + $0xb0] sm:$0xff] %v2196_v40  ;;  %2621 = vlog2.f32 %v1058_v61  ;;  %vm448_vm5 = vcmp.eq.f32.partialorder %v4024_v0, inf  ;;  %vm450_vm6 = vcmp.eq.f32.partialorder %v4024_v0, 0.0  ;;  %v1128_v14 = vand.u32 2147483647, %v4123_v42 }
 0x1f1   :  { %2623 = vlog2.f32 %v1794_v2  ;;  %v451_v59 = vand.u32 2147483648, %v4024_v0  ;;  %v511_v12 = vand.u32 2147483648, %v4085_v27  ;;  %v1130_v11 = vand.u32 2147483648, %v4123_v42 }
 0x1f2   :  { %2625 = vrcp.f32 %v4132_v25  ;;  %v594_v1 = vmin.f32 %v562_v6, 0.99999  ;;  %v2314_v4 = vclamps-f32 %v562_v6, 0.9999999  ;;  %v449_v8 = vsel %vm448_vm5, %v4024_v0, %v447_v35  ;;  %v2618_v54 = vpop.eup %2617 }
 0x1f3   :  { %v4144_v34 = vadd.f32 1.0, %v595_v37  ;;  %v4146_v60 = vadd.f32 1.0, %v2315_v24  ;;  %2627 = vrcp.f32 %v563_v51  ;;  %v503_v21 = vmul.f32 %v4112_v15, %v502_v19 }
 0x1f4   :  { %vm1124_vm7 = vweird.f32 %v4123_v42  ;;  %v1864_v44 = vand.u32 2147483647, %v4132_v25  ;;  %v1866_v20 = vand.u32 2147483648, %v4132_v25  ;;  %v4152_v48 = vsub.f32 1.0, %v594_v1 }
 0x1f5   :  { %v2620_v7 = vpop.eup %2619  ;;  %vm4155_vm8 = vcmp.eq.f32.partialorder %v1128_v14, 8.507059e+37  ;;  %v4159_v57 = vsub.f32 1.0, %v2314_v4  ;;  %2629 = vrcp.f32 %v562_v6  ;;  %v452_v56 = vsel %vm450_vm6, %v451_v59, %v449_v8 }
 0x1f6   :  { %v2622_v17 = vpop.eup %2621  ;;  %v1120_v41 = vmul.f32 %v2620_v7, %v4123_v42  ;;  %v1131_v28 = vor.u32 1.1754944e-38, %v1130_v11  ;;  %vm1860_vm9 = vweird.f32 %v4132_v25  ;;  %2631 = vrcp.f32 %v4152_v48 }
 0x1f7   :  { %v2624_v50 = vpop.eup %2623  ;;  %v1252_v58 = vmul.f32 0.6931472, %v2622_v17  ;;  %2633 = vrcp.f32 %v4159_v57  ;;  %v4168_v43 = vmul.f32 0.5, %v503_v21  ;;  %vm4171_vm10 = vcmp.eq.f32.partialorder %v1864_v44, 8.507059e+37 }
 0x1f8   :  { %v2626_v49 = vpop.eup %2625  ;;  %v1988_v16 = vmul.f32 0.6931472, %v2624_v50  ;;  %v1121_v52 = vsub.f32 1.0, %v1120_v41  ;;  %v4175_v29 = vmax.f32 %v452_v56, 1e-15  ;;  %2635 = vrsqrt.f32 %v4163_v31 }
 0x1f9   :  { %v1294_v39 = vmul.f32 0.5, %v1252_v58  ;;  %v1856_v0 = vmul.f32 %v2626_v49, %v4132_v25  ;;  %v4178_v22 = vpop.eup %2627  ;;  %vm1125_vm11 = vweird.f32 %v2620_v7  ;;  %v1867_v26 = vor.u32 1.1754944e-38, %v1866_v20 }
 0x1fa   :  { %v2030_v18 = vmul.f32 0.5, %v1988_v16  ;;  %v1122_v45 = vmul.f32 %v2620_v7, %v1121_v52  ;;  %v4180_v47 = vadd.f32 1.0, %v594_v1  ;;  %v4182_v53 = vadd.f32 1.0, %v2314_v4  ;;  %vm1126_vm12 = vmor %vm1124_vm7, %vm1125_vm11 }
 0x1fb   :  { %v1326_v51 = vmul.f32 2.0, %v1294_v39  ;;  %v1857_v5 = vsub.f32 1.0, %v1856_v0  ;;  %v4184_v23 = vpop.eup %2629  ;;  %v1113_v10 = vand.u32 2147483647, %v4152_v48  ;;  %v1115_v32 = vand.u32 2147483648, %v4152_v48 }
 0x1fc   :  { %v2094_v3 = vmul.f32 %v2618_v54, %v2030_v18  ;;  %v1123_v37 = vadd.f32 %v2620_v7, %v1122_v45  ;;  %v2632_v36 = vpop.eup %2631  ;;  %vm1861_vm13 = vweird.f32 %v2626_v49  ;;  %v593_v24 = vmin.f32 %v4175_v29, 0.99999 }
 0x1fd   :  { %v2163_v33 = vmul.f32 %v2866_v63, %v1326_v51  ;;  %v1858_v55 = vmul.f32 %v2626_v49, %v1857_v5  ;;  %v2634_v38 = vpop.eup %2633  ;;  %v1105_v61 = vmul.f32 %v2632_v36, %v4152_v48  ;;  %v2313_v46 = vclamps-f32 %v4175_v29, 0.9999999  ;;  %vm1862_vm14 = vmor %vm1860_vm9, %vm1861_vm13 }
 0x1fe   :  { %v2126_v62 = vmul.f32 %v2730_v30, %v2094_v3  ;;  %v1127_v40 = vsel %vm1126_vm12, %v2620_v7, %v1123_v37  ;;  %v4194_v2 = vpop.eup %2635  ;;  %v1841_v42 = vmul.f32 %v2634_v38, %v4159_v57  ;;  %v1849_v19 = vand.u32 2147483647, %v4159_v57 }
 0x1ff   :  { %v1132_v35 = vsel %vm4155_vm8, %v1131_v28, %v1127_v40  ;;  %v1859_v6 = vadd.f32 %v2626_v49, %v1858_v55  ;;  %v1106_v11 = vsub.f32 1.0, %v1105_v61  ;;  %v1851_v1 = vand.u32 2147483648, %v4159_v57 }
 0x200   :  { %v2195_v14 = vadd.f32 %v2163_v33, %v2126_v62  ;;  %v1133_v59 = vmul.f32 %v1132_v35, %v4144_v34  ;;  %vm1110_vm15 = vweird.f32 %v2632_v36  ;;  %v1842_v8 = vsub.f32 1.0, %v1841_v42 }
 0x201   :  { %v1863_v4 = vsel %vm1862_vm14, %v2626_v49, %v1859_v6  ;;  %v4205_v54 = vsub.f32 1.0, %v593_v24  ;;  %v1107_v7 = vmul.f32 %v2632_v36, %v1106_v11  ;;  %v4209_v44 = vsub.f32 1.0, %v2313_v46 }
 0x202   :  { %2227 = vst [vmem:[#allocation5 + $0xa8] sm:$0xff] %v2195_v14  ;;  %2637 = vlog2.f32 %v1133_v59  ;;  %v1868_v21 = vsel %vm4171_vm10, %v1867_v26, %v1863_v4  ;;  %v1843_v25 = vmul.f32 %v2634_v38, %v1842_v8  ;;  %vm1846_vm0 = vweird.f32 %v2634_v38 }
 0x203   :  { %v1869_v34 = vmul.f32 %v1868_v21, %v4146_v60  ;;  %2639 = vrcp.f32 %v4205_v54  ;;  %v1108_v20 = vadd.f32 %v2632_v36, %v1107_v7  ;;  %vm1109_vm1 = vweird.f32 %v4152_v48 }
 0x204   :  { %vm1114_vm2 = vcmp.eq.f32.partialorder %v1113_v10, 8.507059e+37  ;;  %2641 = vrcp.f32 %v4209_v44  ;;  %vm1111_vm3 = vmor %vm1109_vm1, %vm1110_vm15  ;;  %v1116_v17 = vor.u32 1.1754944e-38, %v1115_v32  ;;  %v1844_v41 = vadd.f32 %v2634_v38, %v1843_v25 }
 0x205   :  { %2643 = vlog2.f32 %v1869_v34  ;;  %vm1845_vm4 = vweird.f32 %v4159_v57  ;;  %vm508_vm5 = vcmp.eq.f32.partialorder %v4085_v27, inf  ;;  %v1112_v60 = vsel %vm1111_vm3, %v2632_v36, %v1108_v20  ;;  %v2731_v34 = vld [vmem:[#allocation2 + $0xd0] sm:$0xff] }
 0x206   :  { %vm1847_vm6 = vmor %vm1845_vm4, %vm1846_vm0  ;;  %vm1850_vm7 = vcmp.eq.f32.partialorder %v1849_v19, 8.507059e+37  ;;  %v1852_v13 = vor.u32 1.1754944e-38, %v1851_v1  ;;  %v1098_v56 = vand.u32 2147483647, %v4205_v54  ;;  %vm510_vm8 = vcmp.eq.f32.partialorder %v4085_v27, 0.0 }
 0x207   :  { %v1117_v48 = vsel %vm1114_vm2, %v1116_v17, %v1112_v60  ;;  %v1848_v50 = vsel %vm1847_vm6, %v2634_v38, %v1844_v41  ;;  %v4220_v58 = vadd.f32 1.0, %v593_v24  ;;  %v4222_v28 = vadd.f32 1.0, %v2313_v46  ;;  %v4250_v46 = vpop.xlane.xlu0 %143 }
 0x208   :  { %v2638_v49 = vpop.eup %2637  ;;  %v1118_v16 = vmul.f32 %v1117_v48, %v4180_v47  ;;  %v1853_v57 = vsel %vm1850_vm7, %v1852_v13, %v1848_v50  ;;  %vm1094_vm9 = vweird.f32 %v4205_v54  ;;  %v1100_v52 = vand.u32 2147483648, %v4205_v54 }
 0x209   :  { %v505_v39 = vsub.f32 1.5, %v4168_v43  ;;  %v2640_v0 = vpop.eup %2639  ;;  %v1262_v9 = vmul.f32 0.6931472, %v2638_v49  ;;  %v1854_v18 = vmul.f32 %v1853_v57, %v4182_v53  ;;  %vm1830_vm10 = vweird.f32 %v4209_v44 }
 0x20a   :  { %v1834_v45 = vand.u32 2147483647, %v4209_v44  ;;  %v490_v26 = vmul.f32 %v4194_v2, %v4163_v31  ;;  %v2642_v51 = vpop.eup %2641  ;;  %2645 = vlog2.f32 %v1118_v16  ;;  %v1090_v5 = vmul.f32 %v2640_v0, %v4205_v54 }
 0x20b   :  { %vm4234_vm11 = vcmp.eq.f32.partialorder %v1098_v56, 8.507059e+37  ;;  %v506_v43 = vmul.f32 %v4112_v15, %v505_v39  ;;  %v2644_v3 = vpop.eup %2643  ;;  %v1299_v37 = vmul.f32 0.5, %v1262_v9  ;;  %2647 = vlog2.f32 %v1854_v18 }
 0x20c   :  { %v1826_v53 = vmul.f32 %v2642_v51, %v4209_v44  ;;  %v1836_v10 = vand.u32 2147483648, %v4209_v44  ;;  %v1998_v32 = vmul.f32 0.6931472, %v2644_v3  ;;  %v1091_v36 = vsub.f32 1.0, %v1090_v5  ;;  %v4299_v3 = vpop.xlane.xlu1 %151 }
 0x20d   :  { %v1101_v33 = vor.u32 1.1754944e-38, %v1100_v52  ;;  %v507_v55 = vmul.f32 %v506_v43, %v4085_v27  ;;  %v1331_v24 = vmul.f32 2.0, %v1299_v37  ;;  %vm4242_vm12 = vcmp.eq.f32.partialorder %v1834_v45, 8.507059e+37 }
 0x20e   :  { %v1827_v38 = vsub.f32 1.0, %v1826_v53  ;;  %v491_v15 = vmul.f32 %v4194_v2, %v490_v26  ;;  %v2035_v62 = vmul.f32 0.5, %v1998_v32  ;;  %v1092_v40 = vmul.f32 %v2640_v0, %v1091_v36 }
 0x20f   :  { %vm1095_vm13 = vweird.f32 %v2640_v0  ;;  %v509_v61 = vsel %vm508_vm5, %v4085_v27, %v507_v55  ;;  %vm1831_vm14 = vweird.f32 %v2642_v51  ;;  %v1837_v6 = vor.u32 1.1754944e-38, %v1836_v10 }
 0x210   :  { %v1828_v35 = vmul.f32 %v2642_v51, %v1827_v38  ;;  %v512_v42 = vsel %vm510_vm8, %v511_v12, %v509_v61  ;;  %v2646_v19 = vpop.eup %2645  ;;  %v2099_v14 = vmul.f32 %v4178_v22, %v2035_v62  ;;  %v2168_v59 = vmul.f32 %v2866_v63, %v1331_v24  ;;  %vm1096_vm15 = vmor %vm1094_vm9, %vm1095_vm13 }
 0x211   :  { %v1093_v11 = vadd.f32 %v2640_v0, %v1092_v40  ;;  %v4258_v1 = vmax.f32 %v512_v42, 1e-15  ;;  %v2648_v4 = vpop.eup %2647  ;;  %v1260_v8 = vmul.f32 0.6931472, %v2646_v19  ;;  %v492_v7 = vmul.f32 0.5, %v491_v15  ;;  %vm1832_vm0 = vmor %vm1830_vm10, %vm1831_vm14 }
 0x212   :  { %v1829_v21 = vadd.f32 %v2642_v51, %v1828_v35  ;;  %2649 = vrsqrt.f32 %v4250_v46  ;;  %v2131_v27 = vmul.f32 %v2731_v34, %v2099_v14  ;;  %v1996_v12 = vmul.f32 0.6931472, %v2648_v4 }
 0x213   :  { %v1097_v25 = vsel %vm1096_vm15, %v2640_v0, %v1093_v11  ;;  %v598_v22 = vmin.f32 %v4258_v1, 0.99999  ;;  %v1298_v20 = vmul.f32 0.5, %v1260_v8  ;;  %v2318_v41 = vclamps-f32 %v4258_v1, 0.9999999  ;;  %v2732_v0 = vld [vmem:[#allocation2 + $0xc8] sm:$0xff] }
 0x214   :  { %v1102_v17 = vsel %vm4234_vm11, %v1101_v33, %v1097_v25  ;;  %v1833_v54 = vsel %vm1832_vm0, %v2642_v51, %v1829_v21  ;;  %v2200_v60 = vadd.f32 %v2168_v59, %v2131_v27  ;;  %v2034_v13 = vmul.f32 0.5, %v1996_v12  ;;  %v4306_v33 = vpop.xlane.xlu0 %149 }
 0x215   :  { %v1103_v56 = vmul.f32 %v1102_v17, %v4220_v58  ;;  %v1838_v48 = vsel %vm4242_vm12, %v1837_v6, %v1833_v54  ;;  %v1330_v50 = vmul.f32 2.0, %v1298_v20  ;;  %v4274_v49 = vsub.f32 1.0, %v598_v22 }
 0x216   :  { %v1839_v44 = vmul.f32 %v1838_v48, %v4222_v28  ;;  %2232 = vst [vmem:[#allocation5 + $0xd0] sm:$0xff] %v2200_v60  ;;  %v2098_v16 = vmul.f32 %v4184_v23, %v2034_v13  ;;  %v4279_v57 = vsub.f32 1.0, %v2318_v41  ;;  %v493_v52 = vsub.f32 1.5, %v492_v7  ;;  %v2733_v7 = vld [vmem:[#allocation2 + $0xc0] sm:$0xff] }
 0x217   :  { %2651 = vlog2.f32 %v1103_v56  ;;  %v2167_v58 = vmul.f32 %v2866_v63, %v1330_v50  ;;  %vm496_vm1 = vcmp.eq.f32.partialorder %v4163_v31, inf  ;;  %v4291_v26 = vadd.f32 1.0, %v598_v22 }
 0x218   :  { %v4281_v39 = vpop.eup %2649  ;;  %2653 = vlog2.f32 %v1839_v44  ;;  %v2130_v9 = vmul.f32 %v2732_v0, %v2098_v16  ;;  %v494_v23 = vmul.f32 %v4194_v2, %v493_v52  ;;  %vm498_vm2 = vcmp.eq.f32.partialorder %v4163_v31, 0.0 }
 0x219   :  { %2655 = vrcp.f32 %v4274_v49  ;;  %v478_v18 = vmul.f32 %v4281_v39, %v4250_v46  ;;  %v499_v5 = vand.u32 2147483648, %v4163_v31  ;;  %vm1169_vm3 = vweird.f32 %v4274_v49 }
 0x21a   :  { %2657 = vrcp.f32 %v4279_v57  ;;  %v2199_v28 = vadd.f32 %v2167_v58, %v2130_v9  ;;  %v495_v51 = vmul.f32 %v494_v23, %v4163_v31  ;;  %v1175_v10 = vand.u32 2147483648, %v4274_v49 }
 0x21b   :  { %2659 = vrcp.f32 %v4175_v29  ;;  %v1173_v29 = vand.u32 2147483647, %v4274_v49  ;;  %v479_v2 = vmul.f32 %v4281_v39, %v478_v18  ;;  %v1909_v32 = vand.u32 2147483647, %v4279_v57 }
 0x21c   :  { %2231 = vst [vmem:[#allocation5 + $0xc8] sm:$0xff] %v2199_v28  ;;  %v497_v36 = vsel %vm496_vm1, %v4163_v31, %v495_v51  ;;  %v1911_v30 = vand.u32 2147483648, %v4279_v57  ;;  %2661 = vrsqrt.f32 %v4299_v3  ;;  %v1176_v22 = vor.u32 1.1754944e-38, %v1175_v10 }
 0x21d   :  { %v2652_v45 = vpop.eup %2651  ;;  %v500_v15 = vsel %vm498_vm2, %v499_v5, %v497_v36  ;;  %v480_v19 = vmul.f32 0.5, %v479_v2  ;;  %2663 = vrsqrt.f32 %v4306_v33  ;;  %vm1905_vm6 = vweird.f32 %v4279_v57 }
 0x21e   :  { %v2654_v47 = vpop.eup %2653  ;;  %v1258_v43 = vmul.f32 0.6931472, %v2652_v45  ;;  %v4313_v61 = vmax.f32 %v500_v15, 1e-15  ;;  %vm1174_vm8 = vcmp.eq.f32.partialorder %v1173_v29, 8.507059e+37  ;;  %v1912_v50 = vor.u32 1.1754944e-38, %v1911_v30 }
 0x21f   :  { %v2656_v37 = vpop.eup %2655  ;;  %v1994_v53 = vmul.f32 0.6931472, %v2654_v47  ;;  %v481_v21 = vsub.f32 1.5, %v480_v19  ;;  %vm1910_vm10 = vcmp.eq.f32.partialorder %v1909_v32, 8.507059e+37  ;;  %vm484_vm11 = vcmp.eq.f32.partialorder %v4250_v46, inf }
 0x220   :  { %v2658_v55 = vpop.eup %2657  ;;  %v1297_v24 = vmul.f32 0.5, %v1258_v43  ;;  %v1165_v38 = vmul.f32 %v2656_v37, %v4274_v49  ;;  %v597_v11 = vmin.f32 %v4313_v61, 0.99999  ;;  %v2317_v31 = vclamps-f32 %v4313_v61, 0.9999999 }
 0x221   :  { %v2033_v62 = vmul.f32 0.5, %v1994_v53  ;;  %v1901_v40 = vmul.f32 %v2658_v55, %v4279_v57  ;;  %v2660_v35 = vpop.eup %2659  ;;  %vm1170_vm4 = vweird.f32 %v2656_v37  ;;  %vm1906_vm5 = vweird.f32 %v2658_v55 }
 0x222   :  { %v1329_v6 = vmul.f32 2.0, %v1297_v24  ;;  %v1166_v42 = vsub.f32 1.0, %v1165_v38  ;;  %v4320_v12 = vsub.f32 1.0, %v597_v11  ;;  %v4323_v20 = vsub.f32 1.0, %v2317_v31  ;;  %v4325_v17 = vpop.eup %2661  ;;  %vm1171_vm7 = vmor %vm1169_vm3, %vm1170_vm4 }
 0x223   :  { %v2097_v14 = vmul.f32 %v2660_v35, %v2033_v62  ;;  %v1902_v59 = vsub.f32 1.0, %v1901_v40  ;;  %v482_v13 = vmul.f32 %v4281_v39, %v481_v21  ;;  %v4331_v56 = vpop.eup %2663  ;;  %vm1907_vm9 = vmor %vm1905_vm6, %vm1906_vm5  ;;  %v1430_v49 = vadd.f32 1.0, %v2318_v41 }
 0x224   :  { %v2166_v4 = vmul.f32 %v2866_v63, %v1329_v6  ;;  %v1167_v8 = vmul.f32 %v2656_v37, %v1166_v42  ;;  %2665 = vrcp.f32 %v4320_v12  ;;  %vm486_vm12 = vcmp.eq.f32.partialorder %v4250_v46, 0.0 }
 0x225   :  { %v2129_v34 = vmul.f32 %v2733_v7, %v2097_v14  ;;  %v1903_v27 = vmul.f32 %v2658_v55, %v1902_v59  ;;  %2667 = vrcp.f32 %v4323_v20  ;;  %v483_v58 = vmul.f32 %v482_v13, %v4250_v46 }
 0x226   :  { %v1168_v25 = vadd.f32 %v2656_v37, %v1167_v8  ;;  %2669 = vrcp.f32 %v4258_v1  ;;  %v487_v0 = vand.u32 2147483648, %v4250_v46  ;;  %v1158_v9 = vand.u32 2147483647, %v4320_v12 }
 0x227   :  { %v2198_v54 = vadd.f32 %v2166_v4, %v2129_v34  ;;  %v1904_v60 = vadd.f32 %v2658_v55, %v1903_v27  ;;  %v1160_v41 = vand.u32 2147483648, %v4320_v12  ;;  %v526_v28 = vmul.f32 %v4325_v17, %v4299_v3 }
 0x228   :  { %v1172_v48 = vsel %vm1171_vm7, %v2656_v37, %v1168_v25  ;;  %v693_v18 = vadd.f32 1.0, %v597_v11  ;;  %v1429_v45 = vadd.f32 1.0, %v2317_v31  ;;  %v514_v43 = vmul.f32 %v4331_v56, %v4306_v33 }
 0x229   :  { %2230 = vst [vmem:[#allocation5 + $0xc0] sm:$0xff] %v2198_v54  ;;  %v1177_v44 = vsel %vm1174_vm8, %v1176_v22, %v1172_v48  ;;  %v1908_v16 = vsel %vm1907_vm9, %v2658_v55, %v1904_v60  ;;  %v527_v47 = vmul.f32 %v4325_v17, %v526_v28  ;;  %vm1154_vm13 = vweird.f32 %v4320_v12 }
 0x22a   :  { %v1178_v57 = vmul.f32 %v1177_v44, %v4291_v26  ;;  %v1913_v52 = vsel %vm1910_vm10, %v1912_v50, %v1908_v16  ;;  %v2666_v23 = vpop.eup %2665  ;;  %v485_v26 = vsel %vm484_vm11, %v4250_v46, %v483_v58  ;;  %vm1890_vm14 = vweird.f32 %v4323_v20 }
 0x22b   :  { %v1914_v39 = vmul.f32 %v1913_v52, %v1430_v49  ;;  %v2668_v51 = vpop.eup %2667  ;;  %v1150_v1 = vmul.f32 %v2666_v23, %v4320_v12  ;;  %v488_v5 = vsel %vm486_vm12, %v487_v0, %v485_v26  ;;  %vm4359_vm15 = vcmp.eq.f32.partialorder %v1158_v9, 8.507059e+37  ;;  %v2734_v49 = vld [vmem:[#allocation2 + $0xe8] sm:$0xff] }
 0x22c   :  { %2671 = vlog2.f32 %v1178_v57  ;;  %v1886_v29 = vmul.f32 %v2668_v51, %v4323_v20  ;;  %v4357_v2 = vmax.f32 %v488_v5, 1e-15  ;;  %v1161_v46 = vor.u32 1.1754944e-38, %v1160_v41  ;;  %v2670_v32 = vpop.eup %2669 }
 0x22d   :  { %2673 = vlog2.f32 %v1914_v39  ;;  %v1151_v37 = vsub.f32 1.0, %v1150_v1  ;;  %v1894_v10 = vand.u32 2147483647, %v4323_v20  ;;  %v1896_v55 = vand.u32 2147483648, %v4323_v20 }
 0x22e   :  { %v1887_v36 = vsub.f32 1.0, %v1886_v29  ;;  %v596_v24 = vmin.f32 %v4357_v2, 0.99999  ;;  %v2316_v38 = vclamps-f32 %v4357_v2, 0.9999999  ;;  %vm1155_vm0 = vweird.f32 %v2666_v23 }
 0x22f   :  { %v1152_v15 = vmul.f32 %v2666_v23, %v1151_v37  ;;  %v528_v62 = vmul.f32 0.5, %v527_v47  ;;  %v515_v40 = vmul.f32 %v4331_v56, %v514_v43  ;;  %vm1891_vm1 = vweird.f32 %v2668_v51  ;;  %vm1156_vm3 = vmor %vm1154_vm13, %vm1155_vm0 }
 0x230   :  { %v1888_v42 = vmul.f32 %v2668_v51, %v1887_v36  ;;  %v4368_v19 = vsub.f32 1.0, %v596_v24  ;;  %vm4370_vm2 = vcmp.eq.f32.partialorder %v1894_v10, 8.507059e+37  ;;  %v4374_v31 = vsub.f32 1.0, %v2316_v38  ;;  %vm1892_vm4 = vmor %vm1890_vm14, %vm1891_vm1 }
 0x231   :  { %v1153_v59 = vadd.f32 %v2666_v23, %v1152_v15  ;;  %v1897_v21 = vor.u32 1.1754944e-38, %v1896_v55  ;;  %v529_v27 = vsub.f32 1.5, %v528_v62  ;;  %vm532_vm5 = vcmp.eq.f32.partialorder %v4299_v3, inf }
 0x232   :  { %v2672_v30 = vpop.eup %2671  ;;  %v1889_v8 = vadd.f32 %v2668_v51, %v1888_v42  ;;  %2675 = vrcp.f32 %v4368_v19  ;;  %v516_v25 = vmul.f32 0.5, %v515_v40  ;;  %vm534_vm6 = vcmp.eq.f32.partialorder %v4299_v3, 0.0 }
 0x233   :  { %v2674_v35 = vpop.eup %2673  ;;  %v1268_v6 = vmul.f32 0.6931472, %v2672_v30  ;;  %v1157_v34 = vsel %vm1156_vm3, %v2666_v23, %v1153_v59  ;;  %2677 = vrcp.f32 %v4374_v31  ;;  %v535_v20 = vand.u32 2147483648, %v4299_v3 }
 0x234   :  { %v2004_v14 = vmul.f32 0.6931472, %v2674_v35  ;;  %v1162_v54 = vsel %vm4359_vm15, %v1161_v46, %v1157_v34  ;;  %v1893_v60 = vsel %vm1892_vm4, %v2668_v51, %v1889_v8  ;;  %vm520_vm7 = vcmp.eq.f32.partialorder %v4306_v33, inf }
 0x235   :  { %v1302_v4 = vmul.f32 0.5, %v1268_v6  ;;  %v1163_v13 = vmul.f32 %v1162_v54, %v693_v18  ;;  %v1898_v48 = vsel %vm4370_vm2, %v1897_v21, %v1893_v60  ;;  %vm522_vm8 = vcmp.eq.f32.partialorder %v4306_v33, 0.0 }
 0x236   :  { %v2038_v7 = vmul.f32 0.5, %v2004_v14  ;;  %v1899_v44 = vmul.f32 %v1898_v48, %v1429_v45  ;;  %v1143_v57 = vand.u32 2147483647, %v4368_v19  ;;  %v1145_v52 = vand.u32 2147483648, %v4368_v19 }
 0x237   :  { %v1334_v22 = vmul.f32 2.0, %v1302_v4  ;;  %2679 = vlog2.f32 %v1163_v13  ;;  %v530_v58 = vmul.f32 %v4325_v17, %v529_v27  ;;  %v517_v0 = vsub.f32 1.5, %v516_v25  ;;  %v2735_v25 = vld [vmem:[#allocation2 + $0xe0] sm:$0xff] }
 0x238   :  { %v2102_v12 = vmul.f32 %v2670_v32, %v2038_v7  ;;  %v2676_v39 = vpop.eup %2675  ;;  %2681 = vlog2.f32 %v1899_v44  ;;  %v523_v9 = vand.u32 2147483648, %v4306_v33  ;;  %v692_v28 = vadd.f32 1.0, %v596_v24 }
 0x239   :  { %v2171_v50 = vmul.f32 %v2866_v63, %v1334_v22  ;;  %2683 = vrcp.f32 %v4313_v61  ;;  %v1135_v23 = vmul.f32 %v2676_v39, %v4368_v19  ;;  %v2678_v18 = vpop.eup %2677  ;;  %vm1139_vm9 = vweird.f32 %v4368_v19 }
 0x23a   :  { %v2134_v16 = vmul.f32 %v2734_v49, %v2102_v12  ;;  %v1428_v45 = vadd.f32 1.0, %v2316_v38  ;;  %v531_v26 = vmul.f32 %v530_v58, %v4299_v3  ;;  %v518_v51 = vmul.f32 %v4331_v56, %v517_v0 }
 0x23b   :  { %v1136_v1 = vsub.f32 1.0, %v1135_v23  ;;  %vm4401_vm10 = vcmp.eq.f32.partialorder %v1143_v57, 8.507059e+37  ;;  %v1146_v5 = vor.u32 1.1754944e-38, %v1145_v52  ;;  %v1871_v61 = vmul.f32 %v2678_v18, %v4374_v31 }
 0x23c   :  { %v2203_v41 = vadd.f32 %v2171_v50, %v2134_v16  ;;  %v1879_v47 = vand.u32 2147483647, %v4374_v31  ;;  %v1881_v43 = vand.u32 2147483648, %v4374_v31  ;;  %v533_v29 = vsel %vm532_vm5, %v4299_v3, %v531_v26 }
 0x23d   :  { %v519_v37 = vmul.f32 %v518_v51, %v4306_v33  ;;  %v2680_v56 = vpop.eup %2679  ;;  %v1137_v53 = vmul.f32 %v2676_v39, %v1136_v1  ;;  %vm1140_vm11 = vweird.f32 %v2676_v39  ;;  %v1872_v46 = vsub.f32 1.0, %v1871_v61 }
 0x23e   :  { %2235 = vst [vmem:[#allocation5 + $0xe8] sm:$0xff] %v2203_v41  ;;  %v536_v10 = vsel %vm534_vm6, %v535_v20, %v533_v29  ;;  %v2682_v32 = vpop.eup %2681  ;;  %v1266_v36 = vmul.f32 0.6931472, %v2680_v56  ;;  %vm1876_vm12 = vweird.f32 %v2678_v18  ;;  %vm1141_vm13 = vmor %vm1139_vm9, %vm1140_vm11  ;;  %vm1875_vm14 = vweird.f32 %v4374_v31 }
 0x23f   :  { %v4414_v55 = vmax.f32 %v536_v10, 1e-15  ;;  %v521_v24 = vsel %vm520_vm7, %v4306_v33, %v519_v37  ;;  %v2684_v38 = vpop.eup %2683  ;;  %v2002_v30 = vmul.f32 0.6931472, %v2682_v32  ;;  %v1138_v15 = vadd.f32 %v2676_v39, %v1137_v53  ;;  %vm1877_vm15 = vmor %vm1875_vm14, %vm1876_vm12 }
 0x240   :  { %v1873_v62 = vmul.f32 %v2678_v18, %v1872_v46  ;;  %v524_v40 = vsel %vm522_vm8, %v523_v9, %v521_v24  ;;  %v1301_v35 = vmul.f32 0.5, %v1266_v36  ;;  %v1882_v3 = vor.u32 1.1754944e-38, %v1881_v43 }
 0x241   :  { %v600_v6 = vmin.f32 %v4414_v55, 0.99999  ;;  %v2037_v42 = vmul.f32 0.5, %v2002_v30  ;;  %v1142_v14 = vsel %vm1141_vm13, %v2676_v39, %v1138_v15  ;;  %v2320_v11 = vclamps-f32 %v4414_v55, 0.9999999  ;;  %v2736_v30 = vld [vmem:[#allocation2 + $0xd8] sm:$0xff] }
 0x242   :  { %v1874_v59 = vadd.f32 %v2678_v18, %v1873_v62  ;;  %v1333_v4 = vmul.f32 2.0, %v1301_v35  ;;  %v1147_v8 = vsel %vm4401_vm10, %v1146_v5, %v1142_v14  ;;  %v4429_v21 = vmax.f32 %v524_v40, 1e-15 }
 0x243   :  { %v728_v33 = vsub.f32 1.0, %v600_v6  ;;  %v2101_v19 = vmul.f32 %v2684_v38, %v2037_v42  ;;  %v1148_v7 = vmul.f32 %v1147_v8, %v692_v28  ;;  %vm1880_vm0 = vcmp.eq.f32.partialorder %v1879_v47, 8.507059e+37 }
 0x244   :  { %v1878_v31 = vsel %vm1877_vm15, %v2678_v18, %v1874_v59  ;;  %v2170_v34 = vmul.f32 %v2866_v63, %v1333_v4  ;;  %v1464_v60 = vsub.f32 1.0, %v2320_v11  ;;  %v599_v12 = vmin.f32 %v4429_v21, 0.99999 }
 0x245   :  { %v1883_v27 = vsel %vm1880_vm0, %v1882_v3, %v1878_v31  ;;  %2685 = vrcp.f32 %v728_v33  ;;  %v2133_v22 = vmul.f32 %v2735_v25, %v2101_v19  ;;  %v2319_v13 = vclamps-f32 %v4429_v21, 0.9999999 }
 0x246   :  { %2687 = vlog2.f32 %v1148_v7  ;;  %v1884_v54 = vmul.f32 %v1883_v27, %v1428_v45  ;;  %v4436_v20 = vsub.f32 1.0, %v599_v12  ;;  %v1203_v52 = vand.u32 2147483647, %v728_v33 }
 0x247   :  { %v2202_v48 = vadd.f32 %v2170_v34, %v2133_v22  ;;  %v4441_v44 = vsub.f32 1.0, %v2319_v13  ;;  %v1205_v39 = vand.u32 2147483648, %v728_v33  ;;  %v696_v0 = vadd.f32 1.0, %v600_v6 }
 0x248   :  { %2689 = vlog2.f32 %v1884_v54  ;;  %v1939_v41 = vand.u32 2147483647, %v1464_v60  ;;  %v1432_v18 = vadd.f32 1.0, %v2320_v11  ;;  %v1941_v45 = vand.u32 2147483648, %v1464_v60 }
 0x249   :  { %2691 = vrcp.f32 %v1464_v60  ;;  %2234 = vst [vmem:[#allocation5 + $0xe0] sm:$0xff] %v2202_v48  ;;  %vm1199_vm1 = vweird.f32 %v728_v33  ;;  %vm4445_vm3 = vcmp.eq.f32.partialorder %v1203_v52, 8.507059e+37  ;;  %v1206_v47 = vor.u32 1.1754944e-38, %v1205_v39 }
 0x24a   :  { %2693 = vrcp.f32 %v4357_v2  ;;  %vm1935_vm4 = vweird.f32 %v1464_v60  ;;  %vm4449_vm5 = vcmp.eq.f32.partialorder %v1939_v41, 8.507059e+37  ;;  %v1942_v10 = vor.u32 1.1754944e-38, %v1941_v45 }
 0x24b   :  { %v2686_v50 = vpop.eup %2685  ;;  %2695 = vrcp.f32 %v4436_v20  ;;  %vm1184_vm8 = vweird.f32 %v4436_v20  ;;  %v1188_v42 = vand.u32 2147483647, %v4436_v20  ;;  %v1190_v14 = vand.u32 2147483648, %v4436_v20 }
 0x24c   :  { %v2688_v49 = vpop.eup %2687  ;;  %v1195_v16 = vmul.f32 %v2686_v50, %v728_v33  ;;  %2697 = vrcp.f32 %v4441_v44  ;;  %vm1200_vm2 = vweird.f32 %v2686_v50  ;;  %v1924_v33 = vand.u32 2147483647, %v4441_v44 }
 0x24d   :  { %v1264_v57 = vmul.f32 0.6931472, %v2688_v49  ;;  %vm1201_vm6 = vmor %vm1199_vm1, %vm1200_vm2  ;;  %v1926_v19 = vand.u32 2147483648, %v4441_v44  ;;  %v695_v25 = vadd.f32 1.0, %v599_v12  ;;  %v1191_v22 = vor.u32 1.1754944e-38, %v1190_v14 }
 0x24e   :  { %v2690_v58 = vpop.eup %2689  ;;  %v1196_v9 = vsub.f32 1.0, %v1195_v16  ;;  %vm1189_vm13 = vcmp.eq.f32.partialorder %v1188_v42, 8.507059e+37  ;;  %vm1920_vm14 = vweird.f32 %v4441_v44  ;;  %v1431_v16 = vadd.f32 1.0, %v2319_v13 }
 0x24f   :  { %v2692_v28 = vpop.eup %2691  ;;  %v1300_v23 = vmul.f32 0.5, %v1264_v57  ;;  %v2000_v2 = vmul.f32 0.6931472, %v2690_v58  ;;  %vm1925_vm0 = vcmp.eq.f32.partialorder %v1924_v33, 8.507059e+37 }
 0x250   :  { %v1197_v26 = vmul.f32 %v2686_v50, %v1196_v9  ;;  %v1931_v51 = vmul.f32 %v2692_v28, %v1464_v60  ;;  %v2694_v1 = vpop.eup %2693  ;;  %vm1936_vm7 = vweird.f32 %v2692_v28 }
 0x251   :  { %v1332_v17 = vmul.f32 2.0, %v1300_v23  ;;  %v2036_v5 = vmul.f32 0.5, %v2000_v2  ;;  %v2696_v43 = vpop.eup %2695  ;;  %vm1937_vm9 = vmor %vm1935_vm4, %vm1936_vm7 }
 0x252   :  { %v1198_v29 = vadd.f32 %v2686_v50, %v1197_v26  ;;  %v1932_v37 = vsub.f32 1.0, %v1931_v51  ;;  %v1180_v32 = vmul.f32 %v2696_v43, %v4436_v20  ;;  %v2698_v36 = vpop.eup %2697  ;;  %vm1185_vm10 = vweird.f32 %v2696_v43 }
 0x253   :  { %v2100_v53 = vmul.f32 %v2694_v1, %v2036_v5  ;;  %v2169_v46 = vmul.f32 %v2866_v63, %v1332_v17  ;;  %v1916_v35 = vmul.f32 %v2698_v36, %v4441_v44  ;;  %vm1921_vm11 = vweird.f32 %v2698_v36  ;;  %vm1186_vm12 = vmor %vm1184_vm8, %vm1185_vm10  ;;  %v2737_v1 = vld [vmem:[#allocation2 + $0xf8] sm:$0xff] }
 0x254   :  { %v1202_v24 = vsel %vm1201_vm6, %v2686_v50, %v1198_v29  ;;  %v1933_v38 = vmul.f32 %v2692_v28, %v1932_v37  ;;  %v1181_v40 = vsub.f32 1.0, %v1180_v32  ;;  %vm1922_vm15 = vmor %vm1920_vm14, %vm1921_vm11  ;;  %v1927_v50 = vor.u32 1.1754944e-38, %v1926_v19 }
 0x255   :  { %v2132_v15 = vmul.f32 %v2736_v30, %v2100_v53  ;;  %v1207_v62 = vsel %vm4445_vm3, %v1206_v47, %v1202_v24  ;;  %v1917_v4 = vsub.f32 1.0, %v1916_v35 }
 0x256   :  { %v1208_v3 = vmul.f32 %v1207_v62, %v696_v0  ;;  %v1934_v6 = vadd.f32 %v2692_v28, %v1933_v38  ;;  %v1182_v11 = vmul.f32 %v2696_v43, %v1181_v40 }
 0x257   :  { %v2201_v59 = vadd.f32 %v2169_v46, %v2132_v15  ;;  %v1918_v34 = vmul.f32 %v2698_v36, %v1917_v4 }
 0x258   :  { %2699 = vlog2.f32 %v1208_v3  ;;  %v1938_v8 = vsel %vm1937_vm9, %v2692_v28, %v1934_v6  ;;  %v1183_v31 = vadd.f32 %v2696_v43, %v1182_v11 }
 0x259   :  { %2233 = vst [vmem:[#allocation5 + $0xd8] sm:$0xff] %v2201_v59  ;;  %v1943_v7 = vsel %vm4449_vm5, %v1942_v10, %v1938_v8  ;;  %v1919_v60 = vadd.f32 %v2698_v36, %v1918_v34 }
 0x25a   :  { %v1944_v27 = vmul.f32 %v1943_v7, %v1432_v18  ;;  %v1187_v54 = vsel %vm1186_vm12, %v2696_v43, %v1183_v31 }
 0x25b   :  { %v1192_v48 = vsel %vm1189_vm13, %v1191_v22, %v1187_v54  ;;  %v1923_v57 = vsel %vm1922_vm15, %v2698_v36, %v1919_v60 }
 0x25c   :  { %2701 = vlog2.f32 %v1944_v27  ;;  %v1193_v49 = vmul.f32 %v1192_v48, %v695_v25  ;;  %v1928_v52 = vsel %vm1925_vm0, %v1927_v50, %v1923_v57 }
 0x25d   :  { %v1929_v39 = vmul.f32 %v1928_v52, %v1431_v16 }
 0x25e   :  { %v2700_v12 = vpop.eup %2699  ;;  %2703 = vlog2.f32 %v1193_v49 }
 0x25f   :  { %v1272_v20 = vmul.f32 0.6931472, %v2700_v12  ;;  %2705 = vrcp.f32 %v4414_v55 }
 0x260   :  { %2707 = vlog2.f32 %v1929_v39 }
 0x261   :  { %v1304_v58 = vmul.f32 0.5, %v1272_v20  ;;  %2709 = vrcp.f32 %v4429_v21  ;;  %v2738_v21 = vld [vmem:[#allocation2 + $0xf0] sm:$0xff] }
 0x262   :  { %v2702_v44 = vpop.eup %2701 }
 0x263   :  { %v1336_v0 = vmul.f32 2.0, %v1304_v58  ;;  %v2008_v9 = vmul.f32 0.6931472, %v2702_v44 }
 0x264   :  { %v2704_v41 = vpop.eup %2703 }
 0x265   :  { %v2040_v28 = vmul.f32 0.5, %v2008_v9  ;;  %v2706_v23 = vpop.eup %2705  ;;  %v1270_v13 = vmul.f32 0.6931472, %v2704_v41  ;;  %v2173_v45 = vmul.f32 %v2866_v63, %v1336_v0 }
 0x266   :  { %v2708_v2 = vpop.eup %2707 }
 0x267   :  { %v2104_v18 = vmul.f32 %v2706_v23, %v2040_v28  ;;  %v1303_v26 = vmul.f32 0.5, %v1270_v13  ;;  %v2006_v51 = vmul.f32 0.6931472, %v2708_v2  ;;  %v2710_v61 = vpop.eup %2709 }
 0x269   :  { %v2136_v17 = vmul.f32 %v2737_v1, %v2104_v18  ;;  %v1335_v55 = vmul.f32 2.0, %v1303_v26  ;;  %v2039_v5 = vmul.f32 0.5, %v2006_v51 }
 0x26b   :  { %v2205_v47 = vadd.f32 %v2173_v45, %v2136_v17  ;;  %v2103_v43 = vmul.f32 %v2710_v61, %v2039_v5  ;;  %v2172_v29 = vmul.f32 %v2866_v63, %v1335_v55 }
 0x26d   :  { %2237 = vst [vmem:[#allocation5 + $0xf8] sm:$0xff] %v2205_v47  ;;  %v2135_v37 = vmul.f32 %v2738_v21, %v2103_v43 }
 0x26f   :  { %v2204_v56 = vadd.f32 %v2172_v29, %v2135_v37 }
 0x271   :  { %2236 = vst [vmem:[#allocation5 + $0xf0] sm:$0xff] %v2204_v56 }
 0x272   :  { %2250 = dma.vmem_to_hbm [thread:$0]  %s2243_s13, 4096, %s2245_s16, [#allocation4], %s2792_s11, %s2792_s11, %s2793_s12  }
 0x273   :  { %2789 = dma.done.wait [#allocation4], 4096  }
 0x274   :  { %2790 = vsyncadd [#allocation4], 4294963200 }
 0x275   :  { %2255 = vsyncpa [#allocation3], 1 }
 0x276   :  { %2256 = vsyncpa [#allocation4], 1 }

</bundles_post_ra>
